<compile_context>
chip_gen: v7x
topology: tpu7x:2x2x1
jax: 0.10.0
libtpu: 0.0.40
codegen_flags: <defaults>
</compile_context>

<pallas_src>
import functools

import jax
import jax.numpy as jnp
from jax.experimental import pallas as pl
from jax.experimental.pallas import tpu as pltpu


# ----------------------------------------------------------------------------
# Pallas kernel: one invocation runs all T decoding steps.
# ----------------------------------------------------------------------------
def decoder_kernel(emb_ref, h0_ref, c0_ref, ctxq_ref, ctxo_ref, mask_ref,
                   w_ih_ref, w_hh_ref, b_ref, w_out_b_ref,
                   out_ref, h_out_ref, c_out_ref, attn_ref,
                   *, num_layers, hidden_dim, seq_len):
    H = hidden_dim

    # ---- Hoisted, reused operands: loaded once, live in vregs across the unrolled loop ----
    ctx_q_t = ctxq_ref[...]        # (H, B*S)   (ctx @ W_in)^T flattened: scores projection
    ctx_out = ctxo_ref[...]        # (B*S, H)   ctx @ W_out_a^T: output projection of context
    mask = mask_ref[...]           # (B, B*S)   additive -1e30 cross-batch mask
    w_out_b = w_out_b_ref[...]     # (H, H)     acts on the top LSTM output
    w_ih = [w_ih_ref[l] for l in range(num_layers)]   # each (H, 4H), gate order [i,f,o,g*2]
    w_hh = [w_hh_ref[l] for l in range(num_layers)]   # each (H, 4H)
    bias = [b_ref[l] for l in range(num_layers)]      # each (B, 4H), pre-broadcast in wrapper

    # Carried LSTM state lives in values (vregs), not refs.
    h_state = [h0_ref[l] for l in range(num_layers)]
    c_state = [c0_ref[l] for l in range(num_layers)]

    attn_last = None
    for t in range(seq_len):                          # static unroll (T is small)
        x = emb_ref[t]                                # (B, E) == (B, H)

        # ---- StackedLSTM: one step through all layers ----
        for l in range(num_layers):
            gates = (jnp.dot(x, w_ih[l], preferred_element_type=jnp.float32)
                     + jnp.dot(h_state[l], w_hh[l], preferred_element_type=jnp.float32)
                     + bias[l])                       # (B, 4H), gate order [i, f, o, 2*g]
            s = jax.nn.sigmoid(gates)                 # single EUP dispatch over all 4H lanes
            i_g = s[:, 0:H]
            f_g = s[:, H:2 * H]
            o_g = s[:, 2 * H:3 * H]
            g_g = 2.0 * s[:, 3 * H:4 * H] - 1.0       # tanh(z) = 2*sigmoid(2z) - 1 (VPU fixup)
            c_new = f_g * c_state[l] + i_g * g_g
            h_new = o_g * jnp.tanh(c_new)
            h_state[l] = h_new
            c_state[l] = c_new
            x = h_new                                 # inter-layer dropout ratio == 0 -> identity

        # ---- GlobalAttention (Luong "general"): both contractions on the MXU ----
        scores = jnp.dot(x, ctx_q_t,
                         preferred_element_type=jnp.float32) + mask      # (B, B*S)
        m = jnp.max(scores, axis=-1, keepdims=True)
        e = jnp.exp(scores - m)                       # masked lanes -> exactly 0
        denom = jnp.sum(e, axis=-1, keepdims=True)    # (B, 1)
        inv = pl.reciprocal(denom, approx=True)       # EUP slot
        inv = inv * (2.0 - denom * inv)               # one Newton step -> full f32 accuracy
        attn_last = e * inv                           # (B, B*S), own-batch block = softmax
        ctx_part = jnp.dot(attn_last, ctx_out,
                           preferred_element_type=jnp.float32)           # (B, H)
        out = jnp.tanh(ctx_part
                       + jnp.dot(x, w_out_b, preferred_element_type=jnp.float32))

        # ---- outputs (outer dropout ratio == 0 -> identity) ----
        out_ref[t] = out.astype(out_ref.dtype)

    # Final state + last-step attention written once.
    for l in range(num_layers):
        h_out_ref[l] = h_state[l]
        c_out_ref[l] = c_state[l]
    attn_ref[...] = attn_last.astype(attn_ref.dtype)


# ----------------------------------------------------------------------------
# Wrapper
# ----------------------------------------------------------------------------
def decoder_forward(tokens, hidden_state, context, init_output, params):
    """tokens: (T, B) int32; hidden_state: (h0, c0) each (L, B, H);
    context: (S, B, H) (time-major, transposed inside like PyTorch); init_output: (B, H)."""
    del init_output  # only used when input_feed=True
    h0, c0 = hidden_state
    L, B, H = h0.shape
    T = tokens.shape[0]
    S = context.shape[0]

    # Glue: embedding lookup (gather) outside the kernel.
    embedded = params["embedding"][tokens]                        # (T, B, E)
    ctx_bt = jnp.transpose(context, (1, 0, 2))                    # (B, S, H)

    # --- LSTM parameters: gate-reordered [i,f,g,o]->[i,f,o,g], transposed, g-cols pre-scaled ---
    perm = jnp.concatenate([jnp.arange(0, H), jnp.arange(H, 2 * H),
                            jnp.arange(3 * H, 4 * H), jnp.arange(2 * H, 3 * H)])
    gate_scale = jnp.concatenate([jnp.ones((3 * H,), jnp.float32),
                                  jnp.full((H,), 2.0, jnp.float32)])      # tanh-via-sigmoid
    w_ih_t = jnp.transpose(params["w_ih"][:, perm, :], (0, 2, 1)) * gate_scale   # (L, H, 4H)
    w_hh_t = jnp.transpose(params["w_hh"][:, perm, :], (0, 2, 1)) * gate_scale   # (L, H, 4H)
    bias = (params["b_ih"] + params["b_hh"])[:, perm] * gate_scale               # (L, 4H)
    bias_b = jnp.broadcast_to(bias[:, None, :], (L, B, 4 * H))                   # (L, B, 4H)

    # --- Attention parameters folded into the (per-call constant) context ---
    ctx_q_t = (ctx_bt @ params["w_in"]).reshape(B * S, H).T                      # (H, B*S)
    ctx_out = (ctx_bt @ params["w_out"][:, :H].T).reshape(B * S, H)              # (B*S, H)
    w_out_b = params["w_out"][:, H:].T                                           # (H, H)

    # Additive cross-batch mask: column j belongs to batch row j // S.
    col_b = (jnp.arange(B * S) // S)[None, :]
    mask = jnp.where(col_b == jnp.arange(B)[:, None], 0.0, -1e30).astype(jnp.float32)

    kernel = functools.partial(decoder_kernel, num_layers=L, hidden_dim=H, seq_len=T)

    grid_spec = pltpu.PrefetchScalarGridSpec(
        num_scalar_prefetch=0,
        grid=(1,),                                                # single invocation; T loop in-kernel
        in_specs=[
            pl.BlockSpec((T, B, H), lambda i: (0, 0, 0)),          # embedded (VMEM-resident)
            pl.BlockSpec((L, B, H), lambda i: (0, 0, 0)),          # h0
            pl.BlockSpec((L, B, H), lambda i: (0, 0, 0)),          # c0
            pl.BlockSpec((H, B * S), lambda i: (0, 0)),            # ctx_q^T  (scores projection)
            pl.BlockSpec((B * S, H), lambda i: (0, 0)),            # ctx_out  (output projection)
            pl.BlockSpec((B, B * S), lambda i: (0, 0)),            # additive cross-batch mask
            pl.BlockSpec((L, H, 4 * H), lambda i: (0, 0, 0)),      # W_ih^T (reordered, scaled)
            pl.BlockSpec((L, H, 4 * H), lambda i: (0, 0, 0)),      # W_hh^T (reordered, scaled)
            pl.BlockSpec((L, B, 4 * H), lambda i: (0, 0, 0)),      # fused bias, pre-broadcast
            pl.BlockSpec((H, H), lambda i: (0, 0)),                # W_out_b^T
        ],
        out_specs=[
            pl.BlockSpec((T, B, H), lambda i: (0, 0, 0)),          # outputs (one bulk writeback)
            pl.BlockSpec((L, B, H), lambda i: (0, 0, 0)),          # h_T
            pl.BlockSpec((L, B, H), lambda i: (0, 0, 0)),          # c_T
            pl.BlockSpec((B, B * S), lambda i: (0, 0)),            # attn of last step (masked-flat)
        ],
    )

    outputs, h_out, c_out, attn_full = pl.pallas_call(
        kernel,
        grid_spec=grid_spec,
        out_shape=(
            jax.ShapeDtypeStruct((T, B, H), jnp.float32),
            jax.ShapeDtypeStruct((L, B, H), jnp.float32),
            jax.ShapeDtypeStruct((L, B, H), jnp.float32),
            jax.ShapeDtypeStruct((B, B * S), jnp.float32),
        ),
        compiler_params=pltpu.CompilerParams(
            dimension_semantics=("arbitrary",)),
    )(embedded, h0, c0, ctx_q_t, ctx_out, mask, w_ih_t, w_hh_t, bias_b, w_out_b)

    # Extract the own-batch block (diagonal of the (B, B, S) view) -> (B, S).
    attn = attn_full.reshape(B, B, S)[jnp.arange(B), jnp.arange(B)]
    return outputs, (h_out, c_out), attn


# ----------------------------------------------------------------------------
# Pure-JAX reference (mirrors the PyTorch forward) for a correctness check.
# ----------------------------------------------------------------------------
def decoder_reference(tokens, hidden_state, context, init_output, params):
    h, c = hidden_state
    L, B, H = h.shape
    embedded = params["embedding"][tokens]
    ctx_bt = jnp.transpose(context, (1, 0, 2))
    outputs = []
    attn = None
    for t in range(tokens.shape[0]):
        x = embedded[t]
        new_h, new_c = [], []
        for layer in range(L):
            gates = (x @ params["w_ih"][layer].T + params["b_ih"][layer]
                     + h[layer] @ params["w_hh"][layer].T + params["b_hh"][layer])
            i_g = jax.nn.sigmoid(gates[:, 0 * H:1 * H])
            f_g = jax.nn.sigmoid(gates[:, 1 * H:2 * H])
            g_g = jnp.tanh(gates[:, 2 * H:3 * H])
            o_g = jax.nn.sigmoid(gates[:, 3 * H:4 * H])
            c_i = f_g * c[layer] + i_g * g_g
            h_i = o_g * jnp.tanh(c_i)
            new_h.append(h_i)
            new_c.append(c_i)
            x = h_i
        h = jnp.stack(new_h)
        c = jnp.stack(new_c)
        q = x @ params["w_in"].T
        scores = jnp.einsum("bsh,bh->bs", ctx_bt, q)
        attn = jax.nn.softmax(scores, axis=-1)
        weighted = jnp.einsum("bs,bsh->bh", attn, ctx_bt)
        out = jnp.tanh(jnp.concatenate([weighted, x], axis=-1) @ params["w_out"].T)
        outputs.append(out)
    return jnp.stack(outputs), (h, c), attn


# ----------------------------------------------------------------------------
# Main
# ----------------------------------------------------------------------------
if __name__ == "__main__":
    # Small shapes: T(seq)=8, B(batch)=2, S(src len)=8, H=E=32, L=2, V=20
    T, B, S, H, L, V = 8, 2, 8, 32, 2, 20
    E = H  # required by input_feed=False

    key = jax.random.PRNGKey(0)
    ks = jax.random.split(key, 12)

    scale = 0.1
    emb_table = scale * jax.random.normal(ks[0], (V, E), jnp.float32)
    emb_table = emb_table.at[0].set(0.0)  # padding_idx = PAD_ID = 0
    params = {
        "embedding": emb_table,
        "w_ih": scale * jax.random.normal(ks[1], (L, 4 * H, H), jnp.float32),
        "w_hh": scale * jax.random.normal(ks[2], (L, 4 * H, H), jnp.float32),
        "b_ih": scale * jax.random.normal(ks[3], (L, 4 * H), jnp.float32),
        "b_hh": scale * jax.random.normal(ks[4], (L, 4 * H), jnp.float32),
        "w_in": scale * jax.random.normal(ks[5], (H, H), jnp.float32),       # linear_in (no bias)
        "w_out": scale * jax.random.normal(ks[6], (H, 2 * H), jnp.float32),  # linear_out (no bias)
    }

    tokens = jax.random.randint(ks[7], (T, B), 0, V, jnp.int32)
    h0 = scale * jax.random.normal(ks[8], (L, B, H), jnp.float32)
    c0 = scale * jax.random.normal(ks[9], (L, B, H), jnp.float32)
    context = scale * jax.random.normal(ks[10], (S, B, H), jnp.float32)
    init_output = jnp.zeros((B, H), jnp.float32)  # unused when input_feed=False

    outputs, (h_T, c_T), attn = decoder_forward(
        tokens, (h0, c0), context, init_output, params)
    jax.block_until_ready((outputs, h_T, c_T, attn))

    # Verify against the pure-JAX reference of the PyTorch forward.
    ref_out, (ref_h, ref_c), ref_attn = decoder_reference(
        tokens, (h0, c0), context, init_output, params)
    assert jnp.allclose(outputs, ref_out, atol=1e-4, rtol=1e-4)
    assert jnp.allclose(h_T, ref_h, atol=1e-4, rtol=1e-4)
    assert jnp.allclose(c_T, ref_c, atol=1e-4, rtol=1e-4)
    assert jnp.allclose(attn, ref_attn, atol=1e-4, rtol=1e-4)

    print("KERNEL_OK")
</pallas_src>

<mosaic_0001>
module attributes {stable_mosaic.version = 11 : i64} {
  func.func @decoder_kernel(%arg0: i32, %arg1: memref<8x2x32xf32, #tpu.memory_space<vmem>>, %arg2: memref<2x2x32xf32, #tpu.memory_space<vmem>>, %arg3: memref<2x2x32xf32, #tpu.memory_space<vmem>>, %arg4: memref<32x16xf32, #tpu.memory_space<vmem>>, %arg5: memref<16x32xf32, #tpu.memory_space<vmem>>, %arg6: memref<2x16xf32, #tpu.memory_space<vmem>>, %arg7: memref<2x32x128xf32, #tpu.memory_space<vmem>>, %arg8: memref<2x32x128xf32, #tpu.memory_space<vmem>>, %arg9: memref<2x2x128xf32, #tpu.memory_space<vmem>>, %arg10: memref<32x32xf32, #tpu.memory_space<vmem>>, %arg11: memref<8x2x32xf32, #tpu.memory_space<vmem>>, %arg12: memref<2x2x32xf32, #tpu.memory_space<vmem>>, %arg13: memref<2x2x32xf32, #tpu.memory_space<vmem>>, %arg14: memref<2x16xf32, #tpu.memory_space<vmem>>) attributes {dimension_semantics = [#tpu.dimension_semantics<arbitrary>], iteration_bounds = array<i64: 1>, scalar_prefetch = 0 : i64, scratch_operands = 0 : i64, tpu.core_type = #tpu.core_type<tc>, window_params = [{pipeline_mode = #tpu.pipeline_mode<synchronous>, transform_indices = @transform_0, window_bounds = array<i64: 8, 2, 32>}, {pipeline_mode = #tpu.pipeline_mode<synchronous>, transform_indices = @transform_1, window_bounds = array<i64: 2, 2, 32>}, {pipeline_mode = #tpu.pipeline_mode<synchronous>, transform_indices = @transform_2, window_bounds = array<i64: 2, 2, 32>}, {pipeline_mode = #tpu.pipeline_mode<synchronous>, transform_indices = @transform_3, window_bounds = array<i64: 32, 16>}, {pipeline_mode = #tpu.pipeline_mode<synchronous>, transform_indices = @transform_4, window_bounds = array<i64: 16, 32>}, {pipeline_mode = #tpu.pipeline_mode<synchronous>, transform_indices = @transform_5, window_bounds = array<i64: 2, 16>}, {pipeline_mode = #tpu.pipeline_mode<synchronous>, transform_indices = @transform_6, window_bounds = array<i64: 2, 32, 128>}, {pipeline_mode = #tpu.pipeline_mode<synchronous>, transform_indices = @transform_7, window_bounds = array<i64: 2, 32, 128>}, {pipeline_mode = #tpu.pipeline_mode<synchronous>, transform_indices = @transform_8, window_bounds = array<i64: 2, 2, 128>}, {pipeline_mode = #tpu.pipeline_mode<synchronous>, transform_indices = @transform_9, window_bounds = array<i64: 32, 32>}, {pipeline_mode = #tpu.pipeline_mode<synchronous>, transform_indices = @transform_10, window_bounds = array<i64: 8, 2, 32>}, {pipeline_mode = #tpu.pipeline_mode<synchronous>, transform_indices = @transform_11, window_bounds = array<i64: 2, 2, 32>}, {pipeline_mode = #tpu.pipeline_mode<synchronous>, transform_indices = @transform_12, window_bounds = array<i64: 2, 2, 32>}, {pipeline_mode = #tpu.pipeline_mode<synchronous>, transform_indices = @transform_13, window_bounds = array<i64: 2, 16>}]} {
    %c0 = arith.constant 0 : index
    %c0_0 = arith.constant 0 : index
    %0 = vector.load %arg4[%c0, %c0_0] : memref<32x16xf32, #tpu.memory_space<vmem>>, vector<32x16xf32>
    %c0_1 = arith.constant 0 : index
    %c0_2 = arith.constant 0 : index
    %1 = vector.load %arg5[%c0_1, %c0_2] : memref<16x32xf32, #tpu.memory_space<vmem>>, vector<16x32xf32>
    %c0_3 = arith.constant 0 : index
    %c0_4 = arith.constant 0 : index
    %2 = vector.load %arg6[%c0_3, %c0_4] : memref<2x16xf32, #tpu.memory_space<vmem>>, vector<2x16xf32>
    %c0_5 = arith.constant 0 : index
    %c0_6 = arith.constant 0 : index
    %3 = vector.load %arg10[%c0_5, %c0_6] : memref<32x32xf32, #tpu.memory_space<vmem>>, vector<32x32xf32>
    %c0_7 = arith.constant 0 : index
    %c0_8 = arith.constant 0 : index
    %c0_9 = arith.constant 0 : index
    %4 = vector.load %arg7[%c0_7, %c0_8, %c0_9] : memref<2x32x128xf32, #tpu.memory_space<vmem>>, vector<1x32x128xf32>
    %5 = vector.shape_cast %4 : vector<1x32x128xf32> to vector<32x128xf32>
    %c1 = arith.constant 1 : index
    %c0_10 = arith.constant 0 : index
    %c0_11 = arith.constant 0 : index
    %6 = vector.load %arg7[%c1, %c0_10, %c0_11] : memref<2x32x128xf32, #tpu.memory_space<vmem>>, vector<1x32x128xf32>
    %7 = vector.shape_cast %6 : vector<1x32x128xf32> to vector<32x128xf32>
    %c0_12 = arith.constant 0 : index
    %c0_13 = arith.constant 0 : index
    %c0_14 = arith.constant 0 : index
    %8 = vector.load %arg8[%c0_12, %c0_13, %c0_14] : memref<2x32x128xf32, #tpu.memory_space<vmem>>, vector<1x32x128xf32>
    %9 = vector.shape_cast %8 : vector<1x32x128xf32> to vector<32x128xf32>
    %c1_15 = arith.constant 1 : index
    %c0_16 = arith.constant 0 : index
    %c0_17 = arith.constant 0 : index
    %10 = vector.load %arg8[%c1_15, %c0_16, %c0_17] : memref<2x32x128xf32, #tpu.memory_space<vmem>>, vector<1x32x128xf32>
    %11 = vector.shape_cast %10 : vector<1x32x128xf32> to vector<32x128xf32>
    %c0_18 = arith.constant 0 : index
    %c0_19 = arith.constant 0 : index
    %c0_20 = arith.constant 0 : index
    %12 = vector.load %arg9[%c0_18, %c0_19, %c0_20] : memref<2x2x128xf32, #tpu.memory_space<vmem>>, vector<1x2x128xf32>
    %13 = vector.shape_cast %12 : vector<1x2x128xf32> to vector<2x128xf32>
    %c1_21 = arith.constant 1 : index
    %c0_22 = arith.constant 0 : index
    %c0_23 = arith.constant 0 : index
    %14 = vector.load %arg9[%c1_21, %c0_22, %c0_23] : memref<2x2x128xf32, #tpu.memory_space<vmem>>, vector<1x2x128xf32>
    %15 = vector.shape_cast %14 : vector<1x2x128xf32> to vector<2x128xf32>
    %c0_24 = arith.constant 0 : index
    %c0_25 = arith.constant 0 : index
    %c0_26 = arith.constant 0 : index
    %16 = vector.load %arg2[%c0_24, %c0_25, %c0_26] : memref<2x2x32xf32, #tpu.memory_space<vmem>>, vector<1x2x32xf32>
    %17 = vector.shape_cast %16 : vector<1x2x32xf32> to vector<2x32xf32>
    %c1_27 = arith.constant 1 : index
    %c0_28 = arith.constant 0 : index
    %c0_29 = arith.constant 0 : index
    %18 = vector.load %arg2[%c1_27, %c0_28, %c0_29] : memref<2x2x32xf32, #tpu.memory_space<vmem>>, vector<1x2x32xf32>
    %19 = vector.shape_cast %18 : vector<1x2x32xf32> to vector<2x32xf32>
    %c0_30 = arith.constant 0 : index
    %c0_31 = arith.constant 0 : index
    %c0_32 = arith.constant 0 : index
    %20 = vector.load %arg3[%c0_30, %c0_31, %c0_32] : memref<2x2x32xf32, #tpu.memory_space<vmem>>, vector<1x2x32xf32>
    %21 = vector.shape_cast %20 : vector<1x2x32xf32> to vector<2x32xf32>
    %c1_33 = arith.constant 1 : index
    %c0_34 = arith.constant 0 : index
    %c0_35 = arith.constant 0 : index
    %22 = vector.load %arg3[%c1_33, %c0_34, %c0_35] : memref<2x2x32xf32, #tpu.memory_space<vmem>>, vector<1x2x32xf32>
    %23 = vector.shape_cast %22 : vector<1x2x32xf32> to vector<2x32xf32>
    %c0_36 = arith.constant 0 : index
    %c0_37 = arith.constant 0 : index
    %c0_38 = arith.constant 0 : index
    %24 = vector.load %arg1[%c0_36, %c0_37, %c0_38] : memref<8x2x32xf32, #tpu.memory_space<vmem>>, vector<1x2x32xf32>
    %25 = vector.shape_cast %24 : vector<1x2x32xf32> to vector<2x32xf32>
    %cst = arith.constant dense<0.000000e+00> : vector<2x128xf32>
    %26 = tpu.matmul %25, %5, %cst {dimension_numbers = #tpu.dot_dimension_numbers<[1], [0], [0], [1], [0, 0, 1, 1], [], []>} : vector<2x32xf32>, vector<32x128xf32>, vector<2x128xf32> -> vector<2x128xf32>
    %cst_39 = arith.constant dense<0.000000e+00> : vector<2x128xf32>
    %27 = tpu.matmul %17, %9, %cst_39 {dimension_numbers = #tpu.dot_dimension_numbers<[1], [0], [0], [1], [0, 0, 1, 1], [], []>} : vector<2x32xf32>, vector<32x128xf32>, vector<2x128xf32> -> vector<2x128xf32>
    %28 = arith.addf %26, %27 : vector<2x128xf32>
    %29 = arith.addf %28, %13 : vector<2x128xf32>
    %30 = arith.negf %29 : vector<2x128xf32>
    %31 = math.exp %30 : vector<2x128xf32>
    %cst_40 = arith.constant 1.000000e+00 : f32
    %32 = vector.broadcast %cst_40 : f32 to vector<2x128xf32>
    %33 = arith.addf %32, %31 : vector<2x128xf32>
    %34 = arith.divf %32, %33 : vector<2x128xf32>
    %35 = vector.extract_strided_slice %34 {offsets = [0, 0], sizes = [2, 32], strides = [1, 1]} : vector<2x128xf32> to vector<2x32xf32>
    %36 = vector.extract_strided_slice %34 {offsets = [0, 32], sizes = [2, 32], strides = [1, 1]} : vector<2x128xf32> to vector<2x32xf32>
    %37 = vector.extract_strided_slice %34 {offsets = [0, 64], sizes = [2, 32], strides = [1, 1]} : vector<2x128xf32> to vector<2x32xf32>
    %38 = vector.extract_strided_slice %34 {offsets = [0, 96], sizes = [2, 32], strides = [1, 1]} : vector<2x128xf32> to vector<2x32xf32>
    %cst_41 = arith.constant 2.000000e+00 : f32
    %39 = vector.broadcast %cst_41 : f32 to vector<2x32xf32>
    %40 = arith.mulf %39, %38 : vector<2x32xf32>
    %cst_42 = arith.constant 1.000000e+00 : f32
    %41 = vector.broadcast %cst_42 : f32 to vector<2x32xf32>
    %42 = arith.subf %40, %41 : vector<2x32xf32>
    %43 = arith.mulf %36, %21 : vector<2x32xf32>
    %44 = arith.mulf %35, %42 : vector<2x32xf32>
    %45 = arith.addf %43, %44 : vector<2x32xf32>
    %46 = math.tanh %45 : vector<2x32xf32>
    %47 = arith.mulf %37, %46 : vector<2x32xf32>
    %cst_43 = arith.constant dense<0.000000e+00> : vector<2x128xf32>
    %48 = tpu.matmul %47, %7, %cst_43 {dimension_numbers = #tpu.dot_dimension_numbers<[1], [0], [0], [1], [0, 0, 1, 1], [], []>} : vector<2x32xf32>, vector<32x128xf32>, vector<2x128xf32> -> vector<2x128xf32>
    %cst_44 = arith.constant dense<0.000000e+00> : vector<2x128xf32>
    %49 = tpu.matmul %19, %11, %cst_44 {dimension_numbers = #tpu.dot_dimension_numbers<[1], [0], [0], [1], [0, 0, 1, 1], [], []>} : vector<2x32xf32>, vector<32x128xf32>, vector<2x128xf32> -> vector<2x128xf32>
    %50 = arith.addf %48, %49 : vector<2x128xf32>
    %51 = arith.addf %50, %15 : vector<2x128xf32>
    %52 = arith.negf %51 : vector<2x128xf32>
    %53 = math.exp %52 : vector<2x128xf32>
    %cst_45 = arith.constant 1.000000e+00 : f32
    %54 = vector.broadcast %cst_45 : f32 to vector<2x128xf32>
    %55 = arith.addf %54, %53 : vector<2x128xf32>
    %56 = arith.divf %54, %55 : vector<2x128xf32>
    %57 = vector.extract_strided_slice %56 {offsets = [0, 0], sizes = [2, 32], strides = [1, 1]} : vector<2x128xf32> to vector<2x32xf32>
    %58 = vector.extract_strided_slice %56 {offsets = [0, 32], sizes = [2, 32], strides = [1, 1]} : vector<2x128xf32> to vector<2x32xf32>
    %59 = vector.extract_strided_slice %56 {offsets = [0, 64], sizes = [2, 32], strides = [1, 1]} : vector<2x128xf32> to vector<2x32xf32>
    %60 = vector.extract_strided_slice %56 {offsets = [0, 96], sizes = [2, 32], strides = [1, 1]} : vector<2x128xf32> to vector<2x32xf32>
    %cst_46 = arith.constant 2.000000e+00 : f32
    %61 = vector.broadcast %cst_46 : f32 to vector<2x32xf32>
    %62 = arith.mulf %61, %60 : vector<2x32xf32>
    %cst_47 = arith.constant 1.000000e+00 : f32
    %63 = vector.broadcast %cst_47 : f32 to vector<2x32xf32>
    %64 = arith.subf %62, %63 : vector<2x32xf32>
    %65 = arith.mulf %58, %23 : vector<2x32xf32>
    %66 = arith.mulf %57, %64 : vector<2x32xf32>
    %67 = arith.addf %65, %66 : vector<2x32xf32>
    %68 = math.tanh %67 : vector<2x32xf32>
    %69 = arith.mulf %59, %68 : vector<2x32xf32>
    %cst_48 = arith.constant dense<0.000000e+00> : vector<2x16xf32>
    %70 = tpu.matmul %69, %0, %cst_48 {dimension_numbers = #tpu.dot_dimension_numbers<[1], [0], [0], [1], [0, 0, 1, 1], [], []>} : vector<2x32xf32>, vector<32x16xf32>, vector<2x16xf32> -> vector<2x16xf32>
    %71 = arith.addf %70, %2 : vector<2x16xf32>
    %cst_49 = arith.constant dense<0xFF800000> : vector<2xf32>
    %72 = vector.multi_reduction <maximumf>, %71, %cst_49 [1] : vector<2x16xf32> to vector<2xf32>
    %73 = vector.shape_cast %72 : vector<2xf32> to vector<2x1xf32>
    %74 = vector.broadcast %73 : vector<2x1xf32> to vector<2x16xf32>
    %75 = arith.subf %71, %74 : vector<2x16xf32>
    %76 = math.exp %75 : vector<2x16xf32>
    %cst_50 = arith.constant dense<0.000000e+00> : vector<2xf32>
    %77 = vector.multi_reduction <add>, %76, %cst_50 [1] : vector<2x16xf32> to vector<2xf32>
    %78 = vector.shape_cast %77 : vector<2xf32> to vector<2x1xf32>
    %79 = tpu.reciprocal %78 {approx = true} : vector<2x1xf32> -> vector<2x1xf32>
    %80 = arith.mulf %78, %79 : vector<2x1xf32>
    %cst_51 = arith.constant 2.000000e+00 : f32
    %81 = vector.broadcast %cst_51 : f32 to vector<2x1xf32>
    %82 = arith.subf %81, %80 : vector<2x1xf32>
    %83 = arith.mulf %79, %82 : vector<2x1xf32>
    %84 = vector.broadcast %83 : vector<2x1xf32> to vector<2x16xf32>
    %85 = arith.mulf %76, %84 : vector<2x16xf32>
    %cst_52 = arith.constant dense<0.000000e+00> : vector<2x32xf32>
    %86 = tpu.matmul %85, %1, %cst_52 {dimension_numbers = #tpu.dot_dimension_numbers<[1], [0], [0], [1], [0, 0, 1, 1], [], []>} : vector<2x16xf32>, vector<16x32xf32>, vector<2x32xf32> -> vector<2x32xf32>
    %cst_53 = arith.constant dense<0.000000e+00> : vector<2x32xf32>
    %87 = tpu.matmul %69, %3, %cst_53 {dimension_numbers = #tpu.dot_dimension_numbers<[1], [0], [0], [1], [0, 0, 1, 1], [], []>} : vector<2x32xf32>, vector<32x32xf32>, vector<2x32xf32> -> vector<2x32xf32>
    %88 = arith.addf %86, %87 : vector<2x32xf32>
    %89 = math.tanh %88 : vector<2x32xf32>
    %c0_54 = arith.constant 0 : index
    %c0_55 = arith.constant 0 : index
    %c0_56 = arith.constant 0 : index
    %90 = vector.load %arg11[%c0_54, %c0_55, %c0_56] : memref<8x2x32xf32, #tpu.memory_space<vmem>>, vector<1x2x32xf32>
    %91 = vector.shape_cast %90 : vector<1x2x32xf32> to vector<2x32xf32>
    %92 = vector.shape_cast %89 : vector<2x32xf32> to vector<1x2x32xf32>
    tpu.vector_store %arg11[%c0_54, %c0_55, %c0_56], %92 {strides = array<i32>} : memref<8x2x32xf32, #tpu.memory_space<vmem>>, vector<1x2x32xf32>,
    %c1_57 = arith.constant 1 : index
    %c0_58 = arith.constant 0 : index
    %c0_59 = arith.constant 0 : index
    %93 = vector.load %arg1[%c1_57, %c0_58, %c0_59] : memref<8x2x32xf32, #tpu.memory_space<vmem>>, vector<1x2x32xf32>
    %94 = vector.shape_cast %93 : vector<1x2x32xf32> to vector<2x32xf32>
    %cst_60 = arith.constant dense<0.000000e+00> : vector<2x128xf32>
    %95 = tpu.matmul %94, %5, %cst_60 {dimension_numbers = #tpu.dot_dimension_numbers<[1], [0], [0], [1], [0, 0, 1, 1], [], []>} : vector<2x32xf32>, vector<32x128xf32>, vector<2x128xf32> -> vector<2x128xf32>
    %cst_61 = arith.constant dense<0.000000e+00> : vector<2x128xf32>
    %96 = tpu.matmul %47, %9, %cst_61 {dimension_numbers = #tpu.dot_dimension_numbers<[1], [0], [0], [1], [0, 0, 1, 1], [], []>} : vector<2x32xf32>, vector<32x128xf32>, vector<2x128xf32> -> vector<2x128xf32>
    %97 = arith.addf %95, %96 : vector<2x128xf32>
    %98 = arith.addf %97, %13 : vector<2x128xf32>
    %99 = arith.negf %98 : vector<2x128xf32>
    %100 = math.exp %99 : vector<2x128xf32>
    %cst_62 = arith.constant 1.000000e+00 : f32
    %101 = vector.broadcast %cst_62 : f32 to vector<2x128xf32>
    %102 = arith.addf %101, %100 : vector<2x128xf32>
    %103 = arith.divf %101, %102 : vector<2x128xf32>
    %104 = vector.extract_strided_slice %103 {offsets = [0, 0], sizes = [2, 32], strides = [1, 1]} : vector<2x128xf32> to vector<2x32xf32>
    %105 = vector.extract_strided_slice %103 {offsets = [0, 32], sizes = [2, 32], strides = [1, 1]} : vector<2x128xf32> to vector<2x32xf32>
    %106 = vector.extract_strided_slice %103 {offsets = [0, 64], sizes = [2, 32], strides = [1, 1]} : vector<2x128xf32> to vector<2x32xf32>
    %107 = vector.extract_strided_slice %103 {offsets = [0, 96], sizes = [2, 32], strides = [1, 1]} : vector<2x128xf32> to vector<2x32xf32>
    %cst_63 = arith.constant 2.000000e+00 : f32
    %108 = vector.broadcast %cst_63 : f32 to vector<2x32xf32>
    %109 = arith.mulf %108, %107 : vector<2x32xf32>
    %cst_64 = arith.constant 1.000000e+00 : f32
    %110 = vector.broadcast %cst_64 : f32 to vector<2x32xf32>
    %111 = arith.subf %109, %110 : vector<2x32xf32>
    %112 = arith.mulf %105, %45 : vector<2x32xf32>
    %113 = arith.mulf %104, %111 : vector<2x32xf32>
    %114 = arith.addf %112, %113 : vector<2x32xf32>
    %115 = math.tanh %114 : vector<2x32xf32>
    %116 = arith.mulf %106, %115 : vector<2x32xf32>
    %cst_65 = arith.constant dense<0.000000e+00> : vector<2x128xf32>
    %117 = tpu.matmul %116, %7, %cst_65 {dimension_numbers = #tpu.dot_dimension_numbers<[1], [0], [0], [1], [0, 0, 1, 1], [], []>} : vector<2x32xf32>, vector<32x128xf32>, vector<2x128xf32> -> vector<2x128xf32>
    %cst_66 = arith.constant dense<0.000000e+00> : vector<2x128xf32>
    %118 = tpu.matmul %69, %11, %cst_66 {dimension_numbers = #tpu.dot_dimension_numbers<[1], [0], [0], [1], [0, 0, 1, 1], [], []>} : vector<2x32xf32>, vector<32x128xf32>, vector<2x128xf32> -> vector<2x128xf32>
    %119 = arith.addf %117, %118 : vector<2x128xf32>
    %120 = arith.addf %119, %15 : vector<2x128xf32>
    %121 = arith.negf %120 : vector<2x128xf32>
    %122 = math.exp %121 : vector<2x128xf32>
    %cst_67 = arith.constant 1.000000e+00 : f32
    %123 = vector.broadcast %cst_67 : f32 to vector<2x128xf32>
    %124 = arith.addf %123, %122 : vector<2x128xf32>
    %125 = arith.divf %123, %124 : vector<2x128xf32>
    %126 = vector.extract_strided_slice %125 {offsets = [0, 0], sizes = [2, 32], strides = [1, 1]} : vector<2x128xf32> to vector<2x32xf32>
    %127 = vector.extract_strided_slice %125 {offsets = [0, 32], sizes = [2, 32], strides = [1, 1]} : vector<2x128xf32> to vector<2x32xf32>
    %128 = vector.extract_strided_slice %125 {offsets = [0, 64], sizes = [2, 32], strides = [1, 1]} : vector<2x128xf32> to vector<2x32xf32>
    %129 = vector.extract_strided_slice %125 {offsets = [0, 96], sizes = [2, 32], strides = [1, 1]} : vector<2x128xf32> to vector<2x32xf32>
    %cst_68 = arith.constant 2.000000e+00 : f32
    %130 = vector.broadcast %cst_68 : f32 to vector<2x32xf32>
    %131 = arith.mulf %130, %129 : vector<2x32xf32>
    %cst_69 = arith.constant 1.000000e+00 : f32
    %132 = vector.broadcast %cst_69 : f32 to vector<2x32xf32>
    %133 = arith.subf %131, %132 : vector<2x32xf32>
    %134 = arith.mulf %127, %67 : vector<2x32xf32>
    %135 = arith.mulf %126, %133 : vector<2x32xf32>
    %136 = arith.addf %134, %135 : vector<2x32xf32>
    %137 = math.tanh %136 : vector<2x32xf32>
    %138 = arith.mulf %128, %137 : vector<2x32xf32>
    %cst_70 = arith.constant dense<0.000000e+00> : vector<2x16xf32>
    %139 = tpu.matmul %138, %0, %cst_70 {dimension_numbers = #tpu.dot_dimension_numbers<[1], [0], [0], [1], [0, 0, 1, 1], [], []>} : vector<2x32xf32>, vector<32x16xf32>, vector<2x16xf32> -> vector<2x16xf32>
    %140 = arith.addf %139, %2 : vector<2x16xf32>
    %cst_71 = arith.constant dense<0xFF800000> : vector<2xf32>
    %141 = vector.multi_reduction <maximumf>, %140, %cst_71 [1] : vector<2x16xf32> to vector<2xf32>
    %142 = vector.shape_cast %141 : vector<2xf32> to vector<2x1xf32>
    %143 = vector.broadcast %142 : vector<2x1xf32> to vector<2x16xf32>
    %144 = arith.subf %140, %143 : vector<2x16xf32>
    %145 = math.exp %144 : vector<2x16xf32>
    %cst_72 = arith.constant dense<0.000000e+00> : vector<2xf32>
    %146 = vector.multi_reduction <add>, %145, %cst_72 [1] : vector<2x16xf32> to vector<2xf32>
    %147 = vector.shape_cast %146 : vector<2xf32> to vector<2x1xf32>
    %148 = tpu.reciprocal %147 {approx = true} : vector<2x1xf32> -> vector<2x1xf32>
    %149 = arith.mulf %147, %148 : vector<2x1xf32>
    %cst_73 = arith.constant 2.000000e+00 : f32
    %150 = vector.broadcast %cst_73 : f32 to vector<2x1xf32>
    %151 = arith.subf %150, %149 : vector<2x1xf32>
    %152 = arith.mulf %148, %151 : vector<2x1xf32>
    %153 = vector.broadcast %152 : vector<2x1xf32> to vector<2x16xf32>
    %154 = arith.mulf %145, %153 : vector<2x16xf32>
    %cst_74 = arith.constant dense<0.000000e+00> : vector<2x32xf32>
    %155 = tpu.matmul %154, %1, %cst_74 {dimension_numbers = #tpu.dot_dimension_numbers<[1], [0], [0], [1], [0, 0, 1, 1], [], []>} : vector<2x16xf32>, vector<16x32xf32>, vector<2x32xf32> -> vector<2x32xf32>
    %cst_75 = arith.constant dense<0.000000e+00> : vector<2x32xf32>
    %156 = tpu.matmul %138, %3, %cst_75 {dimension_numbers = #tpu.dot_dimension_numbers<[1], [0], [0], [1], [0, 0, 1, 1], [], []>} : vector<2x32xf32>, vector<32x32xf32>, vector<2x32xf32> -> vector<2x32xf32>
    %157 = arith.addf %155, %156 : vector<2x32xf32>
    %158 = math.tanh %157 : vector<2x32xf32>
    %c1_76 = arith.constant 1 : index
    %c0_77 = arith.constant 0 : index
    %c0_78 = arith.constant 0 : index
    %159 = vector.load %arg11[%c1_76, %c0_77, %c0_78] : memref<8x2x32xf32, #tpu.memory_space<vmem>>, vector<1x2x32xf32>
    %160 = vector.shape_cast %159 : vector<1x2x32xf32> to vector<2x32xf32>
    %161 = vector.shape_cast %158 : vector<2x32xf32> to vector<1x2x32xf32>
    tpu.vector_store %arg11[%c1_76, %c0_77, %c0_78], %161 {strides = array<i32>} : memref<8x2x32xf32, #tpu.memory_space<vmem>>, vector<1x2x32xf32>,
    %c2 = arith.constant 2 : index
    %c0_79 = arith.constant 0 : index
    %c0_80 = arith.constant 0 : index
    %162 = vector.load %arg1[%c2, %c0_79, %c0_80] : memref<8x2x32xf32, #tpu.memory_space<vmem>>, vector<1x2x32xf32>
    %163 = vector.shape_cast %162 : vector<1x2x32xf32> to vector<2x32xf32>
    %cst_81 = arith.constant dense<0.000000e+00> : vector<2x128xf32>
    %164 = tpu.matmul %163, %5, %cst_81 {dimension_numbers = #tpu.dot_dimension_numbers<[1], [0], [0], [1], [0, 0, 1, 1], [], []>} : vector<2x32xf32>, vector<32x128xf32>, vector<2x128xf32> -> vector<2x128xf32>
    %cst_82 = arith.constant dense<0.000000e+00> : vector<2x128xf32>
    %165 = tpu.matmul %116, %9, %cst_82 {dimension_numbers = #tpu.dot_dimension_numbers<[1], [0], [0], [1], [0, 0, 1, 1], [], []>} : vector<2x32xf32>, vector<32x128xf32>, vector<2x128xf32> -> vector<2x128xf32>
    %166 = arith.addf %164, %165 : vector<2x128xf32>
    %167 = arith.addf %166, %13 : vector<2x128xf32>
    %168 = arith.negf %167 : vector<2x128xf32>
    %169 = math.exp %168 : vector<2x128xf32>
    %cst_83 = arith.constant 1.000000e+00 : f32
    %170 = vector.broadcast %cst_83 : f32 to vector<2x128xf32>
    %171 = arith.addf %170, %169 : vector<2x128xf32>
    %172 = arith.divf %170, %171 : vector<2x128xf32>
    %173 = vector.extract_strided_slice %172 {offsets = [0, 0], sizes = [2, 32], strides = [1, 1]} : vector<2x128xf32> to vector<2x32xf32>
    %174 = vector.extract_strided_slice %172 {offsets = [0, 32], sizes = [2, 32], strides = [1, 1]} : vector<2x128xf32> to vector<2x32xf32>
    %175 = vector.extract_strided_slice %172 {offsets = [0, 64], sizes = [2, 32], strides = [1, 1]} : vector<2x128xf32> to vector<2x32xf32>
    %176 = vector.extract_strided_slice %172 {offsets = [0, 96], sizes = [2, 32], strides = [1, 1]} : vector<2x128xf32> to vector<2x32xf32>
    %cst_84 = arith.constant 2.000000e+00 : f32
    %177 = vector.broadcast %cst_84 : f32 to vector<2x32xf32>
    %178 = arith.mulf %177, %176 : vector<2x32xf32>
    %cst_85 = arith.constant 1.000000e+00 : f32
    %179 = vector.broadcast %cst_85 : f32 to vector<2x32xf32>
    %180 = arith.subf %178, %179 : vector<2x32xf32>
    %181 = arith.mulf %174, %114 : vector<2x32xf32>
    %182 = arith.mulf %173, %180 : vector<2x32xf32>
    %183 = arith.addf %181, %182 : vector<2x32xf32>
    %184 = math.tanh %183 : vector<2x32xf32>
    %185 = arith.mulf %175, %184 : vector<2x32xf32>
    %cst_86 = arith.constant dense<0.000000e+00> : vector<2x128xf32>
    %186 = tpu.matmul %185, %7, %cst_86 {dimension_numbers = #tpu.dot_dimension_numbers<[1], [0], [0], [1], [0, 0, 1, 1], [], []>} : vector<2x32xf32>, vector<32x128xf32>, vector<2x128xf32> -> vector<2x128xf32>
    %cst_87 = arith.constant dense<0.000000e+00> : vector<2x128xf32>
    %187 = tpu.matmul %138, %11, %cst_87 {dimension_numbers = #tpu.dot_dimension_numbers<[1], [0], [0], [1], [0, 0, 1, 1], [], []>} : vector<2x32xf32>, vector<32x128xf32>, vector<2x128xf32> -> vector<2x128xf32>
    %188 = arith.addf %186, %187 : vector<2x128xf32>
    %189 = arith.addf %188, %15 : vector<2x128xf32>
    %190 = arith.negf %189 : vector<2x128xf32>
    %191 = math.exp %190 : vector<2x128xf32>
    %cst_88 = arith.constant 1.000000e+00 : f32
    %192 = vector.broadcast %cst_88 : f32 to vector<2x128xf32>
    %193 = arith.addf %192, %191 : vector<2x128xf32>
    %194 = arith.divf %192, %193 : vector<2x128xf32>
    %195 = vector.extract_strided_slice %194 {offsets = [0, 0], sizes = [2, 32], strides = [1, 1]} : vector<2x128xf32> to vector<2x32xf32>
    %196 = vector.extract_strided_slice %194 {offsets = [0, 32], sizes = [2, 32], strides = [1, 1]} : vector<2x128xf32> to vector<2x32xf32>
    %197 = vector.extract_strided_slice %194 {offsets = [0, 64], sizes = [2, 32], strides = [1, 1]} : vector<2x128xf32> to vector<2x32xf32>
    %198 = vector.extract_strided_slice %194 {offsets = [0, 96], sizes = [2, 32], strides = [1, 1]} : vector<2x128xf32> to vector<2x32xf32>
    %cst_89 = arith.constant 2.000000e+00 : f32
    %199 = vector.broadcast %cst_89 : f32 to vector<2x32xf32>
    %200 = arith.mulf %199, %198 : vector<2x32xf32>
    %cst_90 = arith.constant 1.000000e+00 : f32
    %201 = vector.broadcast %cst_90 : f32 to vector<2x32xf32>
    %202 = arith.subf %200, %201 : vector<2x32xf32>
    %203 = arith.mulf %196, %136 : vector<2x32xf32>
    %204 = arith.mulf %195, %202 : vector<2x32xf32>
    %205 = arith.addf %203, %204 : vector<2x32xf32>
    %206 = math.tanh %205 : vector<2x32xf32>
    %207 = arith.mulf %197, %206 : vector<2x32xf32>
    %cst_91 = arith.constant dense<0.000000e+00> : vector<2x16xf32>
    %208 = tpu.matmul %207, %0, %cst_91 {dimension_numbers = #tpu.dot_dimension_numbers<[1], [0], [0], [1], [0, 0, 1, 1], [], []>} : vector<2x32xf32>, vector<32x16xf32>, vector<2x16xf32> -> vector<2x16xf32>
    %209 = arith.addf %208, %2 : vector<2x16xf32>
    %cst_92 = arith.constant dense<0xFF800000> : vector<2xf32>
    %210 = vector.multi_reduction <maximumf>, %209, %cst_92 [1] : vector<2x16xf32> to vector<2xf32>
    %211 = vector.shape_cast %210 : vector<2xf32> to vector<2x1xf32>
    %212 = vector.broadcast %211 : vector<2x1xf32> to vector<2x16xf32>
    %213 = arith.subf %209, %212 : vector<2x16xf32>
    %214 = math.exp %213 : vector<2x16xf32>
    %cst_93 = arith.constant dense<0.000000e+00> : vector<2xf32>
    %215 = vector.multi_reduction <add>, %214, %cst_93 [1] : vector<2x16xf32> to vector<2xf32>
    %216 = vector.shape_cast %215 : vector<2xf32> to vector<2x1xf32>
    %217 = tpu.reciprocal %216 {approx = true} : vector<2x1xf32> -> vector<2x1xf32>
    %218 = arith.mulf %216, %217 : vector<2x1xf32>
    %cst_94 = arith.constant 2.000000e+00 : f32
    %219 = vector.broadcast %cst_94 : f32 to vector<2x1xf32>
    %220 = arith.subf %219, %218 : vector<2x1xf32>
    %221 = arith.mulf %217, %220 : vector<2x1xf32>
    %222 = vector.broadcast %221 : vector<2x1xf32> to vector<2x16xf32>
    %223 = arith.mulf %214, %222 : vector<2x16xf32>
    %cst_95 = arith.constant dense<0.000000e+00> : vector<2x32xf32>
    %224 = tpu.matmul %223, %1, %cst_95 {dimension_numbers = #tpu.dot_dimension_numbers<[1], [0], [0], [1], [0, 0, 1, 1], [], []>} : vector<2x16xf32>, vector<16x32xf32>, vector<2x32xf32> -> vector<2x32xf32>
    %cst_96 = arith.constant dense<0.000000e+00> : vector<2x32xf32>
    %225 = tpu.matmul %207, %3, %cst_96 {dimension_numbers = #tpu.dot_dimension_numbers<[1], [0], [0], [1], [0, 0, 1, 1], [], []>} : vector<2x32xf32>, vector<32x32xf32>, vector<2x32xf32> -> vector<2x32xf32>
    %226 = arith.addf %224, %225 : vector<2x32xf32>
    %227 = math.tanh %226 : vector<2x32xf32>
    %c2_97 = arith.constant 2 : index
    %c0_98 = arith.constant 0 : index
    %c0_99 = arith.constant 0 : index
    %228 = vector.load %arg11[%c2_97, %c0_98, %c0_99] : memref<8x2x32xf32, #tpu.memory_space<vmem>>, vector<1x2x32xf32>
    %229 = vector.shape_cast %228 : vector<1x2x32xf32> to vector<2x32xf32>
    %230 = vector.shape_cast %227 : vector<2x32xf32> to vector<1x2x32xf32>
    tpu.vector_store %arg11[%c2_97, %c0_98, %c0_99], %230 {strides = array<i32>} : memref<8x2x32xf32, #tpu.memory_space<vmem>>, vector<1x2x32xf32>,
    %c3 = arith.constant 3 : index
    %c0_100 = arith.constant 0 : index
    %c0_101 = arith.constant 0 : index
    %231 = vector.load %arg1[%c3, %c0_100, %c0_101] : memref<8x2x32xf32, #tpu.memory_space<vmem>>, vector<1x2x32xf32>
    %232 = vector.shape_cast %231 : vector<1x2x32xf32> to vector<2x32xf32>
    %cst_102 = arith.constant dense<0.000000e+00> : vector<2x128xf32>
    %233 = tpu.matmul %232, %5, %cst_102 {dimension_numbers = #tpu.dot_dimension_numbers<[1], [0], [0], [1], [0, 0, 1, 1], [], []>} : vector<2x32xf32>, vector<32x128xf32>, vector<2x128xf32> -> vector<2x128xf32>
    %cst_103 = arith.constant dense<0.000000e+00> : vector<2x128xf32>
    %234 = tpu.matmul %185, %9, %cst_103 {dimension_numbers = #tpu.dot_dimension_numbers<[1], [0], [0], [1], [0, 0, 1, 1], [], []>} : vector<2x32xf32>, vector<32x128xf32>, vector<2x128xf32> -> vector<2x128xf32>
    %235 = arith.addf %233, %234 : vector<2x128xf32>
    %236 = arith.addf %235, %13 : vector<2x128xf32>
    %237 = arith.negf %236 : vector<2x128xf32>
    %238 = math.exp %237 : vector<2x128xf32>
    %cst_104 = arith.constant 1.000000e+00 : f32
    %239 = vector.broadcast %cst_104 : f32 to vector<2x128xf32>
    %240 = arith.addf %239, %238 : vector<2x128xf32>
    %241 = arith.divf %239, %240 : vector<2x128xf32>
    %242 = vector.extract_strided_slice %241 {offsets = [0, 0], sizes = [2, 32], strides = [1, 1]} : vector<2x128xf32> to vector<2x32xf32>
    %243 = vector.extract_strided_slice %241 {offsets = [0, 32], sizes = [2, 32], strides = [1, 1]} : vector<2x128xf32> to vector<2x32xf32>
    %244 = vector.extract_strided_slice %241 {offsets = [0, 64], sizes = [2, 32], strides = [1, 1]} : vector<2x128xf32> to vector<2x32xf32>
    %245 = vector.extract_strided_slice %241 {offsets = [0, 96], sizes = [2, 32], strides = [1, 1]} : vector<2x128xf32> to vector<2x32xf32>
    %cst_105 = arith.constant 2.000000e+00 : f32
    %246 = vector.broadcast %cst_105 : f32 to vector<2x32xf32>
    %247 = arith.mulf %246, %245 : vector<2x32xf32>
    %cst_106 = arith.constant 1.000000e+00 : f32
    %248 = vector.broadcast %cst_106 : f32 to vector<2x32xf32>
    %249 = arith.subf %247, %248 : vector<2x32xf32>
    %250 = arith.mulf %243, %183 : vector<2x32xf32>
    %251 = arith.mulf %242, %249 : vector<2x32xf32>
    %252 = arith.addf %250, %251 : vector<2x32xf32>
    %253 = math.tanh %252 : vector<2x32xf32>
    %254 = arith.mulf %244, %253 : vector<2x32xf32>
    %cst_107 = arith.constant dense<0.000000e+00> : vector<2x128xf32>
    %255 = tpu.matmul %254, %7, %cst_107 {dimension_numbers = #tpu.dot_dimension_numbers<[1], [0], [0], [1], [0, 0, 1, 1], [], []>} : vector<2x32xf32>, vector<32x128xf32>, vector<2x128xf32> -> vector<2x128xf32>
    %cst_108 = arith.constant dense<0.000000e+00> : vector<2x128xf32>
    %256 = tpu.matmul %207, %11, %cst_108 {dimension_numbers = #tpu.dot_dimension_numbers<[1], [0], [0], [1], [0, 0, 1, 1], [], []>} : vector<2x32xf32>, vector<32x128xf32>, vector<2x128xf32> -> vector<2x128xf32>
    %257 = arith.addf %255, %256 : vector<2x128xf32>
    %258 = arith.addf %257, %15 : vector<2x128xf32>
    %259 = arith.negf %258 : vector<2x128xf32>
    %260 = math.exp %259 : vector<2x128xf32>
    %cst_109 = arith.constant 1.000000e+00 : f32
    %261 = vector.broadcast %cst_109 : f32 to vector<2x128xf32>
    %262 = arith.addf %261, %260 : vector<2x128xf32>
    %263 = arith.divf %261, %262 : vector<2x128xf32>
    %264 = vector.extract_strided_slice %263 {offsets = [0, 0], sizes = [2, 32], strides = [1, 1]} : vector<2x128xf32> to vector<2x32xf32>
    %265 = vector.extract_strided_slice %263 {offsets = [0, 32], sizes = [2, 32], strides = [1, 1]} : vector<2x128xf32> to vector<2x32xf32>
    %266 = vector.extract_strided_slice %263 {offsets = [0, 64], sizes = [2, 32], strides = [1, 1]} : vector<2x128xf32> to vector<2x32xf32>
    %267 = vector.extract_strided_slice %263 {offsets = [0, 96], sizes = [2, 32], strides = [1, 1]} : vector<2x128xf32> to vector<2x32xf32>
    %cst_110 = arith.constant 2.000000e+00 : f32
    %268 = vector.broadcast %cst_110 : f32 to vector<2x32xf32>
    %269 = arith.mulf %268, %267 : vector<2x32xf32>
    %cst_111 = arith.constant 1.000000e+00 : f32
    %270 = vector.broadcast %cst_111 : f32 to vector<2x32xf32>
    %271 = arith.subf %269, %270 : vector<2x32xf32>
    %272 = arith.mulf %265, %205 : vector<2x32xf32>
    %273 = arith.mulf %264, %271 : vector<2x32xf32>
    %274 = arith.addf %272, %273 : vector<2x32xf32>
    %275 = math.tanh %274 : vector<2x32xf32>
    %276 = arith.mulf %266, %275 : vector<2x32xf32>
    %cst_112 = arith.constant dense<0.000000e+00> : vector<2x16xf32>
    %277 = tpu.matmul %276, %0, %cst_112 {dimension_numbers = #tpu.dot_dimension_numbers<[1], [0], [0], [1], [0, 0, 1, 1], [], []>} : vector<2x32xf32>, vector<32x16xf32>, vector<2x16xf32> -> vector<2x16xf32>
    %278 = arith.addf %277, %2 : vector<2x16xf32>
    %cst_113 = arith.constant dense<0xFF800000> : vector<2xf32>
    %279 = vector.multi_reduction <maximumf>, %278, %cst_113 [1] : vector<2x16xf32> to vector<2xf32>
    %280 = vector.shape_cast %279 : vector<2xf32> to vector<2x1xf32>
    %281 = vector.broadcast %280 : vector<2x1xf32> to vector<2x16xf32>
    %282 = arith.subf %278, %281 : vector<2x16xf32>
    %283 = math.exp %282 : vector<2x16xf32>
    %cst_114 = arith.constant dense<0.000000e+00> : vector<2xf32>
    %284 = vector.multi_reduction <add>, %283, %cst_114 [1] : vector<2x16xf32> to vector<2xf32>
    %285 = vector.shape_cast %284 : vector<2xf32> to vector<2x1xf32>
    %286 = tpu.reciprocal %285 {approx = true} : vector<2x1xf32> -> vector<2x1xf32>
    %287 = arith.mulf %285, %286 : vector<2x1xf32>
    %cst_115 = arith.constant 2.000000e+00 : f32
    %288 = vector.broadcast %cst_115 : f32 to vector<2x1xf32>
    %289 = arith.subf %288, %287 : vector<2x1xf32>
    %290 = arith.mulf %286, %289 : vector<2x1xf32>
    %291 = vector.broadcast %290 : vector<2x1xf32> to vector<2x16xf32>
    %292 = arith.mulf %283, %291 : vector<2x16xf32>
    %cst_116 = arith.constant dense<0.000000e+00> : vector<2x32xf32>
    %293 = tpu.matmul %292, %1, %cst_116 {dimension_numbers = #tpu.dot_dimension_numbers<[1], [0], [0], [1], [0, 0, 1, 1], [], []>} : vector<2x16xf32>, vector<16x32xf32>, vector<2x32xf32> -> vector<2x32xf32>
    %cst_117 = arith.constant dense<0.000000e+00> : vector<2x32xf32>
    %294 = tpu.matmul %276, %3, %cst_117 {dimension_numbers = #tpu.dot_dimension_numbers<[1], [0], [0], [1], [0, 0, 1, 1], [], []>} : vector<2x32xf32>, vector<32x32xf32>, vector<2x32xf32> -> vector<2x32xf32>
    %295 = arith.addf %293, %294 : vector<2x32xf32>
    %296 = math.tanh %295 : vector<2x32xf32>
    %c3_118 = arith.constant 3 : index
    %c0_119 = arith.constant 0 : index
    %c0_120 = arith.constant 0 : index
    %297 = vector.load %arg11[%c3_118, %c0_119, %c0_120] : memref<8x2x32xf32, #tpu.memory_space<vmem>>, vector<1x2x32xf32>
    %298 = vector.shape_cast %297 : vector<1x2x32xf32> to vector<2x32xf32>
    %299 = vector.shape_cast %296 : vector<2x32xf32> to vector<1x2x32xf32>
    tpu.vector_store %arg11[%c3_118, %c0_119, %c0_120], %299 {strides = array<i32>} : memref<8x2x32xf32, #tpu.memory_space<vmem>>, vector<1x2x32xf32>,
    %c4 = arith.constant 4 : index
    %c0_121 = arith.constant 0 : index
    %c0_122 = arith.constant 0 : index
    %300 = vector.load %arg1[%c4, %c0_121, %c0_122] : memref<8x2x32xf32, #tpu.memory_space<vmem>>, vector<1x2x32xf32>
    %301 = vector.shape_cast %300 : vector<1x2x32xf32> to vector<2x32xf32>
    %cst_123 = arith.constant dense<0.000000e+00> : vector<2x128xf32>
    %302 = tpu.matmul %301, %5, %cst_123 {dimension_numbers = #tpu.dot_dimension_numbers<[1], [0], [0], [1], [0, 0, 1, 1], [], []>} : vector<2x32xf32>, vector<32x128xf32>, vector<2x128xf32> -> vector<2x128xf32>
    %cst_124 = arith.constant dense<0.000000e+00> : vector<2x128xf32>
    %303 = tpu.matmul %254, %9, %cst_124 {dimension_numbers = #tpu.dot_dimension_numbers<[1], [0], [0], [1], [0, 0, 1, 1], [], []>} : vector<2x32xf32>, vector<32x128xf32>, vector<2x128xf32> -> vector<2x128xf32>
    %304 = arith.addf %302, %303 : vector<2x128xf32>
    %305 = arith.addf %304, %13 : vector<2x128xf32>
    %306 = arith.negf %305 : vector<2x128xf32>
    %307 = math.exp %306 : vector<2x128xf32>
    %cst_125 = arith.constant 1.000000e+00 : f32
    %308 = vector.broadcast %cst_125 : f32 to vector<2x128xf32>
    %309 = arith.addf %308, %307 : vector<2x128xf32>
    %310 = arith.divf %308, %309 : vector<2x128xf32>
    %311 = vector.extract_strided_slice %310 {offsets = [0, 0], sizes = [2, 32], strides = [1, 1]} : vector<2x128xf32> to vector<2x32xf32>
    %312 = vector.extract_strided_slice %310 {offsets = [0, 32], sizes = [2, 32], strides = [1, 1]} : vector<2x128xf32> to vector<2x32xf32>
    %313 = vector.extract_strided_slice %310 {offsets = [0, 64], sizes = [2, 32], strides = [1, 1]} : vector<2x128xf32> to vector<2x32xf32>
    %314 = vector.extract_strided_slice %310 {offsets = [0, 96], sizes = [2, 32], strides = [1, 1]} : vector<2x128xf32> to vector<2x32xf32>
    %cst_126 = arith.constant 2.000000e+00 : f32
    %315 = vector.broadcast %cst_126 : f32 to vector<2x32xf32>
    %316 = arith.mulf %315, %314 : vector<2x32xf32>
    %cst_127 = arith.constant 1.000000e+00 : f32
    %317 = vector.broadcast %cst_127 : f32 to vector<2x32xf32>
    %318 = arith.subf %316, %317 : vector<2x32xf32>
    %319 = arith.mulf %312, %252 : vector<2x32xf32>
    %320 = arith.mulf %311, %318 : vector<2x32xf32>
    %321 = arith.addf %319, %320 : vector<2x32xf32>
    %322 = math.tanh %321 : vector<2x32xf32>
    %323 = arith.mulf %313, %322 : vector<2x32xf32>
    %cst_128 = arith.constant dense<0.000000e+00> : vector<2x128xf32>
    %324 = tpu.matmul %323, %7, %cst_128 {dimension_numbers = #tpu.dot_dimension_numbers<[1], [0], [0], [1], [0, 0, 1, 1], [], []>} : vector<2x32xf32>, vector<32x128xf32>, vector<2x128xf32> -> vector<2x128xf32>
    %cst_129 = arith.constant dense<0.000000e+00> : vector<2x128xf32>
    %325 = tpu.matmul %276, %11, %cst_129 {dimension_numbers = #tpu.dot_dimension_numbers<[1], [0], [0], [1], [0, 0, 1, 1], [], []>} : vector<2x32xf32>, vector<32x128xf32>, vector<2x128xf32> -> vector<2x128xf32>
    %326 = arith.addf %324, %325 : vector<2x128xf32>
    %327 = arith.addf %326, %15 : vector<2x128xf32>
    %328 = arith.negf %327 : vector<2x128xf32>
    %329 = math.exp %328 : vector<2x128xf32>
    %cst_130 = arith.constant 1.000000e+00 : f32
    %330 = vector.broadcast %cst_130 : f32 to vector<2x128xf32>
    %331 = arith.addf %330, %329 : vector<2x128xf32>
    %332 = arith.divf %330, %331 : vector<2x128xf32>
    %333 = vector.extract_strided_slice %332 {offsets = [0, 0], sizes = [2, 32], strides = [1, 1]} : vector<2x128xf32> to vector<2x32xf32>
    %334 = vector.extract_strided_slice %332 {offsets = [0, 32], sizes = [2, 32], strides = [1, 1]} : vector<2x128xf32> to vector<2x32xf32>
    %335 = vector.extract_strided_slice %332 {offsets = [0, 64], sizes = [2, 32], strides = [1, 1]} : vector<2x128xf32> to vector<2x32xf32>
    %336 = vector.extract_strided_slice %332 {offsets = [0, 96], sizes = [2, 32], strides = [1, 1]} : vector<2x128xf32> to vector<2x32xf32>
    %cst_131 = arith.constant 2.000000e+00 : f32
    %337 = vector.broadcast %cst_131 : f32 to vector<2x32xf32>
    %338 = arith.mulf %337, %336 : vector<2x32xf32>
    %cst_132 = arith.constant 1.000000e+00 : f32
    %339 = vector.broadcast %cst_132 : f32 to vector<2x32xf32>
    %340 = arith.subf %338, %339 : vector<2x32xf32>
    %341 = arith.mulf %334, %274 : vector<2x32xf32>
    %342 = arith.mulf %333, %340 : vector<2x32xf32>
    %343 = arith.addf %341, %342 : vector<2x32xf32>
    %344 = math.tanh %343 : vector<2x32xf32>
    %345 = arith.mulf %335, %344 : vector<2x32xf32>
    %cst_133 = arith.constant dense<0.000000e+00> : vector<2x16xf32>
    %346 = tpu.matmul %345, %0, %cst_133 {dimension_numbers = #tpu.dot_dimension_numbers<[1], [0], [0], [1], [0, 0, 1, 1], [], []>} : vector<2x32xf32>, vector<32x16xf32>, vector<2x16xf32> -> vector<2x16xf32>
    %347 = arith.addf %346, %2 : vector<2x16xf32>
    %cst_134 = arith.constant dense<0xFF800000> : vector<2xf32>
    %348 = vector.multi_reduction <maximumf>, %347, %cst_134 [1] : vector<2x16xf32> to vector<2xf32>
    %349 = vector.shape_cast %348 : vector<2xf32> to vector<2x1xf32>
    %350 = vector.broadcast %349 : vector<2x1xf32> to vector<2x16xf32>
    %351 = arith.subf %347, %350 : vector<2x16xf32>
    %352 = math.exp %351 : vector<2x16xf32>
    %cst_135 = arith.constant dense<0.000000e+00> : vector<2xf32>
    %353 = vector.multi_reduction <add>, %352, %cst_135 [1] : vector<2x16xf32> to vector<2xf32>
    %354 = vector.shape_cast %353 : vector<2xf32> to vector<2x1xf32>
    %355 = tpu.reciprocal %354 {approx = true} : vector<2x1xf32> -> vector<2x1xf32>
    %356 = arith.mulf %354, %355 : vector<2x1xf32>
    %cst_136 = arith.constant 2.000000e+00 : f32
    %357 = vector.broadcast %cst_136 : f32 to vector<2x1xf32>
    %358 = arith.subf %357, %356 : vector<2x1xf32>
    %359 = arith.mulf %355, %358 : vector<2x1xf32>
    %360 = vector.broadcast %359 : vector<2x1xf32> to vector<2x16xf32>
    %361 = arith.mulf %352, %360 : vector<2x16xf32>
    %cst_137 = arith.constant dense<0.000000e+00> : vector<2x32xf32>
    %362 = tpu.matmul %361, %1, %cst_137 {dimension_numbers = #tpu.dot_dimension_numbers<[1], [0], [0], [1], [0, 0, 1, 1], [], []>} : vector<2x16xf32>, vector<16x32xf32>, vector<2x32xf32> -> vector<2x32xf32>
    %cst_138 = arith.constant dense<0.000000e+00> : vector<2x32xf32>
    %363 = tpu.matmul %345, %3, %cst_138 {dimension_numbers = #tpu.dot_dimension_numbers<[1], [0], [0], [1], [0, 0, 1, 1], [], []>} : vector<2x32xf32>, vector<32x32xf32>, vector<2x32xf32> -> vector<2x32xf32>
    %364 = arith.addf %362, %363 : vector<2x32xf32>
    %365 = math.tanh %364 : vector<2x32xf32>
    %c4_139 = arith.constant 4 : index
    %c0_140 = arith.constant 0 : index
    %c0_141 = arith.constant 0 : index
    %366 = vector.load %arg11[%c4_139, %c0_140, %c0_141] : memref<8x2x32xf32, #tpu.memory_space<vmem>>, vector<1x2x32xf32>
    %367 = vector.shape_cast %366 : vector<1x2x32xf32> to vector<2x32xf32>
    %368 = vector.shape_cast %365 : vector<2x32xf32> to vector<1x2x32xf32>
    tpu.vector_store %arg11[%c4_139, %c0_140, %c0_141], %368 {strides = array<i32>} : memref<8x2x32xf32, #tpu.memory_space<vmem>>, vector<1x2x32xf32>,
    %c5 = arith.constant 5 : index
    %c0_142 = arith.constant 0 : index
    %c0_143 = arith.constant 0 : index
    %369 = vector.load %arg1[%c5, %c0_142, %c0_143] : memref<8x2x32xf32, #tpu.memory_space<vmem>>, vector<1x2x32xf32>
    %370 = vector.shape_cast %369 : vector<1x2x32xf32> to vector<2x32xf32>
    %cst_144 = arith.constant dense<0.000000e+00> : vector<2x128xf32>
    %371 = tpu.matmul %370, %5, %cst_144 {dimension_numbers = #tpu.dot_dimension_numbers<[1], [0], [0], [1], [0, 0, 1, 1], [], []>} : vector<2x32xf32>, vector<32x128xf32>, vector<2x128xf32> -> vector<2x128xf32>
    %cst_145 = arith.constant dense<0.000000e+00> : vector<2x128xf32>
    %372 = tpu.matmul %323, %9, %cst_145 {dimension_numbers = #tpu.dot_dimension_numbers<[1], [0], [0], [1], [0, 0, 1, 1], [], []>} : vector<2x32xf32>, vector<32x128xf32>, vector<2x128xf32> -> vector<2x128xf32>
    %373 = arith.addf %371, %372 : vector<2x128xf32>
    %374 = arith.addf %373, %13 : vector<2x128xf32>
    %375 = arith.negf %374 : vector<2x128xf32>
    %376 = math.exp %375 : vector<2x128xf32>
    %cst_146 = arith.constant 1.000000e+00 : f32
    %377 = vector.broadcast %cst_146 : f32 to vector<2x128xf32>
    %378 = arith.addf %377, %376 : vector<2x128xf32>
    %379 = arith.divf %377, %378 : vector<2x128xf32>
    %380 = vector.extract_strided_slice %379 {offsets = [0, 0], sizes = [2, 32], strides = [1, 1]} : vector<2x128xf32> to vector<2x32xf32>
    %381 = vector.extract_strided_slice %379 {offsets = [0, 32], sizes = [2, 32], strides = [1, 1]} : vector<2x128xf32> to vector<2x32xf32>
    %382 = vector.extract_strided_slice %379 {offsets = [0, 64], sizes = [2, 32], strides = [1, 1]} : vector<2x128xf32> to vector<2x32xf32>
    %383 = vector.extract_strided_slice %379 {offsets = [0, 96], sizes = [2, 32], strides = [1, 1]} : vector<2x128xf32> to vector<2x32xf32>
    %cst_147 = arith.constant 2.000000e+00 : f32
    %384 = vector.broadcast %cst_147 : f32 to vector<2x32xf32>
    %385 = arith.mulf %384, %383 : vector<2x32xf32>
    %cst_148 = arith.constant 1.000000e+00 : f32
    %386 = vector.broadcast %cst_148 : f32 to vector<2x32xf32>
    %387 = arith.subf %385, %386 : vector<2x32xf32>
    %388 = arith.mulf %381, %321 : vector<2x32xf32>
    %389 = arith.mulf %380, %387 : vector<2x32xf32>
    %390 = arith.addf %388, %389 : vector<2x32xf32>
    %391 = math.tanh %390 : vector<2x32xf32>
    %392 = arith.mulf %382, %391 : vector<2x32xf32>
    %cst_149 = arith.constant dense<0.000000e+00> : vector<2x128xf32>
    %393 = tpu.matmul %392, %7, %cst_149 {dimension_numbers = #tpu.dot_dimension_numbers<[1], [0], [0], [1], [0, 0, 1, 1], [], []>} : vector<2x32xf32>, vector<32x128xf32>, vector<2x128xf32> -> vector<2x128xf32>
    %cst_150 = arith.constant dense<0.000000e+00> : vector<2x128xf32>
    %394 = tpu.matmul %345, %11, %cst_150 {dimension_numbers = #tpu.dot_dimension_numbers<[1], [0], [0], [1], [0, 0, 1, 1], [], []>} : vector<2x32xf32>, vector<32x128xf32>, vector<2x128xf32> -> vector<2x128xf32>
    %395 = arith.addf %393, %394 : vector<2x128xf32>
    %396 = arith.addf %395, %15 : vector<2x128xf32>
    %397 = arith.negf %396 : vector<2x128xf32>
    %398 = math.exp %397 : vector<2x128xf32>
    %cst_151 = arith.constant 1.000000e+00 : f32
    %399 = vector.broadcast %cst_151 : f32 to vector<2x128xf32>
    %400 = arith.addf %399, %398 : vector<2x128xf32>
    %401 = arith.divf %399, %400 : vector<2x128xf32>
    %402 = vector.extract_strided_slice %401 {offsets = [0, 0], sizes = [2, 32], strides = [1, 1]} : vector<2x128xf32> to vector<2x32xf32>
    %403 = vector.extract_strided_slice %401 {offsets = [0, 32], sizes = [2, 32], strides = [1, 1]} : vector<2x128xf32> to vector<2x32xf32>
    %404 = vector.extract_strided_slice %401 {offsets = [0, 64], sizes = [2, 32], strides = [1, 1]} : vector<2x128xf32> to vector<2x32xf32>
    %405 = vector.extract_strided_slice %401 {offsets = [0, 96], sizes = [2, 32], strides = [1, 1]} : vector<2x128xf32> to vector<2x32xf32>
    %cst_152 = arith.constant 2.000000e+00 : f32
    %406 = vector.broadcast %cst_152 : f32 to vector<2x32xf32>
    %407 = arith.mulf %406, %405 : vector<2x32xf32>
    %cst_153 = arith.constant 1.000000e+00 : f32
    %408 = vector.broadcast %cst_153 : f32 to vector<2x32xf32>
    %409 = arith.subf %407, %408 : vector<2x32xf32>
    %410 = arith.mulf %403, %343 : vector<2x32xf32>
    %411 = arith.mulf %402, %409 : vector<2x32xf32>
    %412 = arith.addf %410, %411 : vector<2x32xf32>
    %413 = math.tanh %412 : vector<2x32xf32>
    %414 = arith.mulf %404, %413 : vector<2x32xf32>
    %cst_154 = arith.constant dense<0.000000e+00> : vector<2x16xf32>
    %415 = tpu.matmul %414, %0, %cst_154 {dimension_numbers = #tpu.dot_dimension_numbers<[1], [0], [0], [1], [0, 0, 1, 1], [], []>} : vector<2x32xf32>, vector<32x16xf32>, vector<2x16xf32> -> vector<2x16xf32>
    %416 = arith.addf %415, %2 : vector<2x16xf32>
    %cst_155 = arith.constant dense<0xFF800000> : vector<2xf32>
    %417 = vector.multi_reduction <maximumf>, %416, %cst_155 [1] : vector<2x16xf32> to vector<2xf32>
    %418 = vector.shape_cast %417 : vector<2xf32> to vector<2x1xf32>
    %419 = vector.broadcast %418 : vector<2x1xf32> to vector<2x16xf32>
    %420 = arith.subf %416, %419 : vector<2x16xf32>
    %421 = math.exp %420 : vector<2x16xf32>
    %cst_156 = arith.constant dense<0.000000e+00> : vector<2xf32>
    %422 = vector.multi_reduction <add>, %421, %cst_156 [1] : vector<2x16xf32> to vector<2xf32>
    %423 = vector.shape_cast %422 : vector<2xf32> to vector<2x1xf32>
    %424 = tpu.reciprocal %423 {approx = true} : vector<2x1xf32> -> vector<2x1xf32>
    %425 = arith.mulf %423, %424 : vector<2x1xf32>
    %cst_157 = arith.constant 2.000000e+00 : f32
    %426 = vector.broadcast %cst_157 : f32 to vector<2x1xf32>
    %427 = arith.subf %426, %425 : vector<2x1xf32>
    %428 = arith.mulf %424, %427 : vector<2x1xf32>
    %429 = vector.broadcast %428 : vector<2x1xf32> to vector<2x16xf32>
    %430 = arith.mulf %421, %429 : vector<2x16xf32>
    %cst_158 = arith.constant dense<0.000000e+00> : vector<2x32xf32>
    %431 = tpu.matmul %430, %1, %cst_158 {dimension_numbers = #tpu.dot_dimension_numbers<[1], [0], [0], [1], [0, 0, 1, 1], [], []>} : vector<2x16xf32>, vector<16x32xf32>, vector<2x32xf32> -> vector<2x32xf32>
    %cst_159 = arith.constant dense<0.000000e+00> : vector<2x32xf32>
    %432 = tpu.matmul %414, %3, %cst_159 {dimension_numbers = #tpu.dot_dimension_numbers<[1], [0], [0], [1], [0, 0, 1, 1], [], []>} : vector<2x32xf32>, vector<32x32xf32>, vector<2x32xf32> -> vector<2x32xf32>
    %433 = arith.addf %431, %432 : vector<2x32xf32>
    %434 = math.tanh %433 : vector<2x32xf32>
    %c5_160 = arith.constant 5 : index
    %c0_161 = arith.constant 0 : index
    %c0_162 = arith.constant 0 : index
    %435 = vector.load %arg11[%c5_160, %c0_161, %c0_162] : memref<8x2x32xf32, #tpu.memory_space<vmem>>, vector<1x2x32xf32>
    %436 = vector.shape_cast %435 : vector<1x2x32xf32> to vector<2x32xf32>
    %437 = vector.shape_cast %434 : vector<2x32xf32> to vector<1x2x32xf32>
    tpu.vector_store %arg11[%c5_160, %c0_161, %c0_162], %437 {strides = array<i32>} : memref<8x2x32xf32, #tpu.memory_space<vmem>>, vector<1x2x32xf32>,
    %c6 = arith.constant 6 : index
    %c0_163 = arith.constant 0 : index
    %c0_164 = arith.constant 0 : index
    %438 = vector.load %arg1[%c6, %c0_163, %c0_164] : memref<8x2x32xf32, #tpu.memory_space<vmem>>, vector<1x2x32xf32>
    %439 = vector.shape_cast %438 : vector<1x2x32xf32> to vector<2x32xf32>
    %cst_165 = arith.constant dense<0.000000e+00> : vector<2x128xf32>
    %440 = tpu.matmul %439, %5, %cst_165 {dimension_numbers = #tpu.dot_dimension_numbers<[1], [0], [0], [1], [0, 0, 1, 1], [], []>} : vector<2x32xf32>, vector<32x128xf32>, vector<2x128xf32> -> vector<2x128xf32>
    %cst_166 = arith.constant dense<0.000000e+00> : vector<2x128xf32>
    %441 = tpu.matmul %392, %9, %cst_166 {dimension_numbers = #tpu.dot_dimension_numbers<[1], [0], [0], [1], [0, 0, 1, 1], [], []>} : vector<2x32xf32>, vector<32x128xf32>, vector<2x128xf32> -> vector<2x128xf32>
    %442 = arith.addf %440, %441 : vector<2x128xf32>
    %443 = arith.addf %442, %13 : vector<2x128xf32>
    %444 = arith.negf %443 : vector<2x128xf32>
    %445 = math.exp %444 : vector<2x128xf32>
    %cst_167 = arith.constant 1.000000e+00 : f32
    %446 = vector.broadcast %cst_167 : f32 to vector<2x128xf32>
    %447 = arith.addf %446, %445 : vector<2x128xf32>
    %448 = arith.divf %446, %447 : vector<2x128xf32>
    %449 = vector.extract_strided_slice %448 {offsets = [0, 0], sizes = [2, 32], strides = [1, 1]} : vector<2x128xf32> to vector<2x32xf32>
    %450 = vector.extract_strided_slice %448 {offsets = [0, 32], sizes = [2, 32], strides = [1, 1]} : vector<2x128xf32> to vector<2x32xf32>
    %451 = vector.extract_strided_slice %448 {offsets = [0, 64], sizes = [2, 32], strides = [1, 1]} : vector<2x128xf32> to vector<2x32xf32>
    %452 = vector.extract_strided_slice %448 {offsets = [0, 96], sizes = [2, 32], strides = [1, 1]} : vector<2x128xf32> to vector<2x32xf32>
    %cst_168 = arith.constant 2.000000e+00 : f32
    %453 = vector.broadcast %cst_168 : f32 to vector<2x32xf32>
    %454 = arith.mulf %453, %452 : vector<2x32xf32>
    %cst_169 = arith.constant 1.000000e+00 : f32
    %455 = vector.broadcast %cst_169 : f32 to vector<2x32xf32>
    %456 = arith.subf %454, %455 : vector<2x32xf32>
    %457 = arith.mulf %450, %390 : vector<2x32xf32>
    %458 = arith.mulf %449, %456 : vector<2x32xf32>
    %459 = arith.addf %457, %458 : vector<2x32xf32>
    %460 = math.tanh %459 : vector<2x32xf32>
    %461 = arith.mulf %451, %460 : vector<2x32xf32>
    %cst_170 = arith.constant dense<0.000000e+00> : vector<2x128xf32>
    %462 = tpu.matmul %461, %7, %cst_170 {dimension_numbers = #tpu.dot_dimension_numbers<[1], [0], [0], [1], [0, 0, 1, 1], [], []>} : vector<2x32xf32>, vector<32x128xf32>, vector<2x128xf32> -> vector<2x128xf32>
    %cst_171 = arith.constant dense<0.000000e+00> : vector<2x128xf32>
    %463 = tpu.matmul %414, %11, %cst_171 {dimension_numbers = #tpu.dot_dimension_numbers<[1], [0], [0], [1], [0, 0, 1, 1], [], []>} : vector<2x32xf32>, vector<32x128xf32>, vector<2x128xf32> -> vector<2x128xf32>
    %464 = arith.addf %462, %463 : vector<2x128xf32>
    %465 = arith.addf %464, %15 : vector<2x128xf32>
    %466 = arith.negf %465 : vector<2x128xf32>
    %467 = math.exp %466 : vector<2x128xf32>
    %cst_172 = arith.constant 1.000000e+00 : f32
    %468 = vector.broadcast %cst_172 : f32 to vector<2x128xf32>
    %469 = arith.addf %468, %467 : vector<2x128xf32>
    %470 = arith.divf %468, %469 : vector<2x128xf32>
    %471 = vector.extract_strided_slice %470 {offsets = [0, 0], sizes = [2, 32], strides = [1, 1]} : vector<2x128xf32> to vector<2x32xf32>
    %472 = vector.extract_strided_slice %470 {offsets = [0, 32], sizes = [2, 32], strides = [1, 1]} : vector<2x128xf32> to vector<2x32xf32>
    %473 = vector.extract_strided_slice %470 {offsets = [0, 64], sizes = [2, 32], strides = [1, 1]} : vector<2x128xf32> to vector<2x32xf32>
    %474 = vector.extract_strided_slice %470 {offsets = [0, 96], sizes = [2, 32], strides = [1, 1]} : vector<2x128xf32> to vector<2x32xf32>
    %cst_173 = arith.constant 2.000000e+00 : f32
    %475 = vector.broadcast %cst_173 : f32 to vector<2x32xf32>
    %476 = arith.mulf %475, %474 : vector<2x32xf32>
    %cst_174 = arith.constant 1.000000e+00 : f32
    %477 = vector.broadcast %cst_174 : f32 to vector<2x32xf32>
    %478 = arith.subf %476, %477 : vector<2x32xf32>
    %479 = arith.mulf %472, %412 : vector<2x32xf32>
    %480 = arith.mulf %471, %478 : vector<2x32xf32>
    %481 = arith.addf %479, %480 : vector<2x32xf32>
    %482 = math.tanh %481 : vector<2x32xf32>
    %483 = arith.mulf %473, %482 : vector<2x32xf32>
    %cst_175 = arith.constant dense<0.000000e+00> : vector<2x16xf32>
    %484 = tpu.matmul %483, %0, %cst_175 {dimension_numbers = #tpu.dot_dimension_numbers<[1], [0], [0], [1], [0, 0, 1, 1], [], []>} : vector<2x32xf32>, vector<32x16xf32>, vector<2x16xf32> -> vector<2x16xf32>
    %485 = arith.addf %484, %2 : vector<2x16xf32>
    %cst_176 = arith.constant dense<0xFF800000> : vector<2xf32>
    %486 = vector.multi_reduction <maximumf>, %485, %cst_176 [1] : vector<2x16xf32> to vector<2xf32>
    %487 = vector.shape_cast %486 : vector<2xf32> to vector<2x1xf32>
    %488 = vector.broadcast %487 : vector<2x1xf32> to vector<2x16xf32>
    %489 = arith.subf %485, %488 : vector<2x16xf32>
    %490 = math.exp %489 : vector<2x16xf32>
    %cst_177 = arith.constant dense<0.000000e+00> : vector<2xf32>
    %491 = vector.multi_reduction <add>, %490, %cst_177 [1] : vector<2x16xf32> to vector<2xf32>
    %492 = vector.shape_cast %491 : vector<2xf32> to vector<2x1xf32>
    %493 = tpu.reciprocal %492 {approx = true} : vector<2x1xf32> -> vector<2x1xf32>
    %494 = arith.mulf %492, %493 : vector<2x1xf32>
    %cst_178 = arith.constant 2.000000e+00 : f32
    %495 = vector.broadcast %cst_178 : f32 to vector<2x1xf32>
    %496 = arith.subf %495, %494 : vector<2x1xf32>
    %497 = arith.mulf %493, %496 : vector<2x1xf32>
    %498 = vector.broadcast %497 : vector<2x1xf32> to vector<2x16xf32>
    %499 = arith.mulf %490, %498 : vector<2x16xf32>
    %cst_179 = arith.constant dense<0.000000e+00> : vector<2x32xf32>
    %500 = tpu.matmul %499, %1, %cst_179 {dimension_numbers = #tpu.dot_dimension_numbers<[1], [0], [0], [1], [0, 0, 1, 1], [], []>} : vector<2x16xf32>, vector<16x32xf32>, vector<2x32xf32> -> vector<2x32xf32>
    %cst_180 = arith.constant dense<0.000000e+00> : vector<2x32xf32>
    %501 = tpu.matmul %483, %3, %cst_180 {dimension_numbers = #tpu.dot_dimension_numbers<[1], [0], [0], [1], [0, 0, 1, 1], [], []>} : vector<2x32xf32>, vector<32x32xf32>, vector<2x32xf32> -> vector<2x32xf32>
    %502 = arith.addf %500, %501 : vector<2x32xf32>
    %503 = math.tanh %502 : vector<2x32xf32>
    %c6_181 = arith.constant 6 : index
    %c0_182 = arith.constant 0 : index
    %c0_183 = arith.constant 0 : index
    %504 = vector.load %arg11[%c6_181, %c0_182, %c0_183] : memref<8x2x32xf32, #tpu.memory_space<vmem>>, vector<1x2x32xf32>
    %505 = vector.shape_cast %504 : vector<1x2x32xf32> to vector<2x32xf32>
    %506 = vector.shape_cast %503 : vector<2x32xf32> to vector<1x2x32xf32>
    tpu.vector_store %arg11[%c6_181, %c0_182, %c0_183], %506 {strides = array<i32>} : memref<8x2x32xf32, #tpu.memory_space<vmem>>, vector<1x2x32xf32>,
    %c7 = arith.constant 7 : index
    %c0_184 = arith.constant 0 : index
    %c0_185 = arith.constant 0 : index
    %507 = vector.load %arg1[%c7, %c0_184, %c0_185] : memref<8x2x32xf32, #tpu.memory_space<vmem>>, vector<1x2x32xf32>
    %508 = vector.shape_cast %507 : vector<1x2x32xf32> to vector<2x32xf32>
    %cst_186 = arith.constant dense<0.000000e+00> : vector<2x128xf32>
    %509 = tpu.matmul %508, %5, %cst_186 {dimension_numbers = #tpu.dot_dimension_numbers<[1], [0], [0], [1], [0, 0, 1, 1], [], []>} : vector<2x32xf32>, vector<32x128xf32>, vector<2x128xf32> -> vector<2x128xf32>
    %cst_187 = arith.constant dense<0.000000e+00> : vector<2x128xf32>
    %510 = tpu.matmul %461, %9, %cst_187 {dimension_numbers = #tpu.dot_dimension_numbers<[1], [0], [0], [1], [0, 0, 1, 1], [], []>} : vector<2x32xf32>, vector<32x128xf32>, vector<2x128xf32> -> vector<2x128xf32>
    %511 = arith.addf %509, %510 : vector<2x128xf32>
    %512 = arith.addf %511, %13 : vector<2x128xf32>
    %513 = arith.negf %512 : vector<2x128xf32>
    %514 = math.exp %513 : vector<2x128xf32>
    %cst_188 = arith.constant 1.000000e+00 : f32
    %515 = vector.broadcast %cst_188 : f32 to vector<2x128xf32>
    %516 = arith.addf %515, %514 : vector<2x128xf32>
    %517 = arith.divf %515, %516 : vector<2x128xf32>
    %518 = vector.extract_strided_slice %517 {offsets = [0, 0], sizes = [2, 32], strides = [1, 1]} : vector<2x128xf32> to vector<2x32xf32>
    %519 = vector.extract_strided_slice %517 {offsets = [0, 32], sizes = [2, 32], strides = [1, 1]} : vector<2x128xf32> to vector<2x32xf32>
    %520 = vector.extract_strided_slice %517 {offsets = [0, 64], sizes = [2, 32], strides = [1, 1]} : vector<2x128xf32> to vector<2x32xf32>
    %521 = vector.extract_strided_slice %517 {offsets = [0, 96], sizes = [2, 32], strides = [1, 1]} : vector<2x128xf32> to vector<2x32xf32>
    %cst_189 = arith.constant 2.000000e+00 : f32
    %522 = vector.broadcast %cst_189 : f32 to vector<2x32xf32>
    %523 = arith.mulf %522, %521 : vector<2x32xf32>
    %cst_190 = arith.constant 1.000000e+00 : f32
    %524 = vector.broadcast %cst_190 : f32 to vector<2x32xf32>
    %525 = arith.subf %523, %524 : vector<2x32xf32>
    %526 = arith.mulf %519, %459 : vector<2x32xf32>
    %527 = arith.mulf %518, %525 : vector<2x32xf32>
    %528 = arith.addf %526, %527 : vector<2x32xf32>
    %529 = math.tanh %528 : vector<2x32xf32>
    %530 = arith.mulf %520, %529 : vector<2x32xf32>
    %cst_191 = arith.constant dense<0.000000e+00> : vector<2x128xf32>
    %531 = tpu.matmul %530, %7, %cst_191 {dimension_numbers = #tpu.dot_dimension_numbers<[1], [0], [0], [1], [0, 0, 1, 1], [], []>} : vector<2x32xf32>, vector<32x128xf32>, vector<2x128xf32> -> vector<2x128xf32>
    %cst_192 = arith.constant dense<0.000000e+00> : vector<2x128xf32>
    %532 = tpu.matmul %483, %11, %cst_192 {dimension_numbers = #tpu.dot_dimension_numbers<[1], [0], [0], [1], [0, 0, 1, 1], [], []>} : vector<2x32xf32>, vector<32x128xf32>, vector<2x128xf32> -> vector<2x128xf32>
    %533 = arith.addf %531, %532 : vector<2x128xf32>
    %534 = arith.addf %533, %15 : vector<2x128xf32>
    %535 = arith.negf %534 : vector<2x128xf32>
    %536 = math.exp %535 : vector<2x128xf32>
    %cst_193 = arith.constant 1.000000e+00 : f32
    %537 = vector.broadcast %cst_193 : f32 to vector<2x128xf32>
    %538 = arith.addf %537, %536 : vector<2x128xf32>
    %539 = arith.divf %537, %538 : vector<2x128xf32>
    %540 = vector.extract_strided_slice %539 {offsets = [0, 0], sizes = [2, 32], strides = [1, 1]} : vector<2x128xf32> to vector<2x32xf32>
    %541 = vector.extract_strided_slice %539 {offsets = [0, 32], sizes = [2, 32], strides = [1, 1]} : vector<2x128xf32> to vector<2x32xf32>
    %542 = vector.extract_strided_slice %539 {offsets = [0, 64], sizes = [2, 32], strides = [1, 1]} : vector<2x128xf32> to vector<2x32xf32>
    %543 = vector.extract_strided_slice %539 {offsets = [0, 96], sizes = [2, 32], strides = [1, 1]} : vector<2x128xf32> to vector<2x32xf32>
    %cst_194 = arith.constant 2.000000e+00 : f32
    %544 = vector.broadcast %cst_194 : f32 to vector<2x32xf32>
    %545 = arith.mulf %544, %543 : vector<2x32xf32>
    %cst_195 = arith.constant 1.000000e+00 : f32
    %546 = vector.broadcast %cst_195 : f32 to vector<2x32xf32>
    %547 = arith.subf %545, %546 : vector<2x32xf32>
    %548 = arith.mulf %541, %481 : vector<2x32xf32>
    %549 = arith.mulf %540, %547 : vector<2x32xf32>
    %550 = arith.addf %548, %549 : vector<2x32xf32>
    %551 = math.tanh %550 : vector<2x32xf32>
    %552 = arith.mulf %542, %551 : vector<2x32xf32>
    %cst_196 = arith.constant dense<0.000000e+00> : vector<2x16xf32>
    %553 = tpu.matmul %552, %0, %cst_196 {dimension_numbers = #tpu.dot_dimension_numbers<[1], [0], [0], [1], [0, 0, 1, 1], [], []>} : vector<2x32xf32>, vector<32x16xf32>, vector<2x16xf32> -> vector<2x16xf32>
    %554 = arith.addf %553, %2 : vector<2x16xf32>
    %cst_197 = arith.constant dense<0xFF800000> : vector<2xf32>
    %555 = vector.multi_reduction <maximumf>, %554, %cst_197 [1] : vector<2x16xf32> to vector<2xf32>
    %556 = vector.shape_cast %555 : vector<2xf32> to vector<2x1xf32>
    %557 = vector.broadcast %556 : vector<2x1xf32> to vector<2x16xf32>
    %558 = arith.subf %554, %557 : vector<2x16xf32>
    %559 = math.exp %558 : vector<2x16xf32>
    %cst_198 = arith.constant dense<0.000000e+00> : vector<2xf32>
    %560 = vector.multi_reduction <add>, %559, %cst_198 [1] : vector<2x16xf32> to vector<2xf32>
    %561 = vector.shape_cast %560 : vector<2xf32> to vector<2x1xf32>
    %562 = tpu.reciprocal %561 {approx = true} : vector<2x1xf32> -> vector<2x1xf32>
    %563 = arith.mulf %561, %562 : vector<2x1xf32>
    %cst_199 = arith.constant 2.000000e+00 : f32
    %564 = vector.broadcast %cst_199 : f32 to vector<2x1xf32>
    %565 = arith.subf %564, %563 : vector<2x1xf32>
    %566 = arith.mulf %562, %565 : vector<2x1xf32>
    %567 = vector.broadcast %566 : vector<2x1xf32> to vector<2x16xf32>
    %568 = arith.mulf %559, %567 : vector<2x16xf32>
    %cst_200 = arith.constant dense<0.000000e+00> : vector<2x32xf32>
    %569 = tpu.matmul %568, %1, %cst_200 {dimension_numbers = #tpu.dot_dimension_numbers<[1], [0], [0], [1], [0, 0, 1, 1], [], []>} : vector<2x16xf32>, vector<16x32xf32>, vector<2x32xf32> -> vector<2x32xf32>
    %cst_201 = arith.constant dense<0.000000e+00> : vector<2x32xf32>
    %570 = tpu.matmul %552, %3, %cst_201 {dimension_numbers = #tpu.dot_dimension_numbers<[1], [0], [0], [1], [0, 0, 1, 1], [], []>} : vector<2x32xf32>, vector<32x32xf32>, vector<2x32xf32> -> vector<2x32xf32>
    %571 = arith.addf %569, %570 : vector<2x32xf32>
    %572 = math.tanh %571 : vector<2x32xf32>
    %c7_202 = arith.constant 7 : index
    %c0_203 = arith.constant 0 : index
    %c0_204 = arith.constant 0 : index
    %573 = vector.load %arg11[%c7_202, %c0_203, %c0_204] : memref<8x2x32xf32, #tpu.memory_space<vmem>>, vector<1x2x32xf32>
    %574 = vector.shape_cast %573 : vector<1x2x32xf32> to vector<2x32xf32>
    %575 = vector.shape_cast %572 : vector<2x32xf32> to vector<1x2x32xf32>
    tpu.vector_store %arg11[%c7_202, %c0_203, %c0_204], %575 {strides = array<i32>} : memref<8x2x32xf32, #tpu.memory_space<vmem>>, vector<1x2x32xf32>,
    %c0_205 = arith.constant 0 : index
    %c0_206 = arith.constant 0 : index
    %c0_207 = arith.constant 0 : index
    %576 = vector.load %arg12[%c0_205, %c0_206, %c0_207] : memref<2x2x32xf32, #tpu.memory_space<vmem>>, vector<1x2x32xf32>
    %577 = vector.shape_cast %576 : vector<1x2x32xf32> to vector<2x32xf32>
    %578 = vector.shape_cast %530 : vector<2x32xf32> to vector<1x2x32xf32>
    tpu.vector_store %arg12[%c0_205, %c0_206, %c0_207], %578 {strides = array<i32>} : memref<2x2x32xf32, #tpu.memory_space<vmem>>, vector<1x2x32xf32>,
    %c0_208 = arith.constant 0 : index
    %c0_209 = arith.constant 0 : index
    %c0_210 = arith.constant 0 : index
    %579 = vector.load %arg13[%c0_208, %c0_209, %c0_210] : memref<2x2x32xf32, #tpu.memory_space<vmem>>, vector<1x2x32xf32>
    %580 = vector.shape_cast %579 : vector<1x2x32xf32> to vector<2x32xf32>
    %581 = vector.shape_cast %528 : vector<2x32xf32> to vector<1x2x32xf32>
    tpu.vector_store %arg13[%c0_208, %c0_209, %c0_210], %581 {strides = array<i32>} : memref<2x2x32xf32, #tpu.memory_space<vmem>>, vector<1x2x32xf32>,
    %c1_211 = arith.constant 1 : index
    %c0_212 = arith.constant 0 : index
    %c0_213 = arith.constant 0 : index
    %582 = vector.load %arg12[%c1_211, %c0_212, %c0_213] : memref<2x2x32xf32, #tpu.memory_space<vmem>>, vector<1x2x32xf32>
    %583 = vector.shape_cast %582 : vector<1x2x32xf32> to vector<2x32xf32>
    %584 = vector.shape_cast %552 : vector<2x32xf32> to vector<1x2x32xf32>
    tpu.vector_store %arg12[%c1_211, %c0_212, %c0_213], %584 {strides = array<i32>} : memref<2x2x32xf32, #tpu.memory_space<vmem>>, vector<1x2x32xf32>,
    %c1_214 = arith.constant 1 : index
    %c0_215 = arith.constant 0 : index
    %c0_216 = arith.constant 0 : index
    %585 = vector.load %arg13[%c1_214, %c0_215, %c0_216] : memref<2x2x32xf32, #tpu.memory_space<vmem>>, vector<1x2x32xf32>
    %586 = vector.shape_cast %585 : vector<1x2x32xf32> to vector<2x32xf32>
    %587 = vector.shape_cast %550 : vector<2x32xf32> to vector<1x2x32xf32>
    tpu.vector_store %arg13[%c1_214, %c0_215, %c0_216], %587 {strides = array<i32>} : memref<2x2x32xf32, #tpu.memory_space<vmem>>, vector<1x2x32xf32>,
    %c0_217 = arith.constant 0 : index
    %c0_218 = arith.constant 0 : index
    %588 = vector.load %arg14[%c0_217, %c0_218] : memref<2x16xf32, #tpu.memory_space<vmem>>, vector<2x16xf32>
    tpu.vector_store %arg14[%c0_217, %c0_218], %568 {strides = array<i32>} : memref<2x16xf32, #tpu.memory_space<vmem>>, vector<2x16xf32>,
    return
  }
  func.func @transform_0(%arg0: i32) -> (i32, i32, i32) {
    %c0_i32 = arith.constant 0 : i32
    %c0_i32_0 = arith.constant 0 : i32
    %c0_i32_1 = arith.constant 0 : i32
    %c0_i32_2 = arith.constant 0 : i32
    return %c0_i32, %c0_i32_0, %c0_i32_1 : i32, i32, i32
  }
  func.func @transform_1(%arg0: i32) -> (i32, i32, i32) {
    %c0_i32 = arith.constant 0 : i32
    %c0_i32_0 = arith.constant 0 : i32
    %c0_i32_1 = arith.constant 0 : i32
    %c0_i32_2 = arith.constant 0 : i32
    return %c0_i32, %c0_i32_0, %c0_i32_1 : i32, i32, i32
  }
  func.func @transform_2(%arg0: i32) -> (i32, i32, i32) {
    %c0_i32 = arith.constant 0 : i32
    %c0_i32_0 = arith.constant 0 : i32
    %c0_i32_1 = arith.constant 0 : i32
    %c0_i32_2 = arith.constant 0 : i32
    return %c0_i32, %c0_i32_0, %c0_i32_1 : i32, i32, i32
  }
  func.func @transform_3(%arg0: i32) -> (i32, i32) {
    %c0_i32 = arith.constant 0 : i32
    %c0_i32_0 = arith.constant 0 : i32
    %c0_i32_1 = arith.constant 0 : i32
    return %c0_i32, %c0_i32_0 : i32, i32
  }
  func.func @transform_4(%arg0: i32) -> (i32, i32) {
    %c0_i32 = arith.constant 0 : i32
    %c0_i32_0 = arith.constant 0 : i32
    %c0_i32_1 = arith.constant 0 : i32
    return %c0_i32, %c0_i32_0 : i32, i32
  }
  func.func @transform_5(%arg0: i32) -> (i32, i32) {
    %c0_i32 = arith.constant 0 : i32
    %c0_i32_0 = arith.constant 0 : i32
    %c0_i32_1 = arith.constant 0 : i32
    return %c0_i32, %c0_i32_0 : i32, i32
  }
  func.func @transform_6(%arg0: i32) -> (i32, i32, i32) {
    %c0_i32 = arith.constant 0 : i32
    %c0_i32_0 = arith.constant 0 : i32
    %c0_i32_1 = arith.constant 0 : i32
    %c0_i32_2 = arith.constant 0 : i32
    return %c0_i32, %c0_i32_0, %c0_i32_1 : i32, i32, i32
  }
  func.func @transform_7(%arg0: i32) -> (i32, i32, i32) {
    %c0_i32 = arith.constant 0 : i32
    %c0_i32_0 = arith.constant 0 : i32
    %c0_i32_1 = arith.constant 0 : i32
    %c0_i32_2 = arith.constant 0 : i32
    return %c0_i32, %c0_i32_0, %c0_i32_1 : i32, i32, i32
  }
  func.func @transform_8(%arg0: i32) -> (i32, i32, i32) {
    %c0_i32 = arith.constant 0 : i32
    %c0_i32_0 = arith.constant 0 : i32
    %c0_i32_1 = arith.constant 0 : i32
    %c0_i32_2 = arith.constant 0 : i32
    return %c0_i32, %c0_i32_0, %c0_i32_1 : i32, i32, i32
  }
  func.func @transform_9(%arg0: i32) -> (i32, i32) {
    %c0_i32 = arith.constant 0 : i32
    %c0_i32_0 = arith.constant 0 : i32
    %c0_i32_1 = arith.constant 0 : i32
    return %c0_i32, %c0_i32_0 : i32, i32
  }
  func.func @transform_10(%arg0: i32) -> (i32, i32, i32) {
    %c0_i32 = arith.constant 0 : i32
    %c0_i32_0 = arith.constant 0 : i32
    %c0_i32_1 = arith.constant 0 : i32
    %c0_i32_2 = arith.constant 0 : i32
    return %c0_i32, %c0_i32_0, %c0_i32_1 : i32, i32, i32
  }
  func.func @transform_11(%arg0: i32) -> (i32, i32, i32) {
    %c0_i32 = arith.constant 0 : i32
    %c0_i32_0 = arith.constant 0 : i32
    %c0_i32_1 = arith.constant 0 : i32
    %c0_i32_2 = arith.constant 0 : i32
    return %c0_i32, %c0_i32_0, %c0_i32_1 : i32, i32, i32
  }
  func.func @transform_12(%arg0: i32) -> (i32, i32, i32) {
    %c0_i32 = arith.constant 0 : i32
    %c0_i32_0 = arith.constant 0 : i32
    %c0_i32_1 = arith.constant 0 : i32
    %c0_i32_2 = arith.constant 0 : i32
    return %c0_i32, %c0_i32_0, %c0_i32_1 : i32, i32, i32
  }
  func.func @transform_13(%arg0: i32) -> (i32, i32) {
    %c0_i32 = arith.constant 0 : i32
    %c0_i32_0 = arith.constant 0 : i32
    %c0_i32_1 = arith.constant 0 : i32
    return %c0_i32, %c0_i32_0 : i32, i32
  }
}

</mosaic_0001>

<bundles_post_ra>
// kernel: tpu_custom_call.1
= control target key start
LH: loop header
LB: loop body
LE: loop exit
PB: predicated region body
PF: predicated region fallthrough
CT: control target
= control target key end

     0   :  { %19 = vsyncpa [#allocation3], 0  ;;  %s7412_s0 = inlined_call_operand.hbm [shape: f32[8,2,32], index: 0, kind: input, shape index: {}]   ;;  %s7413_s1 = inlined_call_operand.vmem [shape: f32[2,2,32], index: 1, kind: input, shape index: {}]   ;;  %s7414_s2 = inlined_call_operand.hbm [shape: f32[2,2,32], index: 2, kind: input, shape index: {}]   ;;  %s7415_s3 = inlined_call_operand.vmem [shape: f32[32,16], index: 3, kind: input, shape index: {}]   ;;  %s7416_s4 = inlined_call_operand.hbm [shape: f32[16,32], index: 4, kind: input, shape index: {}]   ;;  %s7417_s5 = inlined_call_operand.vmem [shape: f32[2,16], index: 5, kind: input, shape index: {}]   ;;  %s7418_s6 = inlined_call_operand.vmem [shape: f32[2,32,128], index: 6, kind: input, shape index: {}]   ;;  %s7419_s7 = inlined_call_operand.hbm [shape: f32[2,32,128], index: 7, kind: input, shape index: {}]   ;;  %s7420_s8 = inlined_call_operand.vmem [shape: f32[2,2,128], index: 8, kind: input, shape index: {}]   ;;  %s7421_s9 = inlined_call_operand.hbm [shape: f32[32,32], index: 9, kind: input, shape index: {}]   ;;  %s7422_s10 = inlined_call_operand.hbm [shape: f32[8,2,32], index: 10, kind: output, shape index: {0}]   ;;  %s7423_s11 = inlined_call_operand.hbm [shape: f32[2,2,32], index: 11, kind: output, shape index: {1}]   ;;  %s7424_s12 = inlined_call_operand.hbm [shape: f32[2,2,32], index: 12, kind: output, shape index: {2}]   ;;  %s7425_s13 = inlined_call_operand.hbm [shape: f32[2,16], index: 13, kind: output, shape index: {3}]  }
   0x1   :  { %20 = vsyncpa [#allocation6], 0 }
   0x2   :  { %21 = vsyncpa [#allocation9], 0 }
   0x3   :  { %22 = vsyncpa [#allocation4], 0 }
   0x4   :  { %23 = vsyncpa [#allocation13], 0 }
   0x5   :  { %24 = vsyncpa [#allocation16], 0  ;;  %s6505_s25 = smov [#allocation5]   ;;  %s6295_s29 = scalar_lea.hbm %s7414_s2, 64 }
   0x6   :  { %s44_s26 = sshll.u32 %s6505_s25, 4  ;;  %p6296_p0 = scmp.ne.s32.totalorder %s7414_s2, %s6295_s29  ;;  %s45_s26 = int_to_ptr.vmem [resolvable:$true] %s44_s26 }
   0x7   :  { %p6299_p1 = scmp.lt.u32.totalorder %s6295_s29, %s7414_s2 }
   0x9   :  { %p6301_p2 = pnand %p6299_p1, %p6296_p0 }
   0xb   :  { %6304 = shalt.err (!%p6301_p2)
}
   0xc   :  { %s6305_s17 = scalar_lea.vmem %s45_s26, 64  ;;  %p6310_p4 = scmp.lt.s32.totalorder %s45_s26, %s45_s26 }
   0xd   :  { %p6306_p3 = scmp.ne.s32.totalorder %s45_s26, %s6305_s17  ;;  %p6311_p5 = scmp.lt.s32.totalorder %s6305_s17, %s6305_s17 }
   0xf   :  { %p6312_p6 = por %p6311_p5, %p6310_p4 }
  0x11   :  { %p6313_p7 = pnand %p6312_p6, %p6306_p3 }
  0x13   :  { %6316 = shalt.err (!%p6313_p7)
}
  0x14   :  { %s6506_s18 = smov 32   ;;  %s6507_s19 = smov 2  }
  0x15   :  { %50 = dma.hbm_to_vmem [thread:$0]  %s7414_s2, 64, %s45_s26, [#allocation6], %s6506_s18, %s6506_s18, %s6507_s19  }
  0x16   :  { %s6508_s22 = smov [#allocation8]   ;;  %s6509_s24 = smov [#allocation2]  }
  0x17   :  { %s74_s23 = sshll.u32 %s6508_s22, 4  ;;  %s30_s25 = sshll.u32 %s6509_s24, 4  ;;  %s75_s23 = int_to_ptr.vmem [resolvable:$true] %s74_s23  ;;  %s31_s25 = int_to_ptr.vmem [resolvable:$true] %s30_s25 }
  0x18   :  { %s6317_s29 = scalar_lea.hbm %s7419_s7, 1024 }
  0x19   :  { %p6318_p8 = scmp.ne.s32.totalorder %s7419_s7, %s6317_s29  ;;  %p6321_p9 = scmp.lt.u32.totalorder %s6317_s29, %s7419_s7 }
  0x1b   :  { %p6323_p10 = pnand %p6321_p9, %p6318_p8 }
  0x1d   :  { %6326 = shalt.err (!%p6323_p10)
}
  0x1e   :  { %s6327_s2 = scalar_lea.vmem %s75_s23, 1024  ;;  %p6332_p12 = scmp.lt.s32.totalorder %s75_s23, %s75_s23 }
  0x1f   :  { %p6328_p11 = scmp.ne.s32.totalorder %s75_s23, %s6327_s2  ;;  %p6333_p13 = scmp.lt.s32.totalorder %s6327_s2, %s6327_s2 }
  0x21   :  { %p6334_p0 = por %p6333_p13, %p6332_p12 }
  0x23   :  { %p6335_p1 = pnand %p6334_p0, %p6328_p11 }
  0x25   :  { %6338 = shalt.err (!%p6335_p1)
}
  0x26   :  { %s6510_s26 = smov 128   ;;  %s6511_s17 = smov 8  }
  0x27   :  { %80 = dma.hbm_to_vmem [thread:$0]  %s7419_s7, 1024, %s75_s23, [#allocation9], %s6510_s26, %s6510_s26, %s6511_s17  }
  0x28   :  { %s6339_s27 = scalar_lea.hbm %s7412_s0, 256 }
  0x29   :  { %p6340_p2 = scmp.ne.s32.totalorder %s7412_s0, %s6339_s27  ;;  %p6343_p3 = scmp.lt.u32.totalorder %s6339_s27, %s7412_s0 }
  0x2b   :  { %p6345_p4 = pnand %p6343_p3, %p6340_p2 }
  0x2d   :  { %6348 = shalt.err (!%p6345_p4)
}
  0x2e   :  { %s6349_s15 = scalar_lea.vmem %s31_s25, 256  ;;  %p6354_p6 = scmp.lt.s32.totalorder %s31_s25, %s31_s25 }
  0x2f   :  { %p6350_p5 = scmp.ne.s32.totalorder %s31_s25, %s6349_s15  ;;  %p6355_p7 = scmp.lt.s32.totalorder %s6349_s15, %s6349_s15 }
  0x31   :  { %p6356_p8 = por %p6355_p7, %p6354_p6 }
  0x33   :  { %p6357_p9 = pnand %p6356_p8, %p6350_p5 }
  0x35   :  { %6360 = shalt.err (!%p6357_p9)
}
  0x36   :  { %36 = dma.hbm_to_vmem [thread:$0]  %s7412_s0, 256, %s31_s25, [#allocation3], %s6506_s18, %s6506_s18, %s6507_s19  }
  0x37   :  { %s6512_s16 = smov [#allocation7]   ;;  %s6513_s20 = smov [#allocation10]  }
  0x38   :  { %s58_s2 = sshll.u32 %s6512_s16, 4  ;;  %s88_s21 = sshll.u32 %s6513_s20, 4  ;;  %s59_s2 = int_to_ptr.vmem [resolvable:$true] %s58_s2  ;;  %s89_s21 = int_to_ptr.vmem [resolvable:$true] %s88_s21 }
  0x39   :  { %s6361_s27 = scalar_lea.hbm %s7416_s4, 256 }
  0x3a   :  { %p6362_p10 = scmp.ne.s32.totalorder %s7416_s4, %s6361_s27  ;;  %p6365_p11 = scmp.lt.u32.totalorder %s6361_s27, %s7416_s4 }
  0x3c   :  { %p6367_p12 = pnand %p6365_p11, %p6362_p10 }
  0x3e   :  { %6370 = shalt.err (!%p6367_p12)
}
  0x3f   :  { %s6371_s0 = scalar_lea.vmem %s59_s2, 256  ;;  %p6376_p0 = scmp.lt.s32.totalorder %s59_s2, %s59_s2 }
  0x40   :  { %p6372_p13 = scmp.ne.s32.totalorder %s59_s2, %s6371_s0  ;;  %p6377_p1 = scmp.lt.s32.totalorder %s6371_s0, %s6371_s0 }
  0x42   :  { %p6378_p2 = por %p6377_p1, %p6376_p0 }
  0x44   :  { %p6379_p3 = pnand %p6378_p2, %p6372_p13 }
  0x46   :  { %6382 = shalt.err (!%p6379_p3)
}
  0x47   :  { %64 = dma.hbm_to_vmem [thread:$0]  %s7416_s4, 256, %s59_s2, [#allocation6], %s6510_s26, %s6510_s26, %s6511_s17  }
  0x48   :  { %s6383_s16 = scalar_lea.hbm %s7421_s9, 512 }
  0x49   :  { %p6384_p4 = scmp.ne.s32.totalorder %s7421_s9, %s6383_s16  ;;  %p6387_p5 = scmp.lt.u32.totalorder %s6383_s16, %s7421_s9 }
  0x4b   :  { %p6389_p6 = pnand %p6387_p5, %p6384_p4 }
  0x4d   :  { %6392 = shalt.err (!%p6389_p6)
}
  0x4e   :  { %s6393_s28 = scalar_lea.vmem %s89_s21, 512  ;;  %p6398_p8 = scmp.lt.s32.totalorder %s89_s21, %s89_s21 }
  0x4f   :  { %p6394_p7 = scmp.ne.s32.totalorder %s89_s21, %s6393_s28  ;;  %p6399_p9 = scmp.lt.s32.totalorder %s6393_s28, %s6393_s28 }
  0x51   :  { %p6400_p10 = por %p6399_p9, %p6398_p8 }
  0x53   :  { %p6401_p11 = pnand %p6400_p10, %p6394_p7 }
  0x55   :  { %6404 = shalt.err (!%p6401_p11)
}
  0x56   :  { %94 = dma.hbm_to_vmem [thread:$0]  %s7421_s9, 512, %s89_s21, [#allocation9], %s6510_s26, %s6510_s26, %s6511_s17  }
  0x57   :  { %6493 = dma.done.wait [#allocation3], 256  }
  0x58   :  { %6494 = vsyncadd [#allocation3], 4294967040 }
  0x59   :  { %6495 = dma.done.wait [#allocation6], 320  }
  0x5a   :  { %6496 = vsyncadd [#allocation6], 4294966976 }
  0x5b   :  { %6497 = dma.done.wait [#allocation9], 1536  }
  0x5c   :  { %6498 = vsyncadd [#allocation9], 4294965760  ;;  %v6514_v0 = vmov 0.0|0.0   ;;  %vm6515_vm0 = vmmov 0   ;;  %v6516_v1 = vmov 0.0   ;;  %v130_v2 = vld [vmem:[#allocation8] sm:$0xff] }
  0x5d   :  { %5803 = vmatprep.subr.bf16.mxu0 %v6514_v0  ;;  %5809 = vmatprep.subr.bf16.mxu1 %v6514_v0  ;;  %v131_v3 = vld [vmem:[#allocation8 + $0x8] sm:$0xff]  ;;  %v121_v4 = vld [vmem:[%s7418_s6] sm:$0xff]  ;;  %v132_v7 = vld [vmem:[#allocation8 + $0x10] sm:$0xff]  ;;  %vm149_vm1 = vcmask 261120   ;;  %vm579_vm2 = vcmask 123904   ;;  %vm664_vm3 = vcmask 130048  }
  0x5e   :  { %5227 = vmatprep.mubr.msk.f32.mxu0 %vm6515_vm0, %v6516_v1  ;;  %5238 = vmatprep.mubr.msk.f32.mxu1 %vm6515_vm0, %v6516_v1  ;;  %v6677_v5 = vpack.c.bf16 %v131_v3, %v130_v2  ;;  %v122_v6 = vld [vmem:[%s7418_s6 + $0x8] sm:$0xff]  ;;  %v133_v8 = vld [vmem:[#allocation8 + $0x18] sm:$0xff]  ;;  %v123_v10 = vld [vmem:[%s7418_s6 + $0x10] sm:$0xff]  ;;  %vm739_vm4 = vcmask 254976   ;;  %s6519_s28 = smov [#allocation12]  }
  0x5f   :  { %v6682_v9 = vpack.c.bf16 %v122_v6, %v121_v4  ;;  %v124_v11 = vld [vmem:[%s7418_s6 + $0x18] sm:$0xff]  ;;  %v6691_v12 = vpack.c.bf16 %v133_v8, %v132_v7  ;;  %v142_v14 = vld [vmem:[%s7413_s1] sm:$0x3]  ;;  %v145_v29 = vld [vmem:[#allocation5] sm:$0x3]  ;;  %s4814_s4 = sshll.u32 %s6519_s28, 4  ;;  %s4815_s4 = int_to_ptr.vmem [resolvable:$true] %s4814_s4 }
  0x60   :  { %5805 = vmatpush3.bf16.msra.mxu0 %v6677_v5  ;;  %v6695_v13 = vpack.c.bf16 %v124_v11, %v123_v10  ;;  %v148_v15 = vld [vmem:[#allocation2] sm:$0x3]  ;;  %v135_v36 = vld [vmem:[#allocation8 + $0x20] sm:$0xff]  ;;  %v136_v37 = vld [vmem:[#allocation8 + $0x28] sm:$0xff]  ;;  %s6405_s2 = scalar_lea.vmem %s4815_s4, 64  ;;  %p6410_p13 = scmp.lt.s32.totalorder %s4815_s4, %s4815_s4 }
  0x61   :  { %5811 = vmatpush3.bf16.msra.mxu1 %v6682_v9  ;;  %5806 = vmatprep.subr.bf16.mxu0 %v6514_v0  ;;  %v6714_v17 = vld [vmem:[%s7420_s8] sm:$0x3]  ;;  %v6726_v39 = vpack.c.bf16 %v136_v37, %v135_v36  ;;  %v4862_v40 = vld [vmem:[%s7418_s6 + $0x28] sm:$0xff]  ;;  %v137_v41 = vld [vmem:[#allocation8 + $0x30] sm:$0xff]  ;;  %p6406_p12 = scmp.ne.s32.totalorder %s4815_s4, %s6405_s2  ;;  %p6411_p0 = scmp.lt.s32.totalorder %s6405_s2, %s6405_s2 }
  0x62   :  { %5812 = vmatprep.subr.bf16.mxu1 %v6514_v0  ;;  %v4861_v38 = vld [vmem:[%s7418_s6 + $0x20] sm:$0xff]  ;;  %v4863_v44 = vld [vmem:[%s7418_s6 + $0x30] sm:$0xff]  ;;  %v4864_v45 = vld [vmem:[%s7418_s6 + $0x38] sm:$0xff]  ;;  %s6517_s6 = smov 64  }
  0x63   :  { %v138_v42 = vld [vmem:[#allocation8 + $0x38] sm:$0xff]  ;;  %v6731_v43 = vpack.c.bf16 %v4862_v40, %v4861_v38  ;;  %v6744_v47 = vpack.c.bf16 %v4864_v45, %v4863_v44  ;;  %v147_v52 = vld [vmem:[#allocation5 + $0x2] sm:$0x3]  ;;  %p6412_p1 = por %p6411_p0, %p6410_p13 }
  0x64   :  { %5808 = vmatpush3.bf16.msra.mxu0 %v6691_v12  ;;  %v6740_v46 = vpack.c.bf16 %v138_v42, %v137_v41  ;;  %v4866_v48 = vld [vmem:[%s7413_s1 + $0x2] sm:$0x3] }
  0x65   :  { %5814 = vmatpush3.bf16.msra.mxu1 %v6695_v13  ;;  %5815 = vmatprep.subr.bf16.mxu0 %v6514_v0  ;;  %v6769_v56 = vld [vmem:[%s7420_s8 + $0x2] sm:$0x3]  ;;  %p6413_p2 = pnand %p6412_p1, %p6406_p12 }
  0x66   :  { %5821 = vmatprep.subr.bf16.mxu1 %v6514_v0 }
  0x67   :  { %5228 = vmatmul.mubr.msk.f32.vlgmr.msra.gmra.mrb[0].mxu0 %vm149_vm1, %v142_v14 }
  0x68   :  { %5239 = vmatmul.mubr.msk.f32.vlgmr.msra.gmra.mrb[0].mxu1 %vm149_vm1, %v148_v15  ;;  %5249 = vmatprep.mubr.msk.f32.mxu0 %vm6515_vm0, %v6516_v1  ;;  %v110_v15 = vld [vmem:[%s7415_s3] sm:$0xff] }
  0x69   :  { %5260 = vmatprep.mubr.msk.f32.mxu1 %vm6515_vm0, %v6516_v1  ;;  %5817 = vmatpush3.bf16.msra.mxu0 %v6726_v39 }
  0x6a   :  { %5823 = vmatpush3.bf16.msra.mxu1 %v6731_v43  ;;  %5818 = vmatprep.subr.bf16.mxu0 %v6514_v0 }
  0x6b   :  { %5824 = vmatprep.subr.bf16.mxu1 %v6514_v0 }
  0x6d   :  { %5820 = vmatpush3.bf16.msra.mxu0 %v6740_v46 }
  0x6e   :  { %5826 = vmatpush3.bf16.msra.mxu1 %v6744_v47  ;;  %5827 = vmatprep.subr.bf16.mxu0 %v6514_v0 }
  0x6f   :  { %5833 = vmatprep.subr.bf16.mxu1 %v6514_v0 }
  0x70   :  { %5250 = vmatmul.mubr.msk.f32.vlgmr.msra.gmra.mrb[2].mxu0 %vm149_vm1, %v4866_v48 }
  0x71   :  { %5271 = vmatprep.mubr.msk.f32.mxu0 %vm6515_vm0, %v6516_v1 }
 0x13a   :  { %v219_v16 = vpop.f32.mrb[0].mxu0 }
 0x13b   :  { %v292_v18 = vpop.f32.mrb[0].mxu1  ;;  %v5229_v19 = vpop.f32.mrb[1].mxu0 }
 0x13c   :  { %v293_v20 = vadd.f32 %v292_v18, %v219_v16  ;;  %v5240_v21 = vpop.f32.mrb[1].mxu1  ;;  %v111_v16 = vld [vmem:[%s7415_s3 + $0x8] sm:$0xff] }
 0x13d   :  { %v117_v18 = vld [vmem:[#allocation10] sm:$0xff]  ;;  %v6783_v19 = vpack.c.bf16 %v111_v16, %v110_v15  ;;  %v112_v21 = vld [vmem:[%s7415_s3 + $0x10] sm:$0xff] }
 0x13e   :  { %v296_v22 = vadd.f32 %v293_v20, %v6714_v17  ;;  %v118_v20 = vld [vmem:[#allocation10 + $0x8] sm:$0xff] }
 0x13f   :  { %5829 = vmatpush3.bf16.msra.mxu0 %v6783_v19 }
 0x140   :  { %v4869_v23 = vmul.f32 -1.442695, %v296_v22  ;;  %v113_v22 = vld [vmem:[%s7415_s3 + $0x18] sm:$0xff]  ;;  %5830 = vmatprep.subr.bf16.mxu0 %v6514_v0 }
 0x142   :  { %6148 = vpow2.f32 %v4869_v23  ;;  %v6791_v23 = vpack.c.bf16 %v118_v20, %v117_v18 }
 0x143   :  { %v395_v53 = vpop.f32.mrb[2].mxu0 }
 0x144   :  { %v5251_v54 = vpop.f32.mrb[3].mxu0 }
 0x14c   :  { %v6149_v24 = vpop.eup %6148 }
 0x14d   :  { %v300_v25 = vadd.f32 1.0, %v6149_v24  ;;  %v119_v24 = vld [vmem:[#allocation10 + $0x10] sm:$0xff] }
 0x14f   :  { %6150 = vrcp.f32 %v300_v25  ;;  %v120_v25 = vld [vmem:[#allocation10 + $0x18] sm:$0xff] }
 0x159   :  { %v6151_v26 = vpop.eup %6150 }
 0x15a   :  { %v303_v27 = vmul.f32 2.0, %v6151_v26 }
 0x15c   :  { %v4870_v28 = vadd.f32 -1.0, %v303_v27  ;;  %v6798_v27 = vpack.c.bf16 %v120_v25, %v119_v24 }
 0x15e   :  { %311 = vrot.lane.b32.xlu0 %v4870_v28, %s6506_s18 }
 0x162   :  { %306 = vrot.lane.b32.xlu0 %v145_v29, %s6506_s18 }
 0x1d0   :  { %v312_v30 = vpop.permute.xlu0 %311 }
 0x1d1   :  { %v314_v31 = vmul.f32 %v6151_v26, %v312_v30 }
 0x1d3   :  { %316 = vrot.lane.b32.xlu1 %v314_v31, %s6506_s18 }
 0x1d4   :  { %v307_v32 = vpop.permute.xlu0 %306 }
 0x1d5   :  { %v309_v33 = vmul.f32 %v6151_v26, %v307_v32  ;;  %v6820_v32 = vld [vmem:[%s7417_s5] sm:$0x3] }
 0x245   :  { %v317_v34 = vpop.permute.xlu1 %316 }
 0x246   :  { %v6720_v35 = vadd.f32 %v317_v34, %v309_v33 }
 0x248   :  { %6152 = vtanh.f32 %v6720_v35 }
 0x252   :  { %v6153_v49 = vpop.eup %6152 }
 0x253   :  { %322 = vrot.lane.b32.xlu1 %v6153_v49, %s6506_s18  ;;  %v114_v49 = vld [vmem:[#allocation7] sm:$0xff] }
 0x2c5   :  { %v323_v50 = vpop.permute.xlu1 %322 }
 0x2c6   :  { %v325_v51 = vmul.f32 %v6151_v26, %v323_v50  ;;  %v6794_v26 = vpack.c.bf16 %v113_v22, %v112_v21  ;;  %v115_v50 = vld [vmem:[#allocation7 + $0x8] sm:$0xff] }
 0x2c8   :  { %400 = vrot.lane.b32.xlu0 %v325_v51, %s6517_s6  ;;  %5832 = vmatpush3.bf16.msra.mxu0 %v6794_v26  ;;  %v6825_v51 = vpack.c.bf16 %v115_v50, %v114_v49 }
 0x2c9   :  { %5839 = vmatprep.subr.bf16.mxu0 %v6514_v0 }
 0x2cc   :  { %484 = vrot.lane.b32.xlu0 %v147_v52, %s6506_s18  ;;  %v742_v52 = vld [vmem:[#allocation2 + $0x2] sm:$0x3] }
 0x33a   :  { %v6760_v55 = vpop.permute.xlu0 %400 }
 0x33b   :  { %5261 = vmatmul.mubr.msk.f32.vlgmr.msra.gmra.mrb[2].mxu1 %vm149_vm1, %v6760_v55 }
 0x33c   :  { %5282 = vmatprep.mubr.msk.f32.mxu1 %vm6515_vm0, %v6516_v1  ;;  %5835 = vmatpush3.bf16.msra.mxu1 %v6791_v23 }
 0x33d   :  { %5836 = vmatprep.subr.bf16.mxu1 %v6514_v0 }
 0x33e   :  { %v485_v8 = vpop.permute.xlu0 %484 }
 0x340   :  { %5838 = vmatpush3.bf16.msra.mxu1 %v6798_v27 }
 0x341   :  { %5848 = vmatprep.subr.bf16.mxu1 %v6514_v0 }
 0x40e   :  { %v470_v57 = vpop.f32.mrb[2].mxu1 }
 0x40f   :  { %v471_v58 = vadd.f32 %v470_v57, %v395_v53  ;;  %v5262_v59 = vpop.f32.mrb[3].mxu1 }
 0x411   :  { %v474_v60 = vadd.f32 %v6769_v56, %v471_v58 }
 0x413   :  { %v4873_v61 = vmul.f32 -1.442695, %v474_v60 }
 0x415   :  { %6154 = vpow2.f32 %v4873_v61 }
 0x41f   :  { %v6155_v62 = vpop.eup %6154 }
 0x420   :  { %v478_v63 = vadd.f32 1.0, %v6155_v62 }
 0x422   :  { %6156 = vrcp.f32 %v478_v63 }
 0x42c   :  { %v6157_v2 = vpop.eup %6156 }
 0x42d   :  { %v481_v3 = vmul.f32 2.0, %v6157_v2  ;;  %v487_v10 = vmul.f32 %v6157_v2, %v485_v8 }
 0x42f   :  { %v4874_v4 = vadd.f32 -1.0, %v481_v3 }
 0x431   :  { %489 = vrot.lane.b32.xlu1 %v4874_v4, %s6506_s18 }
 0x4a3   :  { %v490_v6 = vpop.permute.xlu1 %489 }
 0x4a4   :  { %v492_v7 = vmul.f32 %v6157_v2, %v490_v6 }
 0x4a6   :  { %494 = vrot.lane.b32.xlu1 %v492_v7, %s6506_s18 }
 0x518   :  { %v495_v11 = vpop.permute.xlu1 %494 }
 0x519   :  { %v6774_v14 = vadd.f32 %v495_v11, %v487_v10 }
 0x51b   :  { %6158 = vtanh.f32 %v6774_v14 }
 0x525   :  { %v6159_v28 = vpop.eup %6158 }
 0x526   :  { %500 = vrot.lane.b32.xlu0 %v6159_v28, %s6506_s18 }
 0x598   :  { %v501_v29 = vpop.permute.xlu0 %500 }
 0x599   :  { %v503_v30 = vmul.f32 %v6157_v2, %v501_v29 }
 0x59b   :  { %505 = vrot.lane.b32.xlu1 %v503_v30, %s6517_s6 }
 0x60d   :  { %v506_v31 = vpop.permute.xlu1 %505 }
 0x60e   :  { %5272 = vmatmul.mubr.msk.f32.vlgmr.msra.gmra.mrb[4].mxu0 %vm149_vm1, %v506_v31  ;;  %5283 = vmatmul.mubr.msk.f32.vlgmr.msra.gmra.mrb[4].mxu1 %vm149_vm1, %v506_v31 }
 0x60f   :  { %5289 = vmatprep.mubr.msk.f32.mxu0 %vm6515_vm0, %v6516_v1  ;;  %5850 = vmatpush3.bf16.msra.mxu1 %v6682_v9 }
 0x610   :  { %5851 = vmatprep.subr.bf16.mxu1 %v6514_v0  ;;  %5311 = vmatprep.mubr.msk.f32.mxu1 %vm6515_vm0, %v6516_v1 }
 0x611   :  { %5841 = vmatpush3.bf16.msra.mxu0 %v6825_v51 }
 0x612   :  { %5842 = vmatprep.subr.bf16.mxu0 %v6514_v0 }
 0x613   :  { %5853 = vmatpush3.bf16.msra.mxu1 %v6695_v13 }
 0x614   :  { %5860 = vmatprep.subr.bf16.mxu1 %v6514_v0 }
 0x616   :  { %5312 = vmatmul.mubr.msk.f32.vlgmr.msra.gmra.mrb[6].mxu1 %vm149_vm1, %v742_v52 }
 0x617   :  { %5862 = vmatpush3.bf16.msra.mxu1 %v6731_v43  ;;  %5333 = vmatprep.mubr.msk.f32.mxu1 %vm6515_vm0, %v6516_v1 }
 0x618   :  { %5863 = vmatprep.subr.bf16.mxu1 %v6514_v0 }
 0x61b   :  { %5865 = vmatpush3.bf16.msra.mxu1 %v6744_v47 }
 0x61c   :  { %5872 = vmatprep.subr.bf16.mxu1 %v6514_v0 }
 0x6e1   :  { %v575_v33 = vpop.f32.mrb[4].mxu0  ;;  %v660_v34 = vpop.f32.mrb[4].mxu1 }
 0x6e2   :  { %v576_v36 = vadd.f32 %v575_v33, %v6820_v32  ;;  %v5273_v37 = vpop.f32.mrb[5].mxu0  ;;  %v5284_v38 = vpop.f32.mrb[5].mxu1 }
 0x6e4   :  { %v580_v40 = vsel %vm579_vm2, %v576_v36, -inf }
 0x6e5   :  { %581 = vmax.xlane.f32.xlu0 %v580_v40 }
 0x772   :  { %v582_v41 = vpop.xlane.xlu0 %581 }
 0x773   :  { %v583_v42 = vsub.f32 %v576_v36, %v582_v41 }
 0x775   :  { %v584_v44 = vmul.f32 1.442695, %v583_v42 }
 0x777   :  { %6160 = vpow2.f32 %v584_v44 }
 0x781   :  { %v6161_v45 = vpop.eup %6160 }
 0x782   :  { %v586_v48 = vsel %vm579_vm2, %v6161_v45, 0.0 }
 0x783   :  { %587 = vadd.xlane.f32.xlu1 %v586_v48 }
 0x810   :  { %v588_v53 = vpop.xlane.xlu1 %587 }
 0x811   :  { %6162 = vrcp.f32 %v588_v53 }
 0x81b   :  { %v6163_v54 = vpop.eup %6162 }
 0x81c   :  { %v590_v57 = vmul.f32 %v6163_v54, %v588_v53 }
 0x81e   :  { %v591_v58 = vsub.f32 2.0, %v590_v57 }
 0x820   :  { %v592_v59 = vmul.f32 %v6163_v54, %v591_v58 }
 0x822   :  { %v593_v60 = vmul.f32 %v6161_v45, %v592_v59 }
 0x824   :  { %5290 = vmatmul.mubr.msk.f32.vlgmr.msra.gmra.mrb[6].mxu0 %vm664_vm3, %v593_v60 }
 0x825   :  { %5844 = vmatpush3.bf16.msra.mxu0 %v6677_v5  ;;  %5300 = vmatprep.mubr.msk.f32.mxu0 %vm6515_vm0, %v6516_v1 }
 0x826   :  { %5845 = vmatprep.subr.bf16.mxu0 %v6514_v0 }
 0x829   :  { %5847 = vmatpush3.bf16.msra.mxu0 %v6691_v12 }
 0x82a   :  { %5854 = vmatprep.subr.bf16.mxu0 %v6514_v0 }
 0x82c   :  { %5301 = vmatmul.mubr.msk.f32.vlgmr.msra.gmra.mrb[8].mxu0 %vm149_vm1, %v6760_v55  ;;  %v882_v55 = vpop.f32.mrb[6].mxu1 }
 0x82d   :  { %5856 = vmatpush3.bf16.msra.mxu0 %v6726_v39  ;;  %5322 = vmatprep.mubr.msk.f32.mxu0 %vm6515_vm0, %v6516_v1  ;;  %v5313_v61 = vpop.f32.mrb[7].mxu1 }
 0x82e   :  { %5857 = vmatprep.subr.bf16.mxu0 %v6514_v0 }
 0x831   :  { %5859 = vmatpush3.bf16.msra.mxu0 %v6740_v46 }
 0x832   :  { %5866 = vmatprep.subr.bf16.mxu0 %v6514_v0 }
 0x834   :  { %5323 = vmatmul.mubr.msk.f32.vlgmr.msra.gmra.mrb[10].mxu0 %vm149_vm1, %v506_v31 }
 0x835   :  { %5868 = vmatpush3.bf16.msra.mxu0 %v6783_v19  ;;  %5344 = vmatprep.mubr.msk.f32.mxu0 %vm6515_vm0, %v6516_v1 }
 0x836   :  { %5869 = vmatprep.subr.bf16.mxu0 %v6514_v0 }
 0x839   :  { %5871 = vmatpush3.bf16.msra.mxu0 %v6794_v26 }
 0x83a   :  { %5881 = vmatprep.subr.bf16.mxu0 %v6514_v0 }
 0x8f7   :  { %v734_v62 = vpop.f32.mrb[6].mxu0 }
 0x8f8   :  { %v735_v63 = vadd.f32 %v734_v62, %v660_v34  ;;  %v5291_v2 = vpop.f32.mrb[7].mxu0 }
 0x8fa   :  { %6164 = vtanh.f32 %v735_v63 }
 0x8ff   :  { %v809_v3 = vpop.f32.mrb[8].mxu0 }
 0x900   :  { %v883_v4 = vadd.f32 %v882_v55, %v809_v3  ;;  %v5302_v6 = vpop.f32.mrb[9].mxu0 }
 0x902   :  { %v886_v7 = vadd.f32 %v883_v4, %v6714_v17 }
 0x904   :  { %v6165_v8 = vpop.eup %6164  ;;  %v4880_v10 = vmul.f32 -1.442695, %v886_v7 }
 0x905   :  { %740 = vst.msk [vmem:[#allocation11] sm:$0x3] %vm739_vm4, %v6165_v8 }
 0x906   :  { %6166 = vpow2.f32 %v4880_v10 }
 0x907   :  { %v978_v11 = vpop.f32.mrb[10].mxu0 }
 0x908   :  { %v5324_v15 = vpop.f32.mrb[11].mxu0 }
 0x910   :  { %v6167_v16 = vpop.eup %6166 }
 0x911   :  { %v890_v18 = vadd.f32 1.0, %v6167_v16 }
 0x913   :  { %6168 = vrcp.f32 %v890_v18 }
 0x91d   :  { %v6169_v20 = vpop.eup %6168 }
 0x91e   :  { %v893_v21 = vmul.f32 2.0, %v6169_v20  ;;  %v895_v28 = vmul.f32 %v6169_v20, %v6720_v35 }
 0x920   :  { %v4881_v22 = vadd.f32 -1.0, %v893_v21 }
 0x922   :  { %897 = vrot.lane.b32.xlu0 %v4881_v22, %s6506_s18 }
 0x994   :  { %v898_v24 = vpop.permute.xlu0 %897 }
 0x995   :  { %v900_v25 = vmul.f32 %v6169_v20, %v898_v24 }
 0x997   :  { %902 = vrot.lane.b32.xlu1 %v900_v25, %s6506_s18 }
 0xa09   :  { %v903_v29 = vpop.permute.xlu1 %902 }
 0xa0a   :  { %v6863_v30 = vadd.f32 %v903_v29, %v895_v28 }
 0xa0c   :  { %6170 = vtanh.f32 %v6863_v30 }
 0xa16   :  { %v6171_v31 = vpop.eup %6170 }
 0xa17   :  { %908 = vrot.lane.b32.xlu0 %v6171_v31, %s6506_s18 }
 0xa89   :  { %v909_v33 = vpop.permute.xlu0 %908 }
 0xa8a   :  { %v911_v34 = vmul.f32 %v6169_v20, %v909_v33 }
 0xa8c   :  { %983 = vrot.lane.b32.xlu1 %v911_v34, %s6517_s6 }
 0xafe   :  { %v984_v36 = vpop.permute.xlu1 %983 }
 0xaff   :  { %5334 = vmatmul.mubr.msk.f32.vlgmr.msra.gmra.mrb[8].mxu1 %vm149_vm1, %v984_v36 }
 0xb00   :  { %5874 = vmatpush3.bf16.msra.mxu1 %v6791_v23  ;;  %5355 = vmatprep.mubr.msk.f32.mxu1 %vm6515_vm0, %v6516_v1 }
 0xb01   :  { %5875 = vmatprep.subr.bf16.mxu1 %v6514_v0 }
 0xb04   :  { %5877 = vmatpush3.bf16.msra.mxu1 %v6798_v27 }
 0xb05   :  { %5878 = vmatprep.subr.bf16.mxu1 %v6514_v0 }
 0xbd2   :  { %v1053_v35 = vpop.f32.mrb[8].mxu1 }
 0xbd3   :  { %v1054_v37 = vadd.f32 %v1053_v35, %v978_v11  ;;  %v5335_v38 = vpop.f32.mrb[9].mxu1 }
 0xbd5   :  { %v1057_v40 = vadd.f32 %v6769_v56, %v1054_v37 }
 0xbd7   :  { %v4884_v41 = vmul.f32 -1.442695, %v1057_v40 }
 0xbd9   :  { %6172 = vpow2.f32 %v4884_v41 }
 0xbe3   :  { %v6173_v42 = vpop.eup %6172 }
 0xbe4   :  { %v1061_v44 = vadd.f32 1.0, %v6173_v42 }
 0xbe6   :  { %6174 = vrcp.f32 %v1061_v44 }
 0xbf0   :  { %v6175_v45 = vpop.eup %6174 }
 0xbf1   :  { %v1064_v48 = vmul.f32 2.0, %v6175_v45  ;;  %v1066_v53 = vmul.f32 %v6175_v45, %v6774_v14  ;;  %v1319_v14 = vld [vmem:[#allocation2 + $0x4] sm:$0x3] }
 0xbf3   :  { %v4885_v49 = vadd.f32 -1.0, %v1064_v48 }
 0xbf5   :  { %1068 = vrot.lane.b32.xlu0 %v4885_v49, %s6506_s18 }
 0xc67   :  { %v1069_v50 = vpop.permute.xlu0 %1068 }
 0xc68   :  { %v1071_v52 = vmul.f32 %v6175_v45, %v1069_v50 }
 0xc6a   :  { %1073 = vrot.lane.b32.xlu1 %v1071_v52, %s6506_s18 }
 0xcdc   :  { %v1074_v54 = vpop.permute.xlu1 %1073 }
 0xcdd   :  { %v6879_v57 = vadd.f32 %v1074_v54, %v1066_v53 }
 0xcdf   :  { %6176 = vtanh.f32 %v6879_v57 }
 0xce9   :  { %v6177_v58 = vpop.eup %6176 }
 0xcea   :  { %1079 = vrot.lane.b32.xlu0 %v6177_v58, %s6506_s18 }
 0xd5c   :  { %v1080_v59 = vpop.permute.xlu0 %1079 }
 0xd5d   :  { %v1082_v60 = vmul.f32 %v6175_v45, %v1080_v59 }
 0xd5f   :  { %1084 = vrot.lane.b32.xlu1 %v1082_v60, %s6517_s6 }
 0xdd1   :  { %v6884_v55 = vpop.permute.xlu1 %1084 }
 0xdd2   :  { %5345 = vmatmul.mubr.msk.f32.vlgmr.msra.gmra.mrb[12].mxu0 %vm149_vm1, %v6884_v55  ;;  %5356 = vmatmul.mubr.msk.f32.vlgmr.msra.gmra.mrb[10].mxu1 %vm149_vm1, %v6884_v55 }
 0xdd3   :  { %5883 = vmatpush3.bf16.msra.mxu0 %v6677_v5  ;;  %5373 = vmatprep.mubr.msk.f32.mxu0 %vm6515_vm0, %v6516_v1 }
 0xdd4   :  { %5884 = vmatprep.subr.bf16.mxu0 %v6514_v0  ;;  %5880 = vmatpush3.bf16.msra.mxu1 %v6825_v51 }
 0xdd5   :  { %5362 = vmatprep.mubr.msk.f32.mxu1 %vm6515_vm0, %v6516_v1  ;;  %5893 = vmatprep.subr.bf16.mxu1 %v6514_v0 }
 0xdd7   :  { %5886 = vmatpush3.bf16.msra.mxu0 %v6691_v12 }
 0xdd8   :  { %5887 = vmatprep.subr.bf16.mxu0 %v6514_v0 }
 0xdda   :  { %5374 = vmatmul.mubr.msk.f32.vlgmr.msra.gmra.mrb[14].mxu0 %vm149_vm1, %v984_v36 }
 0xddb   :  { %5889 = vmatpush3.bf16.msra.mxu0 %v6682_v9  ;;  %5384 = vmatprep.mubr.msk.f32.mxu0 %vm6515_vm0, %v6516_v1 }
 0xddc   :  { %5890 = vmatprep.subr.bf16.mxu0 %v6514_v0 }
 0xddf   :  { %5892 = vmatpush3.bf16.msra.mxu0 %v6695_v13 }
 0xde0   :  { %5899 = vmatprep.subr.bf16.mxu0 %v6514_v0 }
 0xde2   :  { %5385 = vmatmul.mubr.msk.f32.vlgmr.msra.gmra.mrb[16].mxu0 %vm149_vm1, %v1319_v14 }
 0xde3   :  { %5901 = vmatpush3.bf16.msra.mxu0 %v6731_v43  ;;  %5406 = vmatprep.mubr.msk.f32.mxu0 %vm6515_vm0, %v6516_v1 }
 0xde4   :  { %5902 = vmatprep.subr.bf16.mxu0 %v6514_v0 }
 0xde7   :  { %5904 = vmatpush3.bf16.msra.mxu0 %v6744_v47 }
 0xde8   :  { %5911 = vmatprep.subr.bf16.mxu0 %v6514_v0 }
 0xea5   :  { %v1154_v61 = vpop.f32.mrb[12].mxu0 }
 0xea6   :  { %v5346_v62 = vpop.f32.mrb[13].mxu0  ;;  %v1155_v20 = vadd.f32 %v1154_v61, %v6820_v32 }
 0xea8   :  { %v1158_v21 = vsel %vm579_vm2, %v1155_v20, -inf }
 0xead   :  { %v1386_v63 = vpop.f32.mrb[14].mxu0 }
 0xeae   :  { %v5375_v2 = vpop.f32.mrb[15].mxu0 }
 0xeb5   :  { %v1459_v3 = vpop.f32.mrb[16].mxu0 }
 0xeb6   :  { %v1460_v4 = vadd.f32 %v1459_v3, %v1386_v63  ;;  %v5386_v6 = vpop.f32.mrb[17].mxu0 }
 0xeb8   :  { %v1463_v7 = vadd.f32 %v1460_v4, %v6714_v17 }
 0xeba   :  { %v4891_v8 = vmul.f32 -1.442695, %v1463_v7 }
 0xebc   :  { %6178 = vpow2.f32 %v4891_v8 }
 0xec6   :  { %v6179_v10 = vpop.eup %6178 }
 0xec7   :  { %v1467_v11 = vadd.f32 1.0, %v6179_v10 }
 0xec9   :  { %6180 = vrcp.f32 %v1467_v11 }
 0xed3   :  { %v6181_v15 = vpop.eup %6180 }
 0xed4   :  { %v1470_v16 = vmul.f32 2.0, %v6181_v15  ;;  %v1472_v25 = vmul.f32 %v6181_v15, %v6863_v30 }
 0xed6   :  { %v4892_v18 = vadd.f32 -1.0, %v1470_v16 }
 0xed8   :  { %1474 = vrot.lane.b32.xlu0 %v4892_v18, %s6506_s18 }
 0xef7   :  { %1159 = vmax.xlane.f32.xlu0 %v1158_v21 }
 0xf4a   :  { %v1475_v22 = vpop.permute.xlu0 %1474 }
 0xf4b   :  { %v1477_v24 = vmul.f32 %v6181_v15, %v1475_v22 }
 0xf4d   :  { %1479 = vrot.lane.b32.xlu1 %v1477_v24, %s6506_s18 }
 0xf84   :  { %v1160_v33 = vpop.xlane.xlu0 %1159 }
 0xf85   :  { %v1161_v34 = vsub.f32 %v1155_v20, %v1160_v33 }
 0xf87   :  { %v1162_v36 = vmul.f32 1.442695, %v1161_v34 }
 0xfbf   :  { %v1480_v28 = vpop.permute.xlu1 %1479 }
 0xfc0   :  { %v6920_v29 = vadd.f32 %v1480_v28, %v1472_v25 }
 0xfc2   :  { %6182 = vtanh.f32 %v6920_v29 }
 0xfc3   :  { %6184 = vpow2.f32 %v1162_v36 }
 0xfcc   :  { %v6183_v31 = vpop.eup %6182 }
 0xfcd   :  { %1485 = vrot.lane.b32.xlu1 %v6183_v31, %s6506_s18  ;;  %v6185_v35 = vpop.eup %6184 }
 0xfce   :  { %v1164_v37 = vsel %vm579_vm2, %v6185_v35, 0.0 }
 0xff1   :  { %1165 = vadd.xlane.f32.xlu1 %v1164_v37 }
0x103f   :  { %v1486_v38 = vpop.permute.xlu1 %1485 }
0x1040   :  { %v1488_v40 = vmul.f32 %v6181_v15, %v1486_v38 }
0x1042   :  { %1560 = vrot.lane.b32.xlu0 %v1488_v40, %s6517_s6 }
0x107e   :  { %v1166_v30 = vpop.xlane.xlu1 %1165 }
0x107f   :  { %6186 = vrcp.f32 %v1166_v30 }
0x1089   :  { %v6187_v41 = vpop.eup %6186 }
0x108a   :  { %v1168_v42 = vmul.f32 %v6187_v41, %v1166_v30 }
0x108c   :  { %v1169_v44 = vsub.f32 2.0, %v1168_v42 }
0x108e   :  { %v1170_v45 = vmul.f32 %v6187_v41, %v1169_v44 }
0x1090   :  { %v1171_v48 = vmul.f32 %v6185_v35, %v1170_v45 }
0x1092   :  { %5363 = vmatmul.mubr.msk.f32.vlgmr.msra.gmra.mrb[10].mxu1 %vm664_vm3, %v1171_v48 }
0x1093   :  { %5895 = vmatpush3.bf16.msra.mxu1 %v6726_v39  ;;  %5395 = vmatprep.mubr.msk.f32.mxu1 %vm6515_vm0, %v6516_v1 }
0x1094   :  { %5896 = vmatprep.subr.bf16.mxu1 %v6514_v0 }
0x1097   :  { %5898 = vmatpush3.bf16.msra.mxu1 %v6740_v46 }
0x1098   :  { %5905 = vmatprep.subr.bf16.mxu1 %v6514_v0 }
0x109a   :  { %5396 = vmatmul.mubr.msk.f32.vlgmr.msra.gmra.mrb[12].mxu1 %vm149_vm1, %v6884_v55 }
0x109b   :  { %5907 = vmatpush3.bf16.msra.mxu1 %v6783_v19  ;;  %5417 = vmatprep.mubr.msk.f32.mxu1 %vm6515_vm0, %v6516_v1 }
0x109c   :  { %5908 = vmatprep.subr.bf16.mxu1 %v6514_v0 }
0x109f   :  { %5910 = vmatpush3.bf16.msra.mxu1 %v6794_v26 }
0x10a0   :  { %5920 = vmatprep.subr.bf16.mxu1 %v6514_v0 }
0x10b4   :  { %v1561_v49 = vpop.permute.xlu0 %1560 }
0x10b5   :  { %5407 = vmatmul.mubr.msk.f32.vlgmr.msra.gmra.mrb[18].mxu0 %vm149_vm1, %v1561_v49 }
0x10b6   :  { %5913 = vmatpush3.bf16.msra.mxu0 %v6791_v23  ;;  %5428 = vmatprep.mubr.msk.f32.mxu0 %vm6515_vm0, %v6516_v1 }
0x10b7   :  { %5914 = vmatprep.subr.bf16.mxu0 %v6514_v0 }
0x10ba   :  { %5916 = vmatpush3.bf16.msra.mxu0 %v6798_v27 }
0x10bb   :  { %5917 = vmatprep.subr.bf16.mxu0 %v6514_v0 }
0x1165   :  { %v1311_v50 = vpop.f32.mrb[10].mxu1 }
0x1166   :  { %6188 = vtanh.f32 %v1311_v50  ;;  %v5364_v52 = vpop.f32.mrb[11].mxu1 }
0x116d   :  { %v1555_v53 = vpop.f32.mrb[12].mxu1 }
0x116e   :  { %v5397_v54 = vpop.f32.mrb[13].mxu1 }
0x1170   :  { %v6189_v58 = vpop.eup %6188 }
0x1171   :  { %1317 = vst.msk [vmem:[#allocation11 + $0x2] sm:$0x3] %vm739_vm4, %v6189_v58 }
0x1188   :  { %v1630_v59 = vpop.f32.mrb[18].mxu0 }
0x1189   :  { %v1631_v60 = vadd.f32 %v1630_v59, %v1555_v53  ;;  %v5408_v55 = vpop.f32.mrb[19].mxu0 }
0x118b   :  { %v1634_v14 = vadd.f32 %v6769_v56, %v1631_v60 }
0x118d   :  { %v4895_v61 = vmul.f32 -1.442695, %v1634_v14 }
0x118f   :  { %6190 = vpow2.f32 %v4895_v61 }
0x1199   :  { %v6191_v62 = vpop.eup %6190 }
0x119a   :  { %v1638_v63 = vadd.f32 1.0, %v6191_v62 }
0x119c   :  { %6192 = vrcp.f32 %v1638_v63 }
0x11a6   :  { %v6193_v2 = vpop.eup %6192 }
0x11a7   :  { %v1641_v3 = vmul.f32 2.0, %v6193_v2  ;;  %v1643_v8 = vmul.f32 %v6193_v2, %v6879_v57  ;;  %v1896_v57 = vld [vmem:[#allocation2 + $0x6] sm:$0x3] }
0x11a9   :  { %v4896_v4 = vadd.f32 -1.0, %v1641_v3 }
0x11ab   :  { %1645 = vrot.lane.b32.xlu1 %v4896_v4, %s6506_s18 }
0x121d   :  { %v1646_v6 = vpop.permute.xlu1 %1645 }
0x121e   :  { %v1648_v7 = vmul.f32 %v6193_v2, %v1646_v6 }
0x1220   :  { %1650 = vrot.lane.b32.xlu0 %v1648_v7, %s6506_s18 }
0x1292   :  { %v1651_v10 = vpop.permute.xlu0 %1650 }
0x1293   :  { %v6953_v11 = vadd.f32 %v1651_v10, %v1643_v8 }
0x1295   :  { %6194 = vtanh.f32 %v6953_v11 }
0x129f   :  { %v6195_v15 = vpop.eup %6194 }
0x12a0   :  { %1656 = vrot.lane.b32.xlu0 %v6195_v15, %s6506_s18 }
0x1312   :  { %v1657_v16 = vpop.permute.xlu0 %1656 }
0x1313   :  { %v1659_v18 = vmul.f32 %v6193_v2, %v1657_v16 }
0x1315   :  { %1661 = vrot.lane.b32.xlu1 %v1659_v18, %s6517_s6 }
0x1387   :  { %v6958_v20 = vpop.permute.xlu1 %1661 }
0x1388   :  { %5418 = vmatmul.mubr.msk.f32.vlgmr.msra.gmra.mrb[14].mxu1 %vm149_vm1, %v6958_v20  ;;  %5429 = vmatmul.mubr.msk.f32.vlgmr.msra.gmra.mrb[20].mxu0 %vm149_vm1, %v6958_v20 }
0x1389   :  { %5922 = vmatpush3.bf16.msra.mxu1 %v6677_v5  ;;  %5446 = vmatprep.mubr.msk.f32.mxu1 %vm6515_vm0, %v6516_v1 }
0x138a   :  { %5923 = vmatprep.subr.bf16.mxu1 %v6514_v0  ;;  %5919 = vmatpush3.bf16.msra.mxu0 %v6825_v51 }
0x138b   :  { %5435 = vmatprep.mubr.msk.f32.mxu0 %vm6515_vm0, %v6516_v1  ;;  %5932 = vmatprep.subr.bf16.mxu0 %v6514_v0 }
0x138d   :  { %5925 = vmatpush3.bf16.msra.mxu1 %v6691_v12 }
0x138e   :  { %5926 = vmatprep.subr.bf16.mxu1 %v6514_v0 }
0x1390   :  { %5447 = vmatmul.mubr.msk.f32.vlgmr.msra.gmra.mrb[16].mxu1 %vm149_vm1, %v1561_v49 }
0x1391   :  { %5928 = vmatpush3.bf16.msra.mxu1 %v6682_v9  ;;  %5457 = vmatprep.mubr.msk.f32.mxu1 %vm6515_vm0, %v6516_v1 }
0x1392   :  { %5929 = vmatprep.subr.bf16.mxu1 %v6514_v0 }
0x1395   :  { %5931 = vmatpush3.bf16.msra.mxu1 %v6695_v13 }
0x1396   :  { %5938 = vmatprep.subr.bf16.mxu1 %v6514_v0 }
0x1398   :  { %5458 = vmatmul.mubr.msk.f32.vlgmr.msra.gmra.mrb[18].mxu1 %vm149_vm1, %v1896_v57 }
0x1399   :  { %5940 = vmatpush3.bf16.msra.mxu1 %v6731_v43  ;;  %5479 = vmatprep.mubr.msk.f32.mxu1 %vm6515_vm0, %v6516_v1 }
0x139a   :  { %5941 = vmatprep.subr.bf16.mxu1 %v6514_v0 }
0x139d   :  { %5943 = vmatpush3.bf16.msra.mxu1 %v6744_v47 }
0x139e   :  { %5950 = vmatprep.subr.bf16.mxu1 %v6514_v0 }
0x145b   :  { %v1731_v21 = vpop.f32.mrb[14].mxu1 }
0x145c   :  { %v5419_v22 = vpop.f32.mrb[15].mxu1  ;;  %v1732_v41 = vadd.f32 %v1731_v21, %v6820_v32 }
0x145e   :  { %v1735_v42 = vsel %vm579_vm2, %v1732_v41, -inf }
0x1463   :  { %v1963_v24 = vpop.f32.mrb[16].mxu1 }
0x1464   :  { %v5448_v25 = vpop.f32.mrb[17].mxu1 }
0x146b   :  { %v2036_v28 = vpop.f32.mrb[18].mxu1 }
0x146c   :  { %v2037_v31 = vadd.f32 %v2036_v28, %v1963_v24  ;;  %v5459_v33 = vpop.f32.mrb[19].mxu1 }
0x146e   :  { %v2040_v34 = vadd.f32 %v2037_v31, %v6714_v17 }
0x1470   :  { %v4902_v36 = vmul.f32 -1.442695, %v2040_v34 }
0x1472   :  { %6196 = vpow2.f32 %v4902_v36 }
0x147c   :  { %v6197_v35 = vpop.eup %6196 }
0x147d   :  { %v2044_v37 = vadd.f32 1.0, %v6197_v35 }
0x147f   :  { %6198 = vrcp.f32 %v2044_v37 }
0x1489   :  { %v6199_v38 = vpop.eup %6198 }
0x148a   :  { %v2047_v40 = vmul.f32 2.0, %v6199_v38  ;;  %v2049_v17 = vmul.f32 %v6199_v38, %v6920_v29 }
0x148c   :  { %v4903_v30 = vadd.f32 -1.0, %v2047_v40 }
0x148e   :  { %2051 = vrot.lane.b32.xlu0 %v4903_v30, %s6506_s18 }
0x14ad   :  { %1736 = vmax.xlane.f32.xlu0 %v1735_v42 }
0x1500   :  { %v2052_v44 = vpop.permute.xlu0 %2051 }
0x1501   :  { %v2054_v45 = vmul.f32 %v6199_v38, %v2052_v44 }
0x1503   :  { %2056 = vrot.lane.b32.xlu1 %v2054_v45, %s6506_s18 }
0x153a   :  { %v1737_v52 = vpop.xlane.xlu0 %1736 }
0x153b   :  { %v1738_v53 = vsub.f32 %v1732_v41, %v1737_v52 }
0x153d   :  { %v1739_v54 = vmul.f32 1.442695, %v1738_v53 }
0x1575   :  { %v2057_v48 = vpop.permute.xlu1 %2056 }
0x1576   :  { %v6994_v49 = vadd.f32 %v2057_v48, %v2049_v17 }
0x1578   :  { %6200 = vtanh.f32 %v6994_v49 }
0x1579   :  { %6202 = vpow2.f32 %v1739_v54 }
0x1582   :  { %v6201_v50 = vpop.eup %6200 }
0x1583   :  { %2062 = vrot.lane.b32.xlu1 %v6201_v50, %s6506_s18  ;;  %v6203_v58 = vpop.eup %6202  ;;  %v7065_v50 = vld [vmem:[%s7420_s8] sm:$0x3] }
0x1584   :  { %v1741_v59 = vsel %vm579_vm2, %v6203_v58, 0.0 }
0x15a7   :  { %1742 = vadd.xlane.f32.xlu1 %v1741_v59 }
0x15f5   :  { %v2063_v60 = vpop.permute.xlu1 %2062 }
0x15f6   :  { %v2065_v55 = vmul.f32 %v6199_v38, %v2063_v60 }
0x15f8   :  { %2137 = vrot.lane.b32.xlu0 %v2065_v55, %s6517_s6 }
0x1634   :  { %v1743_v29 = vpop.xlane.xlu1 %1742 }
0x1635   :  { %6204 = vrcp.f32 %v1743_v29 }
0x163f   :  { %v6205_v14 = vpop.eup %6204 }
0x1640   :  { %v1745_v61 = vmul.f32 %v6205_v14, %v1743_v29 }
0x1642   :  { %v1746_v62 = vsub.f32 2.0, %v1745_v61 }
0x1644   :  { %v1747_v63 = vmul.f32 %v6205_v14, %v1746_v62 }
0x1646   :  { %v1748_v2 = vmul.f32 %v6203_v58, %v1747_v63 }
0x1648   :  { %5436 = vmatmul.mubr.msk.f32.vlgmr.msra.gmra.mrb[20].mxu0 %vm664_vm3, %v1748_v2 }
0x1649   :  { %5934 = vmatpush3.bf16.msra.mxu0 %v6726_v39  ;;  %5468 = vmatprep.mubr.msk.f32.mxu0 %vm6515_vm0, %v6516_v1 }
0x164a   :  { %5935 = vmatprep.subr.bf16.mxu0 %v6514_v0 }
0x164d   :  { %5937 = vmatpush3.bf16.msra.mxu0 %v6740_v46 }
0x164e   :  { %5944 = vmatprep.subr.bf16.mxu0 %v6514_v0 }
0x1650   :  { %5469 = vmatmul.mubr.msk.f32.vlgmr.msra.gmra.mrb[22].mxu0 %vm149_vm1, %v6958_v20 }
0x1651   :  { %5946 = vmatpush3.bf16.msra.mxu0 %v6783_v19  ;;  %5490 = vmatprep.mubr.msk.f32.mxu0 %vm6515_vm0, %v6516_v1 }
0x1652   :  { %5947 = vmatprep.subr.bf16.mxu0 %v6514_v0 }
0x1655   :  { %5949 = vmatpush3.bf16.msra.mxu0 %v6794_v26 }
0x1656   :  { %5959 = vmatprep.subr.bf16.mxu0 %v6514_v0 }
0x166a   :  { %v2138_v3 = vpop.permute.xlu0 %2137 }
0x166b   :  { %5480 = vmatmul.mubr.msk.f32.vlgmr.msra.gmra.mrb[20].mxu1 %vm149_vm1, %v2138_v3 }
0x166c   :  { %5952 = vmatpush3.bf16.msra.mxu1 %v6791_v23  ;;  %5501 = vmatprep.mubr.msk.f32.mxu1 %vm6515_vm0, %v6516_v1 }
0x166d   :  { %5953 = vmatprep.subr.bf16.mxu1 %v6514_v0 }
0x1670   :  { %5955 = vmatpush3.bf16.msra.mxu1 %v6798_v27 }
0x1671   :  { %5956 = vmatprep.subr.bf16.mxu1 %v6514_v0 }
0x171b   :  { %v1888_v4 = vpop.f32.mrb[20].mxu0 }
0x171c   :  { %6206 = vtanh.f32 %v1888_v4  ;;  %v5437_v6 = vpop.f32.mrb[21].mxu0 }
0x1723   :  { %v2132_v7 = vpop.f32.mrb[22].mxu0 }
0x1724   :  { %v5470_v8 = vpop.f32.mrb[23].mxu0 }
0x1726   :  { %v6207_v10 = vpop.eup %6206 }
0x1727   :  { %1894 = vst.msk [vmem:[#allocation11 + $0x4] sm:$0x3] %vm739_vm4, %v6207_v10 }
0x173e   :  { %v2207_v15 = vpop.f32.mrb[20].mxu1 }
0x173f   :  { %v2208_v16 = vadd.f32 %v2207_v15, %v2132_v7  ;;  %v5481_v18 = vpop.f32.mrb[21].mxu1 }
0x1741   :  { %v2211_v20 = vadd.f32 %v6769_v56, %v2208_v16 }
0x1743   :  { %v4906_v57 = vmul.f32 -1.442695, %v2211_v20 }
0x1745   :  { %6208 = vpow2.f32 %v4906_v57 }
0x174f   :  { %v6209_v21 = vpop.eup %6208 }
0x1750   :  { %v2215_v22 = vadd.f32 1.0, %v6209_v21 }
0x1752   :  { %6210 = vrcp.f32 %v2215_v22 }
0x175c   :  { %v6211_v24 = vpop.eup %6210 }
0x175d   :  { %v2218_v25 = vmul.f32 2.0, %v6211_v24  ;;  %v2220_v34 = vmul.f32 %v6211_v24, %v6953_v11  ;;  %v2473_v11 = vld [vmem:[#allocation2 + $0x8] sm:$0x3] }
0x175f   :  { %v4907_v28 = vadd.f32 -1.0, %v2218_v25 }
0x1761   :  { %2222 = vrot.lane.b32.xlu1 %v4907_v28, %s6506_s18 }
0x17d3   :  { %v2223_v31 = vpop.permute.xlu1 %2222 }
0x17d4   :  { %v2225_v33 = vmul.f32 %v6211_v24, %v2223_v31 }
0x17d6   :  { %2227 = vrot.lane.b32.xlu0 %v2225_v33, %s6506_s18 }
0x1848   :  { %v2228_v36 = vpop.permute.xlu0 %2227 }
0x1849   :  { %v7027_v35 = vadd.f32 %v2228_v36, %v2220_v34 }
0x184b   :  { %6212 = vtanh.f32 %v7027_v35 }
0x1855   :  { %v6213_v56 = vpop.eup %6212 }
0x1856   :  { %2233 = vrot.lane.b32.xlu0 %v6213_v56, %s6506_s18 }
0x18c8   :  { %v2234_v37 = vpop.permute.xlu0 %2233 }
0x18c9   :  { %v2236_v38 = vmul.f32 %v6211_v24, %v2234_v37 }
0x18cb   :  { %2238 = vrot.lane.b32.xlu1 %v2236_v38, %s6517_s6  ;;  %v7105_v38 = vld [vmem:[%s7420_s8 + $0x2] sm:$0x3] }
0x193d   :  { %v7032_v40 = vpop.permute.xlu1 %2238 }
0x193e   :  { %5491 = vmatmul.mubr.msk.f32.vlgmr.msra.gmra.mrb[24].mxu0 %vm149_vm1, %v7032_v40  ;;  %5502 = vmatmul.mubr.msk.f32.vlgmr.msra.gmra.mrb[22].mxu1 %vm149_vm1, %v7032_v40 }
0x193f   :  { %5961 = vmatpush3.bf16.msra.mxu0 %v6677_v5  ;;  %5519 = vmatprep.mubr.msk.f32.mxu0 %vm6515_vm0, %v6516_v1 }
0x1940   :  { %5962 = vmatprep.subr.bf16.mxu0 %v6514_v0  ;;  %5958 = vmatpush3.bf16.msra.mxu1 %v6825_v51 }
0x1941   :  { %5508 = vmatprep.mubr.msk.f32.mxu1 %vm6515_vm0, %v6516_v1  ;;  %5971 = vmatprep.subr.bf16.mxu1 %v6514_v0 }
0x1943   :  { %5964 = vmatpush3.bf16.msra.mxu0 %v6691_v12 }
0x1944   :  { %5965 = vmatprep.subr.bf16.mxu0 %v6514_v0 }
0x1946   :  { %5520 = vmatmul.mubr.msk.f32.vlgmr.msra.gmra.mrb[26].mxu0 %vm149_vm1, %v2138_v3 }
0x1947   :  { %5967 = vmatpush3.bf16.msra.mxu0 %v6682_v9  ;;  %5530 = vmatprep.mubr.msk.f32.mxu0 %vm6515_vm0, %v6516_v1 }
0x1948   :  { %5968 = vmatprep.subr.bf16.mxu0 %v6514_v0 }
0x194b   :  { %5970 = vmatpush3.bf16.msra.mxu0 %v6695_v13 }
0x194c   :  { %5977 = vmatprep.subr.bf16.mxu0 %v6514_v0 }
0x194e   :  { %5531 = vmatmul.mubr.msk.f32.vlgmr.msra.gmra.mrb[28].mxu0 %vm149_vm1, %v2473_v11 }
0x194f   :  { %5979 = vmatpush3.bf16.msra.mxu0 %v6731_v43  ;;  %5552 = vmatprep.mubr.msk.f32.mxu0 %vm6515_vm0, %v6516_v1 }
0x1950   :  { %5980 = vmatprep.subr.bf16.mxu0 %v6514_v0 }
0x1953   :  { %5982 = vmatpush3.bf16.msra.mxu0 %v6744_v47 }
0x1954   :  { %5989 = vmatprep.subr.bf16.mxu0 %v6514_v0 }
0x1a11   :  { %v2308_v30 = vpop.f32.mrb[24].mxu0 }
0x1a12   :  { %v5492_v41 = vpop.f32.mrb[25].mxu0  ;;  %v2309_v29 = vadd.f32 %v2308_v30, %v6820_v32 }
0x1a14   :  { %v2312_v14 = vsel %vm579_vm2, %v2309_v29, -inf }
0x1a19   :  { %v2540_v42 = vpop.f32.mrb[26].mxu0 }
0x1a1a   :  { %v5521_v44 = vpop.f32.mrb[27].mxu0 }
0x1a21   :  { %v2613_v45 = vpop.f32.mrb[28].mxu0 }
0x1a22   :  { %v2614_v17 = vadd.f32 %v2613_v45, %v2540_v42  ;;  %v5532_v48 = vpop.f32.mrb[29].mxu0 }
0x1a24   :  { %v2617_v52 = vadd.f32 %v7065_v50, %v2614_v17 }
0x1a26   :  { %v4913_v53 = vmul.f32 -1.442695, %v2617_v52 }
0x1a28   :  { %6214 = vpow2.f32 %v4913_v53 }
0x1a32   :  { %v6215_v54 = vpop.eup %6214 }
0x1a33   :  { %v2621_v58 = vadd.f32 1.0, %v6215_v54 }
0x1a35   :  { %6216 = vrcp.f32 %v2621_v58 }
0x1a3f   :  { %v6217_v59 = vpop.eup %6216 }
0x1a40   :  { %v2624_v60 = vmul.f32 2.0, %v6217_v59  ;;  %v2626_v63 = vmul.f32 %v6217_v59, %v6994_v49 }
0x1a42   :  { %v4914_v55 = vadd.f32 -1.0, %v2624_v60 }
0x1a44   :  { %2628 = vrot.lane.b32.xlu0 %v4914_v55, %s6506_s18 }
0x1a63   :  { %2313 = vmax.xlane.f32.xlu0 %v2312_v14 }
0x1ab6   :  { %v2629_v61 = vpop.permute.xlu0 %2628 }
0x1ab7   :  { %v2631_v62 = vmul.f32 %v6217_v59, %v2629_v61 }
0x1ab9   :  { %2633 = vrot.lane.b32.xlu1 %v2631_v62, %s6506_s18 }
0x1af0   :  { %v2314_v6 = vpop.xlane.xlu0 %2313 }
0x1af1   :  { %v2315_v7 = vsub.f32 %v2309_v29, %v2314_v6 }
0x1af3   :  { %v2316_v32 = vmul.f32 1.442695, %v2315_v7 }
0x1b2b   :  { %v2634_v2 = vpop.permute.xlu1 %2633 }
0x1b2c   :  { %v7073_v3 = vadd.f32 %v2634_v2, %v2626_v63 }
0x1b2e   :  { %6218 = vtanh.f32 %v7073_v3 }
0x1b2f   :  { %6220 = vpow2.f32 %v2316_v32 }
0x1b38   :  { %v6219_v4 = vpop.eup %6218 }
0x1b39   :  { %2639 = vrot.lane.b32.xlu1 %v6219_v4, %s6506_s18  ;;  %v6221_v8 = vpop.eup %6220 }
0x1b3a   :  { %v2318_v10 = vsel %vm579_vm2, %v6221_v8, 0.0 }
0x1b5d   :  { %2319 = vadd.xlane.f32.xlu1 %v2318_v10 }
0x1bab   :  { %v2640_v15 = vpop.permute.xlu1 %2639 }
0x1bac   :  { %v2642_v16 = vmul.f32 %v6217_v59, %v2640_v15 }
0x1bae   :  { %2714 = vrot.lane.b32.xlu0 %v2642_v16, %s6517_s6 }
0x1bea   :  { %v2320_v49 = vpop.xlane.xlu1 %2319 }
0x1beb   :  { %6222 = vrcp.f32 %v2320_v49 }
0x1bf5   :  { %v6223_v18 = vpop.eup %6222 }
0x1bf6   :  { %v2322_v20 = vmul.f32 %v6223_v18, %v2320_v49  ;;  %v7151_v49 = vld [vmem:[%s7417_s5] sm:$0x3]  ;;  %s6518_s5 = smov 96  }
0x1bf8   :  { %v2323_v57 = vsub.f32 2.0, %v2322_v20 }
0x1bfa   :  { %v2324_v21 = vmul.f32 %v6223_v18, %v2323_v57 }
0x1bfc   :  { %v2325_v22 = vmul.f32 %v6221_v8, %v2324_v21 }
0x1bfe   :  { %5509 = vmatmul.mubr.msk.f32.vlgmr.msra.gmra.mrb[22].mxu1 %vm664_vm3, %v2325_v22 }
0x1bff   :  { %5973 = vmatpush3.bf16.msra.mxu1 %v6726_v39  ;;  %5541 = vmatprep.mubr.msk.f32.mxu1 %vm6515_vm0, %v6516_v1 }
0x1c00   :  { %5974 = vmatprep.subr.bf16.mxu1 %v6514_v0 }
0x1c03   :  { %5976 = vmatpush3.bf16.msra.mxu1 %v6740_v46 }
0x1c04   :  { %5983 = vmatprep.subr.bf16.mxu1 %v6514_v0 }
0x1c06   :  { %5542 = vmatmul.mubr.msk.f32.vlgmr.msra.gmra.mrb[24].mxu1 %vm149_vm1, %v7032_v40 }
0x1c07   :  { %5985 = vmatpush3.bf16.msra.mxu1 %v6783_v19  ;;  %5563 = vmatprep.mubr.msk.f32.mxu1 %vm6515_vm0, %v6516_v1 }
0x1c08   :  { %5986 = vmatprep.subr.bf16.mxu1 %v6514_v0 }
0x1c0b   :  { %5988 = vmatpush3.bf16.msra.mxu1 %v6794_v26 }
0x1c0c   :  { %5998 = vmatprep.subr.bf16.mxu1 %v6514_v0 }
0x1c20   :  { %v2715_v24 = vpop.permute.xlu0 %2714 }
0x1c21   :  { %5553 = vmatmul.mubr.msk.f32.vlgmr.msra.gmra.mrb[30].mxu0 %vm149_vm1, %v2715_v24 }
0x1c22   :  { %5991 = vmatpush3.bf16.msra.mxu0 %v6791_v23  ;;  %5574 = vmatprep.mubr.msk.f32.mxu0 %vm6515_vm0, %v6516_v1 }
0x1c23   :  { %5992 = vmatprep.subr.bf16.mxu0 %v6514_v0 }
0x1c26   :  { %5994 = vmatpush3.bf16.msra.mxu0 %v6798_v27 }
0x1c27   :  { %5995 = vmatprep.subr.bf16.mxu0 %v6514_v0 }
0x1cd1   :  { %v2465_v25 = vpop.f32.mrb[22].mxu1 }
0x1cd2   :  { %6224 = vtanh.f32 %v2465_v25  ;;  %v5510_v28 = vpop.f32.mrb[23].mxu1 }
0x1cd9   :  { %v2709_v31 = vpop.f32.mrb[24].mxu1 }
0x1cda   :  { %v5543_v33 = vpop.f32.mrb[25].mxu1 }
0x1cdc   :  { %v6225_v34 = vpop.eup %6224 }
0x1cdd   :  { %2471 = vst.msk [vmem:[#allocation11 + $0x6] sm:$0x3] %vm739_vm4, %v6225_v34 }
0x1cf4   :  { %v2784_v36 = vpop.f32.mrb[30].mxu0 }
0x1cf5   :  { %v2785_v56 = vadd.f32 %v2784_v36, %v2709_v31  ;;  %v5554_v37 = vpop.f32.mrb[31].mxu0 }
0x1cf7   :  { %v2788_v40 = vadd.f32 %v7105_v38, %v2785_v56 }
0x1cf9   :  { %v4917_v11 = vmul.f32 -1.442695, %v2788_v40 }
0x1cfb   :  { %6226 = vpow2.f32 %v4917_v11 }
0x1d05   :  { %v6227_v30 = vpop.eup %6226 }
0x1d06   :  { %v2792_v41 = vadd.f32 1.0, %v6227_v30 }
0x1d08   :  { %6228 = vrcp.f32 %v2792_v41 }
0x1d12   :  { %v6229_v42 = vpop.eup %6228 }
0x1d13   :  { %v2795_v44 = vmul.f32 2.0, %v6229_v42  ;;  %v2797_v52 = vmul.f32 %v6229_v42, %v7027_v35  ;;  %v3050_v35 = vld [vmem:[#allocation2 + $0xa] sm:$0x3] }
0x1d15   :  { %v4918_v45 = vadd.f32 -1.0, %v2795_v44 }
0x1d17   :  { %2799 = vrot.lane.b32.xlu1 %v4918_v45, %s6506_s18 }
0x1d89   :  { %v2800_v17 = vpop.permute.xlu1 %2799 }
0x1d8a   :  { %v2802_v48 = vmul.f32 %v6229_v42, %v2800_v17 }
0x1d8c   :  { %2804 = vrot.lane.b32.xlu0 %v2802_v48, %s6506_s18 }
0x1dfe   :  { %v2805_v53 = vpop.permute.xlu0 %2804 }
0x1dff   :  { %v7111_v54 = vadd.f32 %v2805_v53, %v2797_v52 }
0x1e01   :  { %6230 = vtanh.f32 %v7111_v54 }
0x1e0b   :  { %v6231_v58 = vpop.eup %6230 }
0x1e0c   :  { %2810 = vrot.lane.b32.xlu0 %v6231_v58, %s6506_s18 }
0x1e7e   :  { %v2811_v59 = vpop.permute.xlu0 %2810 }
0x1e7f   :  { %v2813_v60 = vmul.f32 %v6229_v42, %v2811_v59 }
0x1e81   :  { %2815 = vrot.lane.b32.xlu1 %v2813_v60, %s6517_s6 }
0x1ef3   :  { %v7116_v55 = vpop.permute.xlu1 %2815 }
0x1ef4   :  { %5564 = vmatmul.mubr.msk.f32.vlgmr.msra.gmra.mrb[26].mxu1 %vm149_vm1, %v7116_v55  ;;  %5575 = vmatmul.mubr.msk.f32.vlgmr.msra.gmra.mrb[32].mxu0 %vm149_vm1, %v7116_v55 }
0x1ef5   :  { %6000 = vmatpush3.bf16.msra.mxu1 %v6677_v5  ;;  %5592 = vmatprep.mubr.msk.f32.mxu1 %vm6515_vm0, %v6516_v1 }
0x1ef6   :  { %6001 = vmatprep.subr.bf16.mxu1 %v6514_v0  ;;  %5997 = vmatpush3.bf16.msra.mxu0 %v6825_v51 }
0x1ef7   :  { %5581 = vmatprep.mubr.msk.f32.mxu0 %vm6515_vm0, %v6516_v1  ;;  %6010 = vmatprep.subr.bf16.mxu0 %v6514_v0 }
0x1ef9   :  { %6003 = vmatpush3.bf16.msra.mxu1 %v6691_v12 }
0x1efa   :  { %6004 = vmatprep.subr.bf16.mxu1 %v6514_v0 }
0x1efc   :  { %5593 = vmatmul.mubr.msk.f32.vlgmr.msra.gmra.mrb[28].mxu1 %vm149_vm1, %v2715_v24 }
0x1efd   :  { %6006 = vmatpush3.bf16.msra.mxu1 %v6682_v9  ;;  %5603 = vmatprep.mubr.msk.f32.mxu1 %vm6515_vm0, %v6516_v1 }
0x1efe   :  { %6007 = vmatprep.subr.bf16.mxu1 %v6514_v0 }
0x1f01   :  { %6009 = vmatpush3.bf16.msra.mxu1 %v6695_v13 }
0x1f02   :  { %6016 = vmatprep.subr.bf16.mxu1 %v6514_v0 }
0x1f04   :  { %5604 = vmatmul.mubr.msk.f32.vlgmr.msra.gmra.mrb[30].mxu1 %vm149_vm1, %v3050_v35 }
0x1f05   :  { %6018 = vmatpush3.bf16.msra.mxu1 %v6731_v43  ;;  %5625 = vmatprep.mubr.msk.f32.mxu1 %vm6515_vm0, %v6516_v1 }
0x1f06   :  { %6019 = vmatprep.subr.bf16.mxu1 %v6514_v0 }
0x1f09   :  { %6021 = vmatpush3.bf16.msra.mxu1 %v6744_v47 }
0x1f0a   :  { %6028 = vmatprep.subr.bf16.mxu1 %v6514_v0 }
0x1fc7   :  { %v2885_v29 = vpop.f32.mrb[26].mxu1 }
0x1fc8   :  { %v5565_v14 = vpop.f32.mrb[27].mxu1  ;;  %v2886_v18 = vadd.f32 %v7151_v49, %v2885_v29 }
0x1fca   :  { %v2889_v20 = vsel %vm579_vm2, %v2886_v18, -inf }
0x1fcf   :  { %v3117_v61 = vpop.f32.mrb[28].mxu1 }
0x1fd0   :  { %v5594_v62 = vpop.f32.mrb[29].mxu1 }
0x1fd7   :  { %v3190_v63 = vpop.f32.mrb[30].mxu1 }
0x1fd8   :  { %v3191_v2 = vadd.f32 %v3190_v63, %v3117_v61  ;;  %v5605_v4 = vpop.f32.mrb[31].mxu1 }
0x1fda   :  { %v3194_v6 = vadd.f32 %v7065_v50, %v3191_v2 }
0x1fdc   :  { %v4924_v7 = vmul.f32 -1.442695, %v3194_v6 }
0x1fde   :  { %6232 = vpow2.f32 %v4924_v7 }
0x1fe8   :  { %v6233_v32 = vpop.eup %6232 }
0x1fe9   :  { %v3198_v8 = vadd.f32 1.0, %v6233_v32 }
0x1feb   :  { %6234 = vrcp.f32 %v3198_v8 }
0x1ff5   :  { %v6235_v10 = vpop.eup %6234 }
0x1ff6   :  { %v3201_v15 = vmul.f32 2.0, %v6235_v10  ;;  %v3203_v22 = vmul.f32 %v6235_v10, %v7073_v3 }
0x1ff8   :  { %v4925_v16 = vadd.f32 -1.0, %v3201_v15 }
0x1ffa   :  { %3205 = vrot.lane.b32.xlu0 %v4925_v16, %s6506_s18 }
0x2019   :  { %2890 = vmax.xlane.f32.xlu0 %v2889_v20 }
0x206c   :  { %v3206_v57 = vpop.permute.xlu0 %3205 }
0x206d   :  { %v3208_v21 = vmul.f32 %v6235_v10, %v3206_v57 }
0x206f   :  { %3210 = vrot.lane.b32.xlu1 %v3208_v21, %s6506_s18 }
0x20a6   :  { %v2891_v31 = vpop.xlane.xlu0 %2890 }
0x20a7   :  { %v2892_v33 = vsub.f32 %v2886_v18, %v2891_v31 }
0x20a9   :  { %v2893_v34 = vmul.f32 1.442695, %v2892_v33 }
0x20e1   :  { %v3211_v24 = vpop.permute.xlu1 %3210 }
0x20e2   :  { %v7157_v25 = vadd.f32 %v3211_v24, %v3203_v22 }
0x20e4   :  { %6236 = vtanh.f32 %v7157_v25 }
0x20e5   :  { %6238 = vpow2.f32 %v2893_v34 }
0x20ee   :  { %v6237_v28 = vpop.eup %6236 }
0x20ef   :  { %3216 = vrot.lane.b32.xlu1 %v6237_v28, %s6506_s18  ;;  %v6239_v36 = vpop.eup %6238 }
0x20f0   :  { %v2895_v56 = vsel %vm579_vm2, %v6239_v36, 0.0 }
0x2113   :  { %2896 = vadd.xlane.f32.xlu1 %v2895_v56 }
0x2161   :  { %v3217_v37 = vpop.permute.xlu1 %3216 }
0x2162   :  { %v3219_v40 = vmul.f32 %v6235_v10, %v3217_v37 }
0x2164   :  { %3291 = vrot.lane.b32.xlu0 %v3219_v40, %s6517_s6 }
0x21a0   :  { %v2897_v3 = vpop.xlane.xlu1 %2896 }
0x21a1   :  { %6240 = vrcp.f32 %v2897_v3 }
0x21ab   :  { %v6241_v11 = vpop.eup %6240 }
0x21ac   :  { %v2899_v30 = vmul.f32 %v6241_v11, %v2897_v3 }
0x21ae   :  { %v2900_v41 = vsub.f32 2.0, %v2899_v30 }
0x21b0   :  { %v2901_v42 = vmul.f32 %v6241_v11, %v2900_v41 }
0x21b2   :  { %v2902_v44 = vmul.f32 %v6239_v36, %v2901_v42 }
0x21b4   :  { %5582 = vmatmul.mubr.msk.f32.vlgmr.msra.gmra.mrb[32].mxu0 %vm664_vm3, %v2902_v44 }
0x21b5   :  { %6012 = vmatpush3.bf16.msra.mxu0 %v6726_v39  ;;  %5614 = vmatprep.mubr.msk.f32.mxu0 %vm6515_vm0, %v6516_v1 }
0x21b6   :  { %6013 = vmatprep.subr.bf16.mxu0 %v6514_v0 }
0x21b9   :  { %6015 = vmatpush3.bf16.msra.mxu0 %v6740_v46 }
0x21ba   :  { %6022 = vmatprep.subr.bf16.mxu0 %v6514_v0 }
0x21bc   :  { %5615 = vmatmul.mubr.msk.f32.vlgmr.msra.gmra.mrb[34].mxu0 %vm149_vm1, %v7116_v55 }
0x21bd   :  { %6024 = vmatpush3.bf16.msra.mxu0 %v6783_v19  ;;  %5636 = vmatprep.mubr.msk.f32.mxu0 %vm6515_vm0, %v6516_v1 }
0x21be   :  { %6025 = vmatprep.subr.bf16.mxu0 %v6514_v0 }
0x21c1   :  { %6027 = vmatpush3.bf16.msra.mxu0 %v6794_v26 }
0x21c2   :  { %6037 = vmatprep.subr.bf16.mxu0 %v6514_v0 }
0x21d6   :  { %v3292_v45 = vpop.permute.xlu0 %3291 }
0x21d7   :  { %5626 = vmatmul.mubr.msk.f32.vlgmr.msra.gmra.mrb[32].mxu1 %vm149_vm1, %v3292_v45 }
0x21d8   :  { %6030 = vmatpush3.bf16.msra.mxu1 %v6791_v23  ;;  %5647 = vmatprep.mubr.msk.f32.mxu1 %vm6515_vm0, %v6516_v1 }
0x21d9   :  { %6031 = vmatprep.subr.bf16.mxu1 %v6514_v0 }
0x21dc   :  { %6033 = vmatpush3.bf16.msra.mxu1 %v6798_v27 }
0x21dd   :  { %6034 = vmatprep.subr.bf16.mxu1 %v6514_v0 }
0x2287   :  { %v3042_v17 = vpop.f32.mrb[32].mxu0 }
0x2288   :  { %6242 = vtanh.f32 %v3042_v17  ;;  %v5583_v48 = vpop.f32.mrb[33].mxu0 }
0x228f   :  { %v3286_v52 = vpop.f32.mrb[34].mxu0 }
0x2290   :  { %v5616_v53 = vpop.f32.mrb[35].mxu0 }
0x2292   :  { %v6243_v58 = vpop.eup %6242 }
0x2293   :  { %3048 = vst.msk [vmem:[#allocation11 + $0x8] sm:$0x3] %vm739_vm4, %v6243_v58 }
0x22aa   :  { %v3361_v59 = vpop.f32.mrb[32].mxu1 }
0x22ab   :  { %v3362_v60 = vadd.f32 %v3361_v59, %v3286_v52  ;;  %v5627_v55 = vpop.f32.mrb[33].mxu1 }
0x22ad   :  { %v3365_v35 = vadd.f32 %v7105_v38, %v3362_v60 }
0x22af   :  { %v4928_v29 = vmul.f32 -1.442695, %v3365_v35 }
0x22b1   :  { %6244 = vpow2.f32 %v4928_v29 }
0x22bb   :  { %v6245_v14 = vpop.eup %6244 }
0x22bc   :  { %v3369_v61 = vadd.f32 1.0, %v6245_v14 }
0x22be   :  { %6246 = vrcp.f32 %v3369_v61 }
0x22c8   :  { %v6247_v62 = vpop.eup %6246 }
0x22c9   :  { %v3372_v63 = vmul.f32 2.0, %v6247_v62  ;;  %v3374_v7 = vmul.f32 %v6247_v62, %v7111_v54  ;;  %v3627_v54 = vld [vmem:[#allocation2 + $0xc] sm:$0x3] }
0x22cb   :  { %v4929_v2 = vadd.f32 -1.0, %v3372_v63 }
0x22cd   :  { %3376 = vrot.lane.b32.xlu1 %v4929_v2, %s6506_s18 }
0x233f   :  { %v3377_v4 = vpop.permute.xlu1 %3376 }
0x2340   :  { %v3379_v6 = vmul.f32 %v6247_v62, %v3377_v4 }
0x2342   :  { %3381 = vrot.lane.b32.xlu0 %v3379_v6, %s6506_s18 }
0x23b4   :  { %v3382_v32 = vpop.permute.xlu0 %3381 }
0x23b5   :  { %v7190_v8 = vadd.f32 %v3382_v32, %v3374_v7 }
0x23b7   :  { %6248 = vtanh.f32 %v7190_v8 }
0x23c1   :  { %v6249_v10 = vpop.eup %6248 }
0x23c2   :  { %3387 = vrot.lane.b32.xlu0 %v6249_v10, %s6506_s18 }
0x2434   :  { %v3388_v15 = vpop.permute.xlu0 %3387 }
0x2435   :  { %v3390_v16 = vmul.f32 %v6247_v62, %v3388_v15 }
0x2437   :  { %3392 = vrot.lane.b32.xlu1 %v3390_v16, %s6517_s6 }
0x24a9   :  { %v7195_v18 = vpop.permute.xlu1 %3392 }
0x24aa   :  { %5637 = vmatmul.mubr.msk.f32.vlgmr.msra.gmra.mrb[36].mxu0 %vm149_vm1, %v7195_v18  ;;  %5648 = vmatmul.mubr.msk.f32.vlgmr.msra.gmra.mrb[34].mxu1 %vm149_vm1, %v7195_v18 }
0x24ab   :  { %6039 = vmatpush3.bf16.msra.mxu0 %v6677_v5  ;;  %5665 = vmatprep.mubr.msk.f32.mxu0 %vm6515_vm0, %v6516_v1 }
0x24ac   :  { %6040 = vmatprep.subr.bf16.mxu0 %v6514_v0  ;;  %6036 = vmatpush3.bf16.msra.mxu1 %v6825_v51 }
0x24ad   :  { %5654 = vmatprep.mubr.msk.f32.mxu1 %vm6515_vm0, %v6516_v1  ;;  %6049 = vmatprep.subr.bf16.mxu1 %v6514_v0 }
0x24af   :  { %6042 = vmatpush3.bf16.msra.mxu0 %v6691_v12 }
0x24b0   :  { %6043 = vmatprep.subr.bf16.mxu0 %v6514_v0 }
0x24b2   :  { %5666 = vmatmul.mubr.msk.f32.vlgmr.msra.gmra.mrb[38].mxu0 %vm149_vm1, %v3292_v45 }
0x24b3   :  { %6045 = vmatpush3.bf16.msra.mxu0 %v6682_v9  ;;  %5676 = vmatprep.mubr.msk.f32.mxu0 %vm6515_vm0, %v6516_v1 }
0x24b4   :  { %6046 = vmatprep.subr.bf16.mxu0 %v6514_v0 }
0x24b7   :  { %6048 = vmatpush3.bf16.msra.mxu0 %v6695_v13 }
0x24b8   :  { %6055 = vmatprep.subr.bf16.mxu0 %v6514_v0 }
0x24ba   :  { %5677 = vmatmul.mubr.msk.f32.vlgmr.msra.gmra.mrb[40].mxu0 %vm149_vm1, %v3627_v54 }
0x24bb   :  { %6057 = vmatpush3.bf16.msra.mxu0 %v6731_v43  ;;  %5698 = vmatprep.mubr.msk.f32.mxu0 %vm6515_vm0, %v6516_v1 }
0x24bc   :  { %6058 = vmatprep.subr.bf16.mxu0 %v6514_v0 }
0x24bf   :  { %6060 = vmatpush3.bf16.msra.mxu0 %v6744_v47 }
0x24c0   :  { %6067 = vmatprep.subr.bf16.mxu0 %v6514_v0 }
0x257d   :  { %v3462_v20 = vpop.f32.mrb[36].mxu0 }
0x257e   :  { %v5638_v57 = vpop.f32.mrb[37].mxu0  ;;  %v3463_v11 = vadd.f32 %v7151_v49, %v3462_v20 }
0x2580   :  { %v3466_v30 = vsel %vm579_vm2, %v3463_v11, -inf }
0x2585   :  { %v3694_v21 = vpop.f32.mrb[38].mxu0 }
0x2586   :  { %v5667_v22 = vpop.f32.mrb[39].mxu0 }
0x258d   :  { %v3767_v24 = vpop.f32.mrb[40].mxu0 }
0x258e   :  { %v3768_v28 = vadd.f32 %v3767_v24, %v3694_v21  ;;  %v5678_v31 = vpop.f32.mrb[41].mxu0 }
0x2590   :  { %v3771_v33 = vadd.f32 %v7065_v50, %v3768_v28 }
0x2592   :  { %v4935_v34 = vmul.f32 -1.442695, %v3771_v33 }
0x2594   :  { %6250 = vpow2.f32 %v4935_v34 }
0x259e   :  { %v6251_v36 = vpop.eup %6250 }
0x259f   :  { %v3775_v56 = vadd.f32 1.0, %v6251_v36 }
0x25a1   :  { %6252 = vrcp.f32 %v3775_v56 }
0x25ab   :  { %v6253_v37 = vpop.eup %6252 }
0x25ac   :  { %v3778_v40 = vmul.f32 2.0, %v6253_v37  ;;  %v3780_v44 = vmul.f32 %v6253_v37, %v7157_v25 }
0x25ae   :  { %v4936_v3 = vadd.f32 -1.0, %v3778_v40 }
0x25b0   :  { %3782 = vrot.lane.b32.xlu0 %v4936_v3, %s6506_s18 }
0x25cf   :  { %3467 = vmax.xlane.f32.xlu0 %v3466_v30 }
0x2622   :  { %v3783_v41 = vpop.permute.xlu0 %3782 }
0x2623   :  { %v3785_v42 = vmul.f32 %v6253_v37, %v3783_v41 }
0x2625   :  { %3787 = vrot.lane.b32.xlu1 %v3785_v42, %s6506_s18 }
0x265c   :  { %v3468_v52 = vpop.xlane.xlu0 %3467 }
0x265d   :  { %v3469_v53 = vsub.f32 %v3463_v11, %v3468_v52 }
0x265f   :  { %v3470_v58 = vmul.f32 1.442695, %v3469_v53 }
0x2697   :  { %v3788_v45 = vpop.permute.xlu1 %3787 }
0x2698   :  { %v7231_v17 = vadd.f32 %v3788_v45, %v3780_v44 }
0x269a   :  { %6254 = vtanh.f32 %v7231_v17 }
0x269b   :  { %6256 = vpow2.f32 %v3470_v58 }
0x26a4   :  { %v6255_v48 = vpop.eup %6254 }
0x26a5   :  { %3793 = vrot.lane.b32.xlu1 %v6255_v48, %s6506_s18  ;;  %v6257_v59 = vpop.eup %6256 }
0x26a6   :  { %v3472_v60 = vsel %vm579_vm2, %v6257_v59, 0.0 }
0x26c9   :  { %3473 = vadd.xlane.f32.xlu1 %v3472_v60 }
0x2717   :  { %v3794_v55 = vpop.permute.xlu1 %3793 }
0x2718   :  { %v3796_v35 = vmul.f32 %v6253_v37, %v3794_v55 }
0x271a   :  { %3868 = vrot.lane.b32.xlu0 %v3796_v35, %s6517_s6 }
0x2756   :  { %v3474_v25 = vpop.xlane.xlu1 %3473 }
0x2757   :  { %6258 = vrcp.f32 %v3474_v25 }
0x2761   :  { %v6259_v29 = vpop.eup %6258 }
0x2762   :  { %v3476_v14 = vmul.f32 %v6259_v29, %v3474_v25 }
0x2764   :  { %v3477_v61 = vsub.f32 2.0, %v3476_v14 }
0x2766   :  { %v3478_v62 = vmul.f32 %v6259_v29, %v3477_v61 }
0x2768   :  { %v3479_v63 = vmul.f32 %v6257_v59, %v3478_v62 }
0x276a   :  { %5655 = vmatmul.mubr.msk.f32.vlgmr.msra.gmra.mrb[34].mxu1 %vm664_vm3, %v3479_v63 }
0x276b   :  { %6051 = vmatpush3.bf16.msra.mxu1 %v6726_v39  ;;  %5687 = vmatprep.mubr.msk.f32.mxu1 %vm6515_vm0, %v6516_v1 }
0x276c   :  { %6052 = vmatprep.subr.bf16.mxu1 %v6514_v0 }
0x276f   :  { %6054 = vmatpush3.bf16.msra.mxu1 %v6740_v46 }
0x2770   :  { %6061 = vmatprep.subr.bf16.mxu1 %v6514_v0 }
0x2772   :  { %5688 = vmatmul.mubr.msk.f32.vlgmr.msra.gmra.mrb[36].mxu1 %vm149_vm1, %v7195_v18 }
0x2773   :  { %6063 = vmatpush3.bf16.msra.mxu1 %v6783_v19  ;;  %5709 = vmatprep.mubr.msk.f32.mxu1 %vm6515_vm0, %v6516_v1 }
0x2774   :  { %6064 = vmatprep.subr.bf16.mxu1 %v6514_v0 }
0x2777   :  { %6066 = vmatpush3.bf16.msra.mxu1 %v6794_v26 }
0x2778   :  { %6076 = vmatprep.subr.bf16.mxu1 %v6514_v0 }
0x278c   :  { %v3869_v2 = vpop.permute.xlu0 %3868 }
0x278d   :  { %5699 = vmatmul.mubr.msk.f32.vlgmr.msra.gmra.mrb[42].mxu0 %vm149_vm1, %v3869_v2 }
0x278e   :  { %6069 = vmatpush3.bf16.msra.mxu0 %v6791_v23  ;;  %5720 = vmatprep.mubr.msk.f32.mxu0 %vm6515_vm0, %v6516_v1 }
0x278f   :  { %6070 = vmatprep.subr.bf16.mxu0 %v6514_v0 }
0x2792   :  { %6072 = vmatpush3.bf16.msra.mxu0 %v6798_v27 }
0x2793   :  { %6073 = vmatprep.subr.bf16.mxu0 %v6514_v0 }
0x283d   :  { %v3619_v4 = vpop.f32.mrb[34].mxu1 }
0x283e   :  { %6260 = vtanh.f32 %v3619_v4  ;;  %v5656_v6 = vpop.f32.mrb[35].mxu1 }
0x2845   :  { %v3863_v7 = vpop.f32.mrb[36].mxu1 }
0x2846   :  { %v5689_v32 = vpop.f32.mrb[37].mxu1 }
0x2848   :  { %v6261_v10 = vpop.eup %6260 }
0x2849   :  { %3625 = vst.msk [vmem:[#allocation11 + $0xa] sm:$0x3] %vm739_vm4, %v6261_v10 }
0x2860   :  { %v3938_v15 = vpop.f32.mrb[42].mxu0 }
0x2861   :  { %v3939_v16 = vadd.f32 %v3938_v15, %v3863_v7  ;;  %v5700_v18 = vpop.f32.mrb[43].mxu0 }
0x2863   :  { %v3942_v54 = vadd.f32 %v7105_v38, %v3939_v16 }
0x2865   :  { %v4939_v20 = vmul.f32 -1.442695, %v3942_v54 }
0x2867   :  { %6262 = vpow2.f32 %v4939_v20 }
0x2871   :  { %v6263_v57 = vpop.eup %6262 }
0x2872   :  { %v3946_v21 = vadd.f32 1.0, %v6263_v57 }
0x2874   :  { %6264 = vrcp.f32 %v3946_v21 }
0x287e   :  { %v6265_v22 = vpop.eup %6264 }
0x287f   :  { %v3949_v24 = vmul.f32 2.0, %v6265_v22  ;;  %v3951_v34 = vmul.f32 %v6265_v22, %v7190_v8 }
0x2881   :  { %v4940_v28 = vadd.f32 -1.0, %v3949_v24 }
0x2883   :  { %3953 = vrot.lane.b32.xlu1 %v4940_v28, %s6506_s18 }
0x28f5   :  { %v3954_v31 = vpop.permute.xlu1 %3953 }
0x28f6   :  { %v3956_v33 = vmul.f32 %v6265_v22, %v3954_v31 }
0x28f8   :  { %3958 = vrot.lane.b32.xlu0 %v3956_v33, %s6506_s18 }
0x296a   :  { %v3959_v36 = vpop.permute.xlu0 %3958 }
0x296b   :  { %v7264_v56 = vadd.f32 %v3959_v36, %v3951_v34 }
0x296d   :  { %6266 = vtanh.f32 %v7264_v56 }
0x2977   :  { %v6267_v37 = vpop.eup %6266 }
0x2978   :  { %3964 = vrot.lane.b32.xlu0 %v6267_v37, %s6506_s18 }
0x29ea   :  { %v3965_v40 = vpop.permute.xlu0 %3964 }
0x29eb   :  { %v3967_v3 = vmul.f32 %v6265_v22, %v3965_v40 }
0x29ed   :  { %3969 = vrot.lane.b32.xlu1 %v3967_v3, %s6517_s6 }
0x2a5f   :  { %v7269_v11 = vpop.permute.xlu1 %3969 }
0x2a60   :  { %5710 = vmatmul.mubr.msk.f32.vlgmr.msra.gmra.mrb[38].mxu1 %vm149_vm1, %v7269_v11  ;;  %5721 = vmatmul.mubr.msk.f32.vlgmr.msra.gmra.mrb[44].mxu0 %vm149_vm1, %v7269_v11 }
0x2a61   :  { %6078 = vmatpush3.bf16.msra.mxu1 %v6677_v5  ;;  %5738 = vmatprep.mubr.msk.f32.mxu1 %vm6515_vm0, %v6516_v1  ;;  %v4204_v5 = vld [vmem:[#allocation2 + $0xe] sm:$0x3] }
0x2a62   :  { %6079 = vmatprep.subr.bf16.mxu1 %v6514_v0  ;;  %6075 = vmatpush3.bf16.msra.mxu0 %v6825_v51 }
0x2a63   :  { %5727 = vmatprep.mubr.msk.f32.mxu0 %vm6515_vm0, %v6516_v1  ;;  %6088 = vmatprep.subr.bf16.mxu0 %v6514_v0 }
0x2a65   :  { %6081 = vmatpush3.bf16.msra.mxu1 %v6691_v12 }
0x2a66   :  { %6082 = vmatprep.subr.bf16.mxu1 %v6514_v0 }
0x2a68   :  { %5739 = vmatmul.mubr.msk.f32.vlgmr.msra.gmra.mrb[40].mxu1 %vm149_vm1, %v3869_v2 }
0x2a69   :  { %6084 = vmatpush3.bf16.msra.mxu1 %v6682_v9  ;;  %5749 = vmatprep.mubr.msk.f32.mxu1 %vm6515_vm0, %v6516_v1 }
0x2a6a   :  { %6085 = vmatprep.subr.bf16.mxu1 %v6514_v0 }
0x2a6d   :  { %6087 = vmatpush3.bf16.msra.mxu1 %v6695_v13 }
0x2a6e   :  { %6094 = vmatprep.subr.bf16.mxu1 %v6514_v0 }
0x2a70   :  { %5750 = vmatmul.mubr.msk.f32.vlgmr.msra.gmra.mrb[42].mxu1 %vm149_vm1, %v4204_v5 }
0x2a71   :  { %6096 = vmatpush3.bf16.msra.mxu1 %v6731_v43  ;;  %5771 = vmatprep.mubr.msk.f32.mxu1 %vm6515_vm0, %v6516_v1 }
0x2a72   :  { %6097 = vmatprep.subr.bf16.mxu1 %v6514_v0 }
0x2a75   :  { %6099 = vmatpush3.bf16.msra.mxu1 %v6744_v47 }
0x2a76   :  { %6106 = vmatprep.subr.bf16.mxu1 %v6514_v0 }
0x2b33   :  { %v4039_v9 = vpop.f32.mrb[38].mxu1 }
0x2b34   :  { %v5711_v12 = vpop.f32.mrb[39].mxu1  ;;  %v4040_v47 = vadd.f32 %v7151_v49, %v4039_v9 }
0x2b36   :  { %v4043_v59 = vsel %vm579_vm2, %v4040_v47, -inf }
0x2b3b   :  { %v4271_v8 = vpop.f32.mrb[40].mxu1 }
0x2b3c   :  { %v5740_v13 = vpop.f32.mrb[41].mxu1 }
0x2b43   :  { %v4344_v30 = vpop.f32.mrb[42].mxu1 }
0x2b44   :  { %v4345_v41 = vadd.f32 %v4344_v30, %v4271_v8  ;;  %v5751_v42 = vpop.f32.mrb[43].mxu1 }
0x2b46   :  { %v4348_v44 = vadd.f32 %v7065_v50, %v4345_v41 }
0x2b48   :  { %v4946_v45 = vmul.f32 -1.442695, %v4348_v44 }
0x2b4a   :  { %6268 = vpow2.f32 %v4946_v45 }
0x2b54   :  { %v6269_v43 = vpop.eup %6268 }
0x2b55   :  { %v4352_v48 = vadd.f32 1.0, %v6269_v43 }
0x2b57   :  { %6270 = vrcp.f32 %v4352_v48 }
0x2b61   :  { %v6271_v52 = vpop.eup %6270 }
0x2b62   :  { %v4355_v53 = vmul.f32 2.0, %v6271_v52  ;;  %v4357_v50 = vmul.f32 %v6271_v52, %v7231_v17 }
0x2b64   :  { %v4947_v58 = vadd.f32 -1.0, %v4355_v53 }
0x2b66   :  { %4359 = vrot.lane.b32.xlu0 %v4947_v58, %s6506_s18 }
0x2b85   :  { %4044 = vmax.xlane.f32.xlu0 %v4043_v59 }
0x2bd8   :  { %v4360_v60 = vpop.permute.xlu0 %4359 }
0x2bd9   :  { %v4362_v55 = vmul.f32 %v6271_v52, %v4360_v60 }
0x2bdb   :  { %4364 = vrot.lane.b32.xlu1 %v4362_v55, %s6506_s18 }
0x2c12   :  { %v4045_v14 = vpop.xlane.xlu0 %4044 }
0x2c13   :  { %v4046_v61 = vsub.f32 %v4040_v47, %v4045_v14 }
0x2c15   :  { %v4047_v62 = vmul.f32 1.442695, %v4046_v61 }
0x2c4d   :  { %v4365_v35 = vpop.permute.xlu1 %4364 }
0x2c4e   :  { %v7305_v25 = vadd.f32 %v4365_v35, %v4357_v50 }
0x2c50   :  { %6272 = vtanh.f32 %v7305_v25 }
0x2c51   :  { %6274 = vpow2.f32 %v4047_v62 }
0x2c5a   :  { %v6273_v29 = vpop.eup %6272 }
0x2c5b   :  { %4370 = vrot.lane.b32.xlu1 %v6273_v29, %s6506_s18  ;;  %v6275_v63 = vpop.eup %6274 }
0x2c5c   :  { %v4049_v2 = vsel %vm579_vm2, %v6275_v63, 0.0 }
0x2c7f   :  { %4050 = vadd.xlane.f32.xlu1 %v4049_v2 }
0x2ccd   :  { %v4371_v4 = vpop.permute.xlu1 %4370 }
0x2cce   :  { %v4373_v6 = vmul.f32 %v6271_v52, %v4371_v4 }
0x2cd0   :  { %4445 = vrot.lane.b32.xlu0 %v4373_v6, %s6517_s6 }
0x2d0c   :  { %v4051_v17 = vpop.xlane.xlu1 %4050 }
0x2d0d   :  { %6276 = vrcp.f32 %v4051_v17 }
0x2d17   :  { %v6277_v7 = vpop.eup %6276 }
0x2d18   :  { %v4053_v32 = vmul.f32 %v6277_v7, %v4051_v17 }
0x2d1a   :  { %v4054_v10 = vsub.f32 2.0, %v4053_v32 }
0x2d1c   :  { %v4055_v15 = vmul.f32 %v6277_v7, %v4054_v10 }
0x2d1e   :  { %v4056_v16 = vmul.f32 %v6275_v63, %v4055_v15 }
0x2d20   :  { %5728 = vmatmul.mubr.msk.f32.vlgmr.msra.gmra.mrb[44].mxu0 %vm664_vm3, %v4056_v16 }
0x2d21   :  { %6090 = vmatpush3.bf16.msra.mxu0 %v6726_v39  ;;  %5760 = vmatprep.mubr.msk.f32.mxu0 %vm6515_vm0, %v6516_v1 }
0x2d22   :  { %6091 = vmatprep.subr.bf16.mxu0 %v6514_v0 }
0x2d25   :  { %6093 = vmatpush3.bf16.msra.mxu0 %v6740_v46 }
0x2d26   :  { %6100 = vmatprep.subr.bf16.mxu0 %v6514_v0 }
0x2d28   :  { %5761 = vmatmul.mubr.msk.f32.vlgmr.msra.gmra.mrb[46].mxu0 %vm149_vm1, %v7269_v11 }
0x2d29   :  { %6102 = vmatpush3.bf16.msra.mxu0 %v6783_v19  ;;  %5782 = vmatprep.mubr.msk.f32.mxu0 %vm6515_vm0, %v6516_v1 }
0x2d2a   :  { %6103 = vmatprep.subr.bf16.mxu0 %v6514_v0 }
0x2d2d   :  { %6105 = vmatpush3.bf16.msra.mxu0 %v6794_v26 }
0x2d42   :  { %v4446_v39 = vpop.permute.xlu0 %4445 }
0x2d43   :  { %4781 = vst.msk [vmem:[#allocation12] sm:$0x3] %vm739_vm4, %v4446_v39  ;;  %5772 = vmatmul.mubr.msk.f32.vlgmr.msra.gmra.mrb[44].mxu1 %vm149_vm1, %v4446_v39 }
0x2d44   :  { %6108 = vmatpush3.bf16.msra.mxu1 %v6791_v23  ;;  %5793 = vmatprep.mubr.msk.f32.mxu1 %vm6515_vm0, %v6516_v1 }
0x2d45   :  { %6109 = vmatprep.subr.bf16.mxu1 %v6514_v0 }
0x2d48   :  { %6111 = vmatpush3.bf16.msra.mxu1 %v6798_v27 }
0x2d49   :  { %6112 = vmatprep.subr.bf16.mxu1 %v6514_v0 }
0x2df3   :  { %v4196_v46 = vpop.f32.mrb[44].mxu0 }
0x2df4   :  { %6278 = vtanh.f32 %v4196_v46  ;;  %v5729_v19 = vpop.f32.mrb[45].mxu0 }
0x2dfb   :  { %v4440_v26 = vpop.f32.mrb[46].mxu0 }
0x2dfc   :  { %v5762_v18 = vpop.f32.mrb[47].mxu0 }
0x2dfe   :  { %v6279_v54 = vpop.eup %6278 }
0x2dff   :  { %4202 = vst.msk [vmem:[#allocation11 + $0xc] sm:$0x3] %vm739_vm4, %v6279_v54 }
0x2e16   :  { %v4515_v20 = vpop.f32.mrb[44].mxu1 }
0x2e17   :  { %v4516_v57 = vadd.f32 %v4515_v20, %v4440_v26  ;;  %v5773_v23 = vpop.f32.mrb[45].mxu1 }
0x2e19   :  { %v4519_v21 = vadd.f32 %v7105_v38, %v4516_v57 }
0x2e1b   :  { %v4950_v22 = vmul.f32 -1.442695, %v4519_v21 }
0x2e1d   :  { %6280 = vpow2.f32 %v4950_v22 }
0x2e27   :  { %v6281_v24 = vpop.eup %6280 }
0x2e28   :  { %v4523_v28 = vadd.f32 1.0, %v6281_v24 }
0x2e2a   :  { %6282 = vrcp.f32 %v4523_v28 }
0x2e34   :  { %v6283_v27 = vpop.eup %6282 }
0x2e35   :  { %v4526_v0 = vmul.f32 2.0, %v6283_v27  ;;  %v4528_v36 = vmul.f32 %v6283_v27, %v7264_v56 }
0x2e37   :  { %v4951_v31 = vadd.f32 -1.0, %v4526_v0 }
0x2e39   :  { %4530 = vrot.lane.b32.xlu1 %v4951_v31, %s6506_s18 }
0x2eab   :  { %v4531_v33 = vpop.permute.xlu1 %4530 }
0x2eac   :  { %v4533_v34 = vmul.f32 %v6283_v27, %v4531_v33 }
0x2eae   :  { %4535 = vrot.lane.b32.xlu0 %v4533_v34, %s6506_s18 }
0x2f20   :  { %v4536_v37 = vpop.permute.xlu0 %4535 }
0x2f21   :  { %v4538_v40 = vadd.f32 %v4536_v37, %v4528_v36 }
0x2f23   :  { %6284 = vtanh.f32 %v4538_v40 }
0x2f2d   :  { %v6285_v38 = vpop.eup %6284 }
0x2f2e   :  { %4541 = vrot.lane.b32.xlu0 %v6285_v38, %s6506_s18 }
0x2fa0   :  { %v4542_v3 = vpop.permute.xlu0 %4541 }
0x2fa1   :  { %v4544_v11 = vmul.f32 %v6283_v27, %v4542_v3 }
0x2fa3   :  { %4546 = vrot.lane.b32.xlu1 %v4544_v11, %s6517_s6 }
0x3015   :  { %v4547_v5 = vpop.permute.xlu1 %4546 }
0x3016   :  { %4789 = vst.msk [vmem:[#allocation12 + $0x2] sm:$0x3] %vm739_vm4, %v4547_v5  ;;  %5783 = vmatmul.mubr.msk.f32.vlgmr.msra.gmra.mrb[48].mxu0 %vm149_vm1, %v4547_v5  ;;  %5794 = vmatmul.mubr.msk.f32.vlgmr.msra.gmra.mrb[46].mxu1 %vm149_vm1, %v4547_v5 }
0x3017   :  { %6114 = vmatpush3.bf16.msra.mxu1 %v6825_v51  ;;  %5800 = vmatprep.mubr.msk.f32.mxu1 %vm6515_vm0, %v6516_v1 }
0x30e9   :  { %v4616_v56 = vpop.f32.mrb[48].mxu0 }
0x30ea   :  { %v4617_v9 = vadd.f32 %v7151_v49, %v4616_v56  ;;  %v5784_v12 = vpop.f32.mrb[49].mxu0 }
0x30ec   :  { %v4620_v8 = vsel %vm579_vm2, %v4617_v9, -inf }
0x30ed   :  { %4621 = vmax.xlane.f32.xlu0 %v4620_v8 }
0x3103   :  { %4783 = vrot.lane.b32.xlu0 %v7305_v25, %s6518_s5 }
0x317a   :  { %v4622_v13 = vpop.xlane.xlu0 %4621 }
0x317b   :  { %v4623_v30 = vsub.f32 %v4617_v9, %v4622_v13 }
0x317d   :  { %v4624_v41 = vmul.f32 1.442695, %v4623_v30 }
0x317e   :  { %v4784_v42 = vpop.permute.xlu0 %4783 }
0x317f   :  { %6286 = vpow2.f32 %v4624_v41  ;;  %4786 = vst.msk [vmem:[#allocation14] sm:$0x3] %vm739_vm4, %v4784_v42 }
0x3189   :  { %v6287_v51 = vpop.eup %6286 }
0x318a   :  { %v4626_v1 = vsel %vm579_vm2, %v6287_v51, 0.0 }
0x318b   :  { %4627 = vadd.xlane.f32.xlu1 %v4626_v1 }
0x319c   :  { %4791 = vrot.lane.b32.xlu1 %v4538_v40, %s6518_s5 }
0x3218   :  { %v4628_v49 = vpop.xlane.xlu1 %4627 }
0x3219   :  { %6288 = vrcp.f32 %v4628_v49 }
0x321c   :  { %v4792_v44 = vpop.permute.xlu1 %4791 }
0x321d   :  { %4795 = vst.msk [vmem:[#allocation14 + $0x2] sm:$0x3] %vm739_vm4, %v4792_v44 }
0x3223   :  { %v6289_v45 = vpop.eup %6288 }
0x3224   :  { %v4630_v43 = vmul.f32 %v6289_v45, %v4628_v49 }
0x3226   :  { %v4631_v48 = vsub.f32 2.0, %v4630_v43 }
0x3228   :  { %v4632_v52 = vmul.f32 %v6289_v45, %v4631_v48 }
0x322a   :  { %v4633_v53 = vmul.f32 %v6287_v51, %v4632_v52 }
0x322c   :  { %4796 = vst.msk [vmem:[#allocation15] sm:$0x3] %vm579_vm2, %v4633_v53  ;;  %5801 = vmatmul.mubr.msk.f32.vlgmr.msra.gmra.mrb[46].mxu1 %vm664_vm3, %v4633_v53 }
0x322d   :  { %6416 = shalt.err (!%p6413_p2)
}
0x322e   :  { %s6417_s6 = scalar_lea.hbm %s7423_s11, 64 }
0x322f   :  { %p6418_p3 = scmp.ne.s32.totalorder %s7423_s11, %s6417_s6  ;;  %p6421_p4 = scmp.lt.u32.totalorder %s6417_s6, %s7423_s11 }
0x3231   :  { %p6423_p5 = pnand %p6421_p4, %p6418_p3 }
0x3233   :  { %6426 = shalt.err (!%p6423_p5)
}
0x3234   :  { %4820 = dma.vmem_to_hbm [thread:$0]  %s4815_s4, 64, %s7423_s11, [#allocation13], %s6506_s18, %s6506_s18, %s6507_s19  }
0x3235   :  { %s6520_s0 = smov [#allocation14]   ;;  %s6521_s15 = smov [#allocation15]  }
0x3236   :  { %s4826_s25 = sshll.u32 %s6520_s0, 4  ;;  %s4839_s7 = sshll.u32 %s6521_s15, 4  ;;  %s4827_s25 = int_to_ptr.vmem [resolvable:$true] %s4826_s25  ;;  %s4840_s7 = int_to_ptr.vmem [resolvable:$true] %s4839_s7 }
0x3237   :  { %s6427_s3 = scalar_lea.vmem %s4827_s25, 64  ;;  %p6432_p7 = scmp.lt.s32.totalorder %s4827_s25, %s4827_s25 }
0x3238   :  { %p6428_p6 = scmp.ne.s32.totalorder %s4827_s25, %s6427_s3  ;;  %p6433_p8 = scmp.lt.s32.totalorder %s6427_s3, %s6427_s3 }
0x323a   :  { %p6434_p9 = por %p6433_p8, %p6432_p7 }
0x323c   :  { %p6435_p10 = pnand %p6434_p9, %p6428_p6 }
0x323e   :  { %6438 = shalt.err (!%p6435_p10)
}
0x323f   :  { %s6439_s20 = scalar_lea.hbm %s7424_s12, 64 }
0x3240   :  { %p6440_p11 = scmp.ne.s32.totalorder %s7424_s12, %s6439_s20  ;;  %p6443_p12 = scmp.lt.u32.totalorder %s6439_s20, %s7424_s12 }
0x3242   :  { %p6445_p13 = pnand %p6443_p12, %p6440_p11 }
0x3244   :  { %6448 = shalt.err (!%p6445_p13)
}
0x3245   :  { %4832 = dma.vmem_to_hbm [thread:$0]  %s4827_s25, 64, %s7424_s12, [#allocation13], %s6506_s18, %s6506_s18, %s6507_s19  }
0x3246   :  { %s6449_s28 = scalar_lea.vmem %s4840_s7, 32  ;;  %p6454_p1 = scmp.lt.s32.totalorder %s4840_s7, %s4840_s7 }
0x3247   :  { %p6450_p0 = scmp.ne.s32.totalorder %s4840_s7, %s6449_s28  ;;  %p6455_p2 = scmp.lt.s32.totalorder %s6449_s28, %s6449_s28 }
0x3249   :  { %p6456_p3 = por %p6455_p2, %p6454_p1 }
0x324b   :  { %p6457_p4 = pnand %p6456_p3, %p6450_p0 }
0x324d   :  { %6460 = shalt.err (!%p6457_p4)
}
0x324e   :  { %s6461_s9 = scalar_lea.hbm %s7425_s13, 32 }
0x324f   :  { %p6462_p5 = scmp.ne.s32.totalorder %s7425_s13, %s6461_s9  ;;  %p6465_p6 = scmp.lt.u32.totalorder %s6461_s9, %s7425_s13 }
0x3251   :  { %p6467_p7 = pnand %p6465_p6, %p6462_p5 }
0x3253   :  { %6470 = shalt.err (!%p6467_p7)
}
0x3254   :  { %4842 = dma.vmem_to_hbm [thread:$0]  %s4840_s7, 32, %s7425_s13, [#allocation16]  }
0x3255   :  { %s6522_s29 = smov [#allocation11]  }
0x3256   :  { %s4802_s30 = sshll.u32 %s6522_s29, 4  ;;  %s4803_s30 = int_to_ptr.vmem [resolvable:$true] %s4802_s30 }
0x3257   :  { %s6471_s14 = scalar_lea.vmem %s4803_s30, 256  ;;  %p6476_p9 = scmp.lt.s32.totalorder %s4803_s30, %s4803_s30 }
0x3258   :  { %p6472_p8 = scmp.ne.s32.totalorder %s4803_s30, %s6471_s14  ;;  %p6477_p10 = scmp.lt.s32.totalorder %s6471_s14, %s6471_s14 }
0x325a   :  { %p6478_p11 = por %p6477_p10, %p6476_p9 }
0x325c   :  { %p6479_p12 = pnand %p6478_p11, %p6472_p8 }
0x32ff   :  { %v4773_v58 = vpop.f32.mrb[46].mxu1 }
0x3300   :  { %6290 = vtanh.f32 %v4773_v58  ;;  %v5802_v47 = vpop.f32.mrb[47].mxu1 }
0x330a   :  { %v6291_v59 = vpop.eup %6290 }
0x330b   :  { %4779 = vst.msk [vmem:[#allocation11 + $0xe] sm:$0x3] %vm739_vm4, %v6291_v59 }
0x330c   :  { %6482 = shalt.err (!%p6479_p12)
}
0x330d   :  { %s6483_s13 = scalar_lea.hbm %s7422_s10, 256 }
0x330e   :  { %p6484_p13 = scmp.ne.s32.totalorder %s7422_s10, %s6483_s13  ;;  %p6487_p0 = scmp.lt.u32.totalorder %s6483_s13, %s7422_s10 }
0x3310   :  { %p6489_p1 = pnand %p6487_p0, %p6484_p13 }
0x3312   :  { %6492 = shalt.err (!%p6489_p1)
}
0x3313   :  { %4808 = dma.vmem_to_hbm [thread:$0]  %s4803_s30, 256, %s7422_s10, [#allocation4], %s6506_s18, %s6506_s18, %s6507_s19  }
0x3314   :  { %6499 = dma.done.wait [#allocation4], 256  }
0x3315   :  { %6500 = vsyncadd [#allocation4], 4294967040 }
0x3316   :  { %6501 = dma.done.wait [#allocation13], 128  }
0x3317   :  { %6502 = vsyncadd [#allocation13], 4294967168 }
0x3318   :  { %6503 = dma.done.wait [#allocation16], 32  }
0x3319   :  { %6504 = vsyncadd [#allocation16], 4294967264 }
0x331a   :  { %4855 = vsyncpa [#allocation3], 1 }
0x331b   :  { %4856 = vsyncpa [#allocation6], 1 }
0x331c   :  { %4857 = vsyncpa [#allocation9], 1 }
0x331d   :  { %4858 = vsyncpa [#allocation4], 1 }
0x331e   :  { %4859 = vsyncpa [#allocation13], 1 }
0x331f   :  { %4860 = vsyncpa [#allocation16], 1 }

</bundles_post_ra>
